<compile_context>
chip_gen: v7x
topology: tpu7x:2x2x1
jax: 0.10.0
libtpu: 0.0.40
codegen_flags: <defaults>
</compile_context>

<pallas_src>
import numpy as np

import jax
import jax.numpy as jnp
from jax.experimental import pallas as pl
from jax.experimental.pallas import tpu as pltpu


# ------------------------------ Pallas kernel ------------------------------

def _lenet_kernel(x_ref, scat_ref, rowpad_ref,
                  w1_ref, b1_ref, pw1_ref, ph1_ref,
                  w3_ref, b3_ref, pw2_ref, ph2_ref,
                  w5_ref, b5_ref, w6_ref, b6_ref, w7_ref, b7_ref,
                  eye_ref, out_ref):
    f32 = jnp.float32
    B = out_ref.shape[0]            # batch (static)

    def mm(a, b):
        return jnp.dot(a, b, preferred_element_type=f32)

    # --- input: (B,28,28) -> height/width padded, lane=(w,b) tile (32, 32*B) --
    # xin[h+2, (w+2)*B + b] = x[b, h, w]; exact 0/1 scatter matmuls, so the
    # wrapper needs no pad/transpose/reshape glue around the kernel.
    xs = mm(x_ref[0], scat_ref[0])
    for b in range(1, B):
        xs = xs + mm(x_ref[b], scat_ref[b])
    xin = mm(rowpad_ref[...], xs)                        # (32, 32*B)

    def conv(act, w_ref, b_ref, w_out):
        # 5x5 "valid" conv in the (c*h, w*B+b) layout.  The 5 width taps are
        # static lane-shift slices (XLU work, no shift/selection matmuls); they
        # are stacked along sublanes (each tap block is a multiple of 8 rows,
        # so the concat is tile aligned) and consumed by ONE fused MXU matmul
        # against the host-prebuilt concatenated weight matrix.
        n = w_out * B
        stacked = jnp.concatenate(
            [act[:, dj * B: dj * B + n] for dj in range(5)], axis=0)
        return jnp.maximum(mm(w_ref[...], stacked) + b_ref[...], 0.0)

    def pool(act, pw_ref, ph_ref):
        # 2x2/stride-2 max pool: shifted max along lanes, then sublanes (static
        # slices), each followed by one exact precomputed 0/1 down-select
        # matmul.  No in-kernel iota/compare work, 2 matmuls instead of 4.
        lw = mm(jnp.maximum(act[:, :-B], act[:, B:]), pw_ref[...])
        return mm(ph_ref[...], jnp.maximum(lw[:-1, :], lw[1:, :]))

    a1 = conv(xin, w1_ref, b1_ref, 28)        # (6*28, 28*B)
    p1 = pool(a1, pw1_ref, ph1_ref)           # (6*16, 14*B)   (h padded 14->16)
    a3 = conv(p1, w3_ref, b3_ref, 10)         # (16*10, 10*B)
    p2 = pool(a3, pw2_ref, ph2_ref)           # (16*5, 5*B)
    a5 = conv(p2, w5_ref, b5_ref, 1)          # (120, B)       conv5: 5x5 -> 1x1
    a6 = jnp.maximum(mm(w6_ref[...], a5) + b6_ref[...], 0.0)    # (84, B)
    logits = mm(w7_ref[...], a6) + b7_ref[...]                   # (10, B)

    # log_softmax over dim=0 of the logical (B,10) output == lane axis here.
    m = jnp.max(logits, axis=1, keepdims=True)
    lse = m + jnp.log(jnp.sum(jnp.exp(logits - m), axis=1, keepdims=True))
    lsm = logits - lse                                           # (10, B)

    # Store directly in the caller's (B,10) layout: out[b,c] = lsm[c,b], done
    # on the MXU as eye(B) @ lsm^T (transposed-rhs dot_general) -> no wrapper .T
    out_ref[...] = jax.lax.dot_general(
        eye_ref[...], lsm, (((1,), (1,)), ((), ())),
        preferred_element_type=f32)


# ------------------------------- JAX wrapper --------------------------------

def _full_spec(a):
    nd = a.ndim
    return pl.BlockSpec(a.shape, lambda i, nd=nd: (0,) * nd)


def net_forward(params, x):
    """x: (B, 1, 28, 28) float32 -> (B, 10) log-probabilities (dim=0 softmax).

    The whole network is ONE pallas_call; all layout glue (input pad /
    batch->lane transpose, output transpose) lives inside the kernel, so there
    are no surrounding micro-HLOs.  `params` must come from prepare_params()
    with the same batch size.
    """
    B = x.shape[0]
    weight_args = (params["scat"], params["rowpad"],
                   params["w1c"], params["b1"], params["pw1"], params["ph1"],
                   params["w3c"], params["b3"], params["pw2"], params["ph2"],
                   params["w5c"], params["b5"],
                   params["w6"], params["b6"], params["w7"], params["b7"],
                   params["eye"])
    x_spec = pl.BlockSpec((B, None, 28, 28), lambda i: (0, 0, 0, 0))
    return pl.pallas_call(
        _lenet_kernel,
        out_shape=jax.ShapeDtypeStruct((B, 10), jnp.float32),
        grid=(1,),
        in_specs=[x_spec] + [_full_spec(a) for a in weight_args],
        out_specs=pl.BlockSpec((B, 10), lambda i: (0, 0)),
        compiler_params=pltpu.CompilerParams(
            # grid=(1,): a single TensorCore program (weights < 1 MiB in VMEM).
            # For large batches, add a leading "parallel" batch grid axis to
            # use both v7x TensorCores.
            dimension_semantics=("arbitrary",),
            vmem_limit_bytes=32 * 1024 * 1024),
    )(x, *weight_args)


# -------------------- one-time weight re-layout (at init) -------------------

def prepare_params(p, batch):
    """PyTorch-shaped params -> kernel-ready fused matrices (host, one-time)."""
    B = int(batch)
    f32 = np.float32

    def conv_left(w, h_in, h_out, pad):
        # (Cout,Cin,5,5) -> (Cout*h_out, 5*Cin*h_in) acting on the tap-stacked
        # activation whose rows are (dj, ci, h_in).
        w = np.asarray(w, f32)
        cout, cin, kh, kw = w.shape
        m = np.zeros((cout, h_out, kw, cin, h_in), f32)
        for di in range(kh):
            for ho in range(h_out):
                hi = ho + di - pad
                if 0 <= hi < h_in:
                    m[:, ho, :, :, hi] = np.transpose(w[:, :, di, :], (0, 2, 1))
        return m.reshape(cout * h_out, kw * cin * h_in)

    # input scatter: image column w of sample b -> lane (w+2)*B + b (width pad 2)
    scat = np.zeros((B, 28, 32 * B), f32)
    for b in range(B):
        for w in range(28):
            scat[b, w, (w + 2) * B + b] = 1.0
    # row pad: image row h -> padded row h+2 (height pad 2)
    rowpad = np.zeros((32, 28), f32)
    for h in range(28):
        rowpad[h + 2, h] = 1.0

    def pool_col_select(w_in):                 # (B*(w_in-1), B*(w_in//2))
        w_out = w_in // 2
        m = np.zeros((B * (w_in - 1), B * w_out), f32)
        for w in range(w_out):
            for b in range(B):
                m[2 * w * B + b, w * B + b] = 1.0
        return m

    def pool_row_select(c, h_in, h_rows):      # (c*h_rows, c*h_in - 1)
        m = np.zeros((c * h_rows, c * h_in - 1), f32)
        for ci in range(c):
            for h in range(h_in // 2):
                m[ci * h_rows + h, ci * h_in + 2 * h] = 1.0
        return m

    def bias_col(b, reps):
        return np.repeat(np.asarray(b, f32), reps).reshape(-1, 1)

    out = {
        "scat": scat, "rowpad": rowpad,
        # conv1 sees the height-padded 32-row input, so pad=0 here.
        "w1c": conv_left(p["conv1_w"], 32, 28, 0), "b1": bias_col(p["conv1_b"], 28),
        "pw1": pool_col_select(28),
        # pool1 output uses 16 rows/channel (14 data + 2 zero) so conv3's tap
        # blocks are multiples of 8 sublanes.
        "ph1": pool_row_select(6, 28, 16),
        "w3c": conv_left(p["conv3_w"], 16, 10, 0), "b3": bias_col(p["conv3_b"], 10),
        "pw2": pool_col_select(10),
        "ph2": pool_row_select(16, 10, 5),
        "w5c": conv_left(p["conv5_w"], 5, 1, 0), "b5": bias_col(p["conv5_b"], 1),
        "w6": np.asarray(p["fc6_w"], f32), "b6": bias_col(p["fc6_b"], 1),
        "w7": np.asarray(p["fc7_w"], f32), "b7": bias_col(p["fc7_b"], 1),
        "eye": np.eye(B, dtype=f32),
    }
    return {k: jnp.asarray(v) for k, v in out.items()}


def init_torch_params(key):
    ks = jax.random.split(key, 10)

    def u(k, shape, fan_in):
        bound = 1.0 / jnp.sqrt(jnp.float32(fan_in))
        return jax.random.uniform(k, shape, jnp.float32, -bound, bound)

    return {
        "conv1_w": u(ks[0], (6, 1, 5, 5), 1 * 25), "conv1_b": u(ks[1], (6,), 1 * 25),
        "conv3_w": u(ks[2], (16, 6, 5, 5), 6 * 25), "conv3_b": u(ks[3], (16,), 6 * 25),
        "conv5_w": u(ks[4], (120, 16, 5, 5), 16 * 25), "conv5_b": u(ks[5], (120,), 16 * 25),
        "fc6_w": u(ks[6], (84, 120), 120), "fc6_b": u(ks[7], (84,), 120),
        "fc7_w": u(ks[8], (10, 84), 84), "fc7_b": u(ks[9], (10,), 84),
    }


# --------------------------- pure-JAX reference -----------------------------

def net_forward_ref(p, x):
    hp = jax.lax.Precision.HIGHEST

    def conv(x, w, b, pad):
        y = jax.lax.conv_general_dilated(
            x, w, window_strides=(1, 1), padding=[(pad, pad), (pad, pad)],
            dimension_numbers=("NCHW", "OIHW", "NCHW"), precision=hp)
        return y + b.reshape(1, -1, 1, 1)

    def pool(x):
        return jax.lax.reduce_window(x, -jnp.inf, jax.lax.max,
                                     (1, 1, 2, 2), (1, 1, 2, 2), "VALID")

    a = pool(jax.nn.relu(conv(x, p["conv1_w"], p["conv1_b"], 2)))
    a = pool(jax.nn.relu(conv(a, p["conv3_w"], p["conv3_b"], 0)))
    a = jax.nn.relu(conv(a, p["conv5_w"], p["conv5_b"], 0))
    a = a.reshape(-1, 120)
    a = jax.nn.relu(jnp.dot(a, p["fc6_w"].T, precision=hp) + p["fc6_b"])
    a = jnp.dot(a, p["fc7_w"].T, precision=hp) + p["fc7_b"]
    return jax.nn.log_softmax(a, axis=0)       # dim=0, as in the reference module


if __name__ == "__main__":
    key = jax.random.PRNGKey(0)
    k_params, k_x = jax.random.split(key)
    torch_params = init_torch_params(k_params)

    B = 2
    params = prepare_params(torch_params, batch=B)   # one-time host re-layout
    x = jax.random.normal(k_x, (B, 1, 28, 28), dtype=jnp.float32)

    out = jax.jit(net_forward)(params, x)
    out = jax.block_until_ready(out)
    assert out.shape == (B, 10) and out.dtype == jnp.float32

    ref = net_forward_ref(torch_params, x)
    np.testing.assert_allclose(np.asarray(out), np.asarray(ref), rtol=1e-2, atol=1e-2)
    print("KERNEL_OK")
</pallas_src>

<mosaic_0001>
module attributes {stable_mosaic.version = 11 : i64} {
  func.func @_lenet_kernel(%arg0: i32, %arg1: memref<2x1x28x28xf32, #tpu.memory_space<vmem>>, %arg2: memref<2x28x64xf32, #tpu.memory_space<vmem>>, %arg3: memref<32x28xf32, #tpu.memory_space<vmem>>, %arg4: memref<168x160xf32, #tpu.memory_space<vmem>>, %arg5: memref<168x1xf32, #tpu.memory_space<vmem>>, %arg6: memref<54x28xf32, #tpu.memory_space<vmem>>, %arg7: memref<96x167xf32, #tpu.memory_space<vmem>>, %arg8: memref<160x480xf32, #tpu.memory_space<vmem>>, %arg9: memref<160x1xf32, #tpu.memory_space<vmem>>, %arg10: memref<18x10xf32, #tpu.memory_space<vmem>>, %arg11: memref<80x159xf32, #tpu.memory_space<vmem>>, %arg12: memref<120x400xf32, #tpu.memory_space<vmem>>, %arg13: memref<120x1xf32, #tpu.memory_space<vmem>>, %arg14: memref<84x120xf32, #tpu.memory_space<vmem>>, %arg15: memref<84x1xf32, #tpu.memory_space<vmem>>, %arg16: memref<10x84xf32, #tpu.memory_space<vmem>>, %arg17: memref<10x1xf32, #tpu.memory_space<vmem>>, %arg18: memref<2x2xf32, #tpu.memory_space<vmem>>, %arg19: memref<2x10xf32, #tpu.memory_space<vmem>>) attributes {dimension_semantics = [#tpu.dimension_semantics<arbitrary>], iteration_bounds = array<i64: 1>, scalar_prefetch = 0 : i64, scratch_operands = 0 : i64, tpu.core_type = #tpu.core_type<tc>, window_params = [{pipeline_mode = #tpu.pipeline_mode<synchronous>, transform_indices = @transform_0, window_bounds = array<i64: 2, 1, 28, 28>}, {pipeline_mode = #tpu.pipeline_mode<synchronous>, transform_indices = @transform_1, window_bounds = array<i64: 2, 28, 64>}, {pipeline_mode = #tpu.pipeline_mode<synchronous>, transform_indices = @transform_2, window_bounds = array<i64: 32, 28>}, {pipeline_mode = #tpu.pipeline_mode<synchronous>, transform_indices = @transform_3, window_bounds = array<i64: 168, 160>}, {pipeline_mode = #tpu.pipeline_mode<synchronous>, transform_indices = @transform_4, window_bounds = array<i64: 168, 1>}, {pipeline_mode = #tpu.pipeline_mode<synchronous>, transform_indices = @transform_5, window_bounds = array<i64: 54, 28>}, {pipeline_mode = #tpu.pipeline_mode<synchronous>, transform_indices = @transform_6, window_bounds = array<i64: 96, 167>}, {pipeline_mode = #tpu.pipeline_mode<synchronous>, transform_indices = @transform_7, window_bounds = array<i64: 160, 480>}, {pipeline_mode = #tpu.pipeline_mode<synchronous>, transform_indices = @transform_8, window_bounds = array<i64: 160, 1>}, {pipeline_mode = #tpu.pipeline_mode<synchronous>, transform_indices = @transform_9, window_bounds = array<i64: 18, 10>}, {pipeline_mode = #tpu.pipeline_mode<synchronous>, transform_indices = @transform_10, window_bounds = array<i64: 80, 159>}, {pipeline_mode = #tpu.pipeline_mode<synchronous>, transform_indices = @transform_11, window_bounds = array<i64: 120, 400>}, {pipeline_mode = #tpu.pipeline_mode<synchronous>, transform_indices = @transform_12, window_bounds = array<i64: 120, 1>}, {pipeline_mode = #tpu.pipeline_mode<synchronous>, transform_indices = @transform_13, window_bounds = array<i64: 84, 120>}, {pipeline_mode = #tpu.pipeline_mode<synchronous>, transform_indices = @transform_14, window_bounds = array<i64: 84, 1>}, {pipeline_mode = #tpu.pipeline_mode<synchronous>, transform_indices = @transform_15, window_bounds = array<i64: 10, 84>}, {pipeline_mode = #tpu.pipeline_mode<synchronous>, transform_indices = @transform_16, window_bounds = array<i64: 10, 1>}, {pipeline_mode = #tpu.pipeline_mode<synchronous>, transform_indices = @transform_17, window_bounds = array<i64: 2, 2>}, {pipeline_mode = #tpu.pipeline_mode<synchronous>, transform_indices = @transform_18, window_bounds = array<i64: 2, 10>}]} {
    %c0 = arith.constant 0 : index
    %c0_0 = arith.constant 0 : index
    %c0_1 = arith.constant 0 : index
    %c0_2 = arith.constant 0 : index
    %0 = vector.load %arg1[%c0, %c0_0, %c0_1, %c0_2] : memref<2x1x28x28xf32, #tpu.memory_space<vmem>>, vector<1x1x28x28xf32>
    %1 = vector.shape_cast %0 : vector<1x1x28x28xf32> to vector<28x28xf32>
    %c0_3 = arith.constant 0 : index
    %c0_4 = arith.constant 0 : index
    %c0_5 = arith.constant 0 : index
    %2 = vector.load %arg2[%c0_3, %c0_4, %c0_5] : memref<2x28x64xf32, #tpu.memory_space<vmem>>, vector<1x28x64xf32>
    %3 = vector.shape_cast %2 : vector<1x28x64xf32> to vector<28x64xf32>
    %cst = arith.constant dense<0.000000e+00> : vector<28x64xf32>
    %4 = tpu.matmul %1, %3, %cst {dimension_numbers = #tpu.dot_dimension_numbers<[1], [0], [0], [1], [0, 0, 1, 1], [], []>} : vector<28x28xf32>, vector<28x64xf32>, vector<28x64xf32> -> vector<28x64xf32>
    %c1 = arith.constant 1 : index
    %c0_6 = arith.constant 0 : index
    %c0_7 = arith.constant 0 : index
    %c0_8 = arith.constant 0 : index
    %5 = vector.load %arg1[%c1, %c0_6, %c0_7, %c0_8] : memref<2x1x28x28xf32, #tpu.memory_space<vmem>>, vector<1x1x28x28xf32>
    %6 = vector.shape_cast %5 : vector<1x1x28x28xf32> to vector<28x28xf32>
    %c1_9 = arith.constant 1 : index
    %c0_10 = arith.constant 0 : index
    %c0_11 = arith.constant 0 : index
    %7 = vector.load %arg2[%c1_9, %c0_10, %c0_11] : memref<2x28x64xf32, #tpu.memory_space<vmem>>, vector<1x28x64xf32>
    %8 = vector.shape_cast %7 : vector<1x28x64xf32> to vector<28x64xf32>
    %cst_12 = arith.constant dense<0.000000e+00> : vector<28x64xf32>
    %9 = tpu.matmul %6, %8, %cst_12 {dimension_numbers = #tpu.dot_dimension_numbers<[1], [0], [0], [1], [0, 0, 1, 1], [], []>} : vector<28x28xf32>, vector<28x64xf32>, vector<28x64xf32> -> vector<28x64xf32>
    %10 = arith.addf %4, %9 : vector<28x64xf32>
    %c0_13 = arith.constant 0 : index
    %c0_14 = arith.constant 0 : index
    %11 = vector.load %arg3[%c0_13, %c0_14] : memref<32x28xf32, #tpu.memory_space<vmem>>, vector<32x28xf32>
    %cst_15 = arith.constant dense<0.000000e+00> : vector<32x64xf32>
    %12 = tpu.matmul %11, %10, %cst_15 {dimension_numbers = #tpu.dot_dimension_numbers<[1], [0], [0], [1], [0, 0, 1, 1], [], []>} : vector<32x28xf32>, vector<28x64xf32>, vector<32x64xf32> -> vector<32x64xf32>
    %13 = vector.extract_strided_slice %12 {offsets = [0, 0], sizes = [32, 56], strides = [1, 1]} : vector<32x64xf32> to vector<32x56xf32>
    %14 = vector.extract_strided_slice %12 {offsets = [0, 2], sizes = [32, 56], strides = [1, 1]} : vector<32x64xf32> to vector<32x56xf32>
    %15 = vector.extract_strided_slice %12 {offsets = [0, 4], sizes = [32, 56], strides = [1, 1]} : vector<32x64xf32> to vector<32x56xf32>
    %16 = vector.extract_strided_slice %12 {offsets = [0, 6], sizes = [32, 56], strides = [1, 1]} : vector<32x64xf32> to vector<32x56xf32>
    %17 = vector.extract_strided_slice %12 {offsets = [0, 8], sizes = [32, 56], strides = [1, 1]} : vector<32x64xf32> to vector<32x56xf32>
    %18 = tpu.concatenate %13, %14, %15, %16, %17 in 0 : vector<32x56xf32>, vector<32x56xf32>, vector<32x56xf32>, vector<32x56xf32>, vector<32x56xf32> -> vector<160x56xf32>
    %c0_16 = arith.constant 0 : index
    %c0_17 = arith.constant 0 : index
    %19 = vector.load %arg4[%c0_16, %c0_17] : memref<168x160xf32, #tpu.memory_space<vmem>>, vector<168x160xf32>
    %cst_18 = arith.constant dense<0.000000e+00> : vector<168x56xf32>
    %20 = tpu.matmul %19, %18, %cst_18 {dimension_numbers = #tpu.dot_dimension_numbers<[1], [0], [0], [1], [0, 0, 1, 1], [], []>} : vector<168x160xf32>, vector<160x56xf32>, vector<168x56xf32> -> vector<168x56xf32>
    %c0_19 = arith.constant 0 : index
    %c0_20 = arith.constant 0 : index
    %21 = vector.load %arg5[%c0_19, %c0_20] : memref<168x1xf32, #tpu.memory_space<vmem>>, vector<168x1xf32>
    %22 = vector.broadcast %21 : vector<168x1xf32> to vector<168x56xf32>
    %23 = arith.addf %20, %22 : vector<168x56xf32>
    %cst_21 = arith.constant 0.000000e+00 : f32
    %24 = vector.broadcast %cst_21 : f32 to vector<168x56xf32>
    %25 = arith.maximumf %23, %24 : vector<168x56xf32>
    %26 = vector.extract_strided_slice %25 {offsets = [0, 0], sizes = [168, 54], strides = [1, 1]} : vector<168x56xf32> to vector<168x54xf32>
    %27 = vector.extract_strided_slice %25 {offsets = [0, 2], sizes = [168, 54], strides = [1, 1]} : vector<168x56xf32> to vector<168x54xf32>
    %28 = arith.maximumf %26, %27 : vector<168x54xf32>
    %c0_22 = arith.constant 0 : index
    %c0_23 = arith.constant 0 : index
    %29 = vector.load %arg6[%c0_22, %c0_23] : memref<54x28xf32, #tpu.memory_space<vmem>>, vector<54x28xf32>
    %cst_24 = arith.constant dense<0.000000e+00> : vector<168x28xf32>
    %30 = tpu.matmul %28, %29, %cst_24 {dimension_numbers = #tpu.dot_dimension_numbers<[1], [0], [0], [1], [0, 0, 1, 1], [], []>} : vector<168x54xf32>, vector<54x28xf32>, vector<168x28xf32> -> vector<168x28xf32>
    %c0_25 = arith.constant 0 : index
    %c0_26 = arith.constant 0 : index
    %31 = vector.load %arg7[%c0_25, %c0_26] : memref<96x167xf32, #tpu.memory_space<vmem>>, vector<96x167xf32>
    %32 = vector.extract_strided_slice %30 {offsets = [0, 0], sizes = [167, 28], strides = [1, 1]} : vector<168x28xf32> to vector<167x28xf32>
    %33 = vector.extract_strided_slice %30 {offsets = [1, 0], sizes = [167, 28], strides = [1, 1]} : vector<168x28xf32> to vector<167x28xf32>
    %34 = arith.maximumf %32, %33 : vector<167x28xf32>
    %cst_27 = arith.constant dense<0.000000e+00> : vector<96x28xf32>
    %35 = tpu.matmul %31, %34, %cst_27 {dimension_numbers = #tpu.dot_dimension_numbers<[1], [0], [0], [1], [0, 0, 1, 1], [], []>} : vector<96x167xf32>, vector<167x28xf32>, vector<96x28xf32> -> vector<96x28xf32>
    %36 = vector.extract_strided_slice %35 {offsets = [0, 0], sizes = [96, 20], strides = [1, 1]} : vector<96x28xf32> to vector<96x20xf32>
    %37 = vector.extract_strided_slice %35 {offsets = [0, 2], sizes = [96, 20], strides = [1, 1]} : vector<96x28xf32> to vector<96x20xf32>
    %38 = vector.extract_strided_slice %35 {offsets = [0, 4], sizes = [96, 20], strides = [1, 1]} : vector<96x28xf32> to vector<96x20xf32>
    %39 = vector.extract_strided_slice %35 {offsets = [0, 6], sizes = [96, 20], strides = [1, 1]} : vector<96x28xf32> to vector<96x20xf32>
    %40 = vector.extract_strided_slice %35 {offsets = [0, 8], sizes = [96, 20], strides = [1, 1]} : vector<96x28xf32> to vector<96x20xf32>
    %41 = tpu.concatenate %36, %37, %38, %39, %40 in 0 : vector<96x20xf32>, vector<96x20xf32>, vector<96x20xf32>, vector<96x20xf32>, vector<96x20xf32> -> vector<480x20xf32>
    %c0_28 = arith.constant 0 : index
    %c0_29 = arith.constant 0 : index
    %42 = vector.load %arg8[%c0_28, %c0_29] : memref<160x480xf32, #tpu.memory_space<vmem>>, vector<160x480xf32>
    %cst_30 = arith.constant dense<0.000000e+00> : vector<160x20xf32>
    %43 = tpu.matmul %42, %41, %cst_30 {dimension_numbers = #tpu.dot_dimension_numbers<[1], [0], [0], [1], [0, 0, 1, 1], [], []>} : vector<160x480xf32>, vector<480x20xf32>, vector<160x20xf32> -> vector<160x20xf32>
    %c0_31 = arith.constant 0 : index
    %c0_32 = arith.constant 0 : index
    %44 = vector.load %arg9[%c0_31, %c0_32] : memref<160x1xf32, #tpu.memory_space<vmem>>, vector<160x1xf32>
    %45 = vector.broadcast %44 : vector<160x1xf32> to vector<160x20xf32>
    %46 = arith.addf %43, %45 : vector<160x20xf32>
    %cst_33 = arith.constant 0.000000e+00 : f32
    %47 = vector.broadcast %cst_33 : f32 to vector<160x20xf32>
    %48 = arith.maximumf %46, %47 : vector<160x20xf32>
    %49 = vector.extract_strided_slice %48 {offsets = [0, 0], sizes = [160, 18], strides = [1, 1]} : vector<160x20xf32> to vector<160x18xf32>
    %50 = vector.extract_strided_slice %48 {offsets = [0, 2], sizes = [160, 18], strides = [1, 1]} : vector<160x20xf32> to vector<160x18xf32>
    %51 = arith.maximumf %49, %50 : vector<160x18xf32>
    %c0_34 = arith.constant 0 : index
    %c0_35 = arith.constant 0 : index
    %52 = vector.load %arg10[%c0_34, %c0_35] : memref<18x10xf32, #tpu.memory_space<vmem>>, vector<18x10xf32>
    %cst_36 = arith.constant dense<0.000000e+00> : vector<160x10xf32>
    %53 = tpu.matmul %51, %52, %cst_36 {dimension_numbers = #tpu.dot_dimension_numbers<[1], [0], [0], [1], [0, 0, 1, 1], [], []>} : vector<160x18xf32>, vector<18x10xf32>, vector<160x10xf32> -> vector<160x10xf32>
    %c0_37 = arith.constant 0 : index
    %c0_38 = arith.constant 0 : index
    %54 = vector.load %arg11[%c0_37, %c0_38] : memref<80x159xf32, #tpu.memory_space<vmem>>, vector<80x159xf32>
    %55 = vector.extract_strided_slice %53 {offsets = [0, 0], sizes = [159, 10], strides = [1, 1]} : vector<160x10xf32> to vector<159x10xf32>
    %56 = vector.extract_strided_slice %53 {offsets = [1, 0], sizes = [159, 10], strides = [1, 1]} : vector<160x10xf32> to vector<159x10xf32>
    %57 = arith.maximumf %55, %56 : vector<159x10xf32>
    %cst_39 = arith.constant dense<0.000000e+00> : vector<80x10xf32>
    %58 = tpu.matmul %54, %57, %cst_39 {dimension_numbers = #tpu.dot_dimension_numbers<[1], [0], [0], [1], [0, 0, 1, 1], [], []>} : vector<80x159xf32>, vector<159x10xf32>, vector<80x10xf32> -> vector<80x10xf32>
    %59 = vector.extract_strided_slice %58 {offsets = [0, 0], sizes = [80, 2], strides = [1, 1]} : vector<80x10xf32> to vector<80x2xf32>
    %60 = vector.extract_strided_slice %58 {offsets = [0, 2], sizes = [80, 2], strides = [1, 1]} : vector<80x10xf32> to vector<80x2xf32>
    %61 = vector.extract_strided_slice %58 {offsets = [0, 4], sizes = [80, 2], strides = [1, 1]} : vector<80x10xf32> to vector<80x2xf32>
    %62 = vector.extract_strided_slice %58 {offsets = [0, 6], sizes = [80, 2], strides = [1, 1]} : vector<80x10xf32> to vector<80x2xf32>
    %63 = vector.extract_strided_slice %58 {offsets = [0, 8], sizes = [80, 2], strides = [1, 1]} : vector<80x10xf32> to vector<80x2xf32>
    %64 = tpu.concatenate %59, %60, %61, %62, %63 in 0 : vector<80x2xf32>, vector<80x2xf32>, vector<80x2xf32>, vector<80x2xf32>, vector<80x2xf32> -> vector<400x2xf32>
    %c0_40 = arith.constant 0 : index
    %c0_41 = arith.constant 0 : index
    %65 = vector.load %arg12[%c0_40, %c0_41] : memref<120x400xf32, #tpu.memory_space<vmem>>, vector<120x400xf32>
    %cst_42 = arith.constant dense<0.000000e+00> : vector<120x2xf32>
    %66 = tpu.matmul %65, %64, %cst_42 {dimension_numbers = #tpu.dot_dimension_numbers<[1], [0], [0], [1], [0, 0, 1, 1], [], []>} : vector<120x400xf32>, vector<400x2xf32>, vector<120x2xf32> -> vector<120x2xf32>
    %c0_43 = arith.constant 0 : index
    %c0_44 = arith.constant 0 : index
    %67 = vector.load %arg13[%c0_43, %c0_44] : memref<120x1xf32, #tpu.memory_space<vmem>>, vector<120x1xf32>
    %68 = vector.broadcast %67 : vector<120x1xf32> to vector<120x2xf32>
    %69 = arith.addf %66, %68 : vector<120x2xf32>
    %cst_45 = arith.constant 0.000000e+00 : f32
    %70 = vector.broadcast %cst_45 : f32 to vector<120x2xf32>
    %71 = arith.maximumf %69, %70 : vector<120x2xf32>
    %c0_46 = arith.constant 0 : index
    %c0_47 = arith.constant 0 : index
    %72 = vector.load %arg14[%c0_46, %c0_47] : memref<84x120xf32, #tpu.memory_space<vmem>>, vector<84x120xf32>
    %cst_48 = arith.constant dense<0.000000e+00> : vector<84x2xf32>
    %73 = tpu.matmul %72, %71, %cst_48 {dimension_numbers = #tpu.dot_dimension_numbers<[1], [0], [0], [1], [0, 0, 1, 1], [], []>} : vector<84x120xf32>, vector<120x2xf32>, vector<84x2xf32> -> vector<84x2xf32>
    %c0_49 = arith.constant 0 : index
    %c0_50 = arith.constant 0 : index
    %74 = vector.load %arg15[%c0_49, %c0_50] : memref<84x1xf32, #tpu.memory_space<vmem>>, vector<84x1xf32>
    %75 = vector.broadcast %74 : vector<84x1xf32> to vector<84x2xf32>
    %76 = arith.addf %73, %75 : vector<84x2xf32>
    %cst_51 = arith.constant 0.000000e+00 : f32
    %77 = vector.broadcast %cst_51 : f32 to vector<84x2xf32>
    %78 = arith.maximumf %76, %77 : vector<84x2xf32>
    %c0_52 = arith.constant 0 : index
    %c0_53 = arith.constant 0 : index
    %79 = vector.load %arg16[%c0_52, %c0_53] : memref<10x84xf32, #tpu.memory_space<vmem>>, vector<10x84xf32>
    %cst_54 = arith.constant dense<0.000000e+00> : vector<10x2xf32>
    %80 = tpu.matmul %79, %78, %cst_54 {dimension_numbers = #tpu.dot_dimension_numbers<[1], [0], [0], [1], [0, 0, 1, 1], [], []>} : vector<10x84xf32>, vector<84x2xf32>, vector<10x2xf32> -> vector<10x2xf32>
    %c0_55 = arith.constant 0 : index
    %c0_56 = arith.constant 0 : index
    %81 = vector.load %arg17[%c0_55, %c0_56] : memref<10x1xf32, #tpu.memory_space<vmem>>, vector<10x1xf32>
    %82 = vector.broadcast %81 : vector<10x1xf32> to vector<10x2xf32>
    %83 = arith.addf %80, %82 : vector<10x2xf32>
    %cst_57 = arith.constant dense<0xFF800000> : vector<10xf32>
    %84 = vector.multi_reduction <maximumf>, %83, %cst_57 [1] : vector<10x2xf32> to vector<10xf32>
    %85 = vector.shape_cast %84 : vector<10xf32> to vector<10x1xf32>
    %86 = vector.broadcast %85 : vector<10x1xf32> to vector<10x2xf32>
    %87 = arith.subf %83, %86 : vector<10x2xf32>
    %88 = math.exp %87 : vector<10x2xf32>
    %cst_58 = arith.constant dense<0.000000e+00> : vector<10xf32>
    %89 = vector.multi_reduction <add>, %88, %cst_58 [1] : vector<10x2xf32> to vector<10xf32>
    %90 = vector.shape_cast %89 : vector<10xf32> to vector<10x1xf32>
    %91 = math.log %90 : vector<10x1xf32>
    %92 = arith.addf %85, %91 : vector<10x1xf32>
    %93 = vector.broadcast %92 : vector<10x1xf32> to vector<10x2xf32>
    %94 = arith.subf %83, %93 : vector<10x2xf32>
    %c0_59 = arith.constant 0 : index
    %c0_60 = arith.constant 0 : index
    %95 = vector.load %arg18[%c0_59, %c0_60] : memref<2x2xf32, #tpu.memory_space<vmem>>, vector<2x2xf32>
    %cst_61 = arith.constant dense<0.000000e+00> : vector<2x10xf32>
    %96 = tpu.matmul %95, %94, %cst_61 {dimension_numbers = #tpu.dot_dimension_numbers<[1], [1], [0], [0], [0, 0, 1, 0], [], []>} : vector<2x2xf32>, vector<10x2xf32>, vector<2x10xf32> -> vector<2x10xf32>
    %c0_62 = arith.constant 0 : index
    %c0_63 = arith.constant 0 : index
    %97 = vector.load %arg19[%c0_62, %c0_63] : memref<2x10xf32, #tpu.memory_space<vmem>>, vector<2x10xf32>
    tpu.vector_store %arg19[%c0_62, %c0_63], %96 {strides = array<i32>} : memref<2x10xf32, #tpu.memory_space<vmem>>, vector<2x10xf32>,
    return
  }
  func.func @transform_0(%arg0: i32) -> (i32, i32, i32, i32) {
    %c0_i32 = arith.constant 0 : i32
    %c0_i32_0 = arith.constant 0 : i32
    %c0_i32_1 = arith.constant 0 : i32
    %c0_i32_2 = arith.constant 0 : i32
    %c0_i32_3 = arith.constant 0 : i32
    return %c0_i32, %c0_i32_0, %c0_i32_1, %c0_i32_2 : i32, i32, i32, i32
  }
  func.func @transform_1(%arg0: i32) -> (i32, i32, i32) {
    %c0_i32 = arith.constant 0 : i32
    %c0_i32_0 = arith.constant 0 : i32
    %c0_i32_1 = arith.constant 0 : i32
    %c0_i32_2 = arith.constant 0 : i32
    return %c0_i32, %c0_i32_0, %c0_i32_1 : i32, i32, i32
  }
  func.func @transform_2(%arg0: i32) -> (i32, i32) {
    %c0_i32 = arith.constant 0 : i32
    %c0_i32_0 = arith.constant 0 : i32
    %c0_i32_1 = arith.constant 0 : i32
    return %c0_i32, %c0_i32_0 : i32, i32
  }
  func.func @transform_3(%arg0: i32) -> (i32, i32) {
    %c0_i32 = arith.constant 0 : i32
    %c0_i32_0 = arith.constant 0 : i32
    %c0_i32_1 = arith.constant 0 : i32
    return %c0_i32, %c0_i32_0 : i32, i32
  }
  func.func @transform_4(%arg0: i32) -> (i32, i32) {
    %c0_i32 = arith.constant 0 : i32
    %c0_i32_0 = arith.constant 0 : i32
    %c0_i32_1 = arith.constant 0 : i32
    return %c0_i32, %c0_i32_0 : i32, i32
  }
  func.func @transform_5(%arg0: i32) -> (i32, i32) {
    %c0_i32 = arith.constant 0 : i32
    %c0_i32_0 = arith.constant 0 : i32
    %c0_i32_1 = arith.constant 0 : i32
    return %c0_i32, %c0_i32_0 : i32, i32
  }
  func.func @transform_6(%arg0: i32) -> (i32, i32) {
    %c0_i32 = arith.constant 0 : i32
    %c0_i32_0 = arith.constant 0 : i32
    %c0_i32_1 = arith.constant 0 : i32
    return %c0_i32, %c0_i32_0 : i32, i32
  }
  func.func @transform_7(%arg0: i32) -> (i32, i32) {
    %c0_i32 = arith.constant 0 : i32
    %c0_i32_0 = arith.constant 0 : i32
    %c0_i32_1 = arith.constant 0 : i32
    return %c0_i32, %c0_i32_0 : i32, i32
  }
  func.func @transform_8(%arg0: i32) -> (i32, i32) {
    %c0_i32 = arith.constant 0 : i32
    %c0_i32_0 = arith.constant 0 : i32
    %c0_i32_1 = arith.constant 0 : i32
    return %c0_i32, %c0_i32_0 : i32, i32
  }
  func.func @transform_9(%arg0: i32) -> (i32, i32) {
    %c0_i32 = arith.constant 0 : i32
    %c0_i32_0 = arith.constant 0 : i32
    %c0_i32_1 = arith.constant 0 : i32
    return %c0_i32, %c0_i32_0 : i32, i32
  }
  func.func @transform_10(%arg0: i32) -> (i32, i32) {
    %c0_i32 = arith.constant 0 : i32
    %c0_i32_0 = arith.constant 0 : i32
    %c0_i32_1 = arith.constant 0 : i32
    return %c0_i32, %c0_i32_0 : i32, i32
  }
  func.func @transform_11(%arg0: i32) -> (i32, i32) {
    %c0_i32 = arith.constant 0 : i32
    %c0_i32_0 = arith.constant 0 : i32
    %c0_i32_1 = arith.constant 0 : i32
    return %c0_i32, %c0_i32_0 : i32, i32
  }
  func.func @transform_12(%arg0: i32) -> (i32, i32) {
    %c0_i32 = arith.constant 0 : i32
    %c0_i32_0 = arith.constant 0 : i32
    %c0_i32_1 = arith.constant 0 : i32
    return %c0_i32, %c0_i32_0 : i32, i32
  }
  func.func @transform_13(%arg0: i32) -> (i32, i32) {
    %c0_i32 = arith.constant 0 : i32
    %c0_i32_0 = arith.constant 0 : i32
    %c0_i32_1 = arith.constant 0 : i32
    return %c0_i32, %c0_i32_0 : i32, i32
  }
  func.func @transform_14(%arg0: i32) -> (i32, i32) {
    %c0_i32 = arith.constant 0 : i32
    %c0_i32_0 = arith.constant 0 : i32
    %c0_i32_1 = arith.constant 0 : i32
    return %c0_i32, %c0_i32_0 : i32, i32
  }
  func.func @transform_15(%arg0: i32) -> (i32, i32) {
    %c0_i32 = arith.constant 0 : i32
    %c0_i32_0 = arith.constant 0 : i32
    %c0_i32_1 = arith.constant 0 : i32
    return %c0_i32, %c0_i32_0 : i32, i32
  }
  func.func @transform_16(%arg0: i32) -> (i32, i32) {
    %c0_i32 = arith.constant 0 : i32
    %c0_i32_0 = arith.constant 0 : i32
    %c0_i32_1 = arith.constant 0 : i32
    return %c0_i32, %c0_i32_0 : i32, i32
  }
  func.func @transform_17(%arg0: i32) -> (i32, i32) {
    %c0_i32 = arith.constant 0 : i32
    %c0_i32_0 = arith.constant 0 : i32
    %c0_i32_1 = arith.constant 0 : i32
    return %c0_i32, %c0_i32_0 : i32, i32
  }
  func.func @transform_18(%arg0: i32) -> (i32, i32) {
    %c0_i32 = arith.constant 0 : i32
    %c0_i32_0 = arith.constant 0 : i32
    %c0_i32_1 = arith.constant 0 : i32
    return %c0_i32, %c0_i32_0 : i32, i32
  }
}

</mosaic_0001>

<bundles_post_ra>
// kernel: net_forward.1
= control target key start
LH: loop header
LB: loop body
LE: loop exit
PB: predicated region body
PF: predicated region fallthrough
CT: control target
= control target key end

     0   :  { %s7187_s0 = inlined_call_operand.vmem [shape: f32[2,1,28,28], index: 0, kind: input, shape index: {}]   ;;  %s7188_s1 = inlined_call_operand.vmem [shape: f32[2,28,64], index: 1, kind: input, shape index: {}]   ;;  %s7189_s2 = inlined_call_operand.vmem [shape: f32[32,28], index: 2, kind: input, shape index: {}]   ;;  %s7190_s3 = inlined_call_operand.vmem [shape: f32[168,160], index: 3, kind: input, shape index: {}]   ;;  %s7191_s4 = inlined_call_operand.vmem [shape: f32[168,1], index: 4, kind: input, shape index: {}]   ;;  %s7192_s5 = inlined_call_operand.vmem [shape: f32[54,28], index: 5, kind: input, shape index: {}]   ;;  %s7193_s6 = inlined_call_operand.vmem [shape: f32[96,167], index: 6, kind: input, shape index: {}]   ;;  %s7194_s7 = inlined_call_operand.vmem [shape: f32[160,480], index: 7, kind: input, shape index: {}]   ;;  %s7195_s8 = inlined_call_operand.vmem [shape: f32[160,1], index: 8, kind: input, shape index: {}]   ;;  %s7196_s9 = inlined_call_operand.vmem [shape: f32[18,10], index: 9, kind: input, shape index: {}]   ;;  %s7197_s10 = inlined_call_operand.vmem [shape: f32[80,159], index: 10, kind: input, shape index: {}]   ;;  %s7198_s11 = inlined_call_operand.vmem [shape: f32[120,400], index: 11, kind: input, shape index: {}]   ;;  %s7199_s12 = inlined_call_operand.vmem [shape: f32[120,1], index: 12, kind: input, shape index: {}]   ;;  %s7200_s13 = inlined_call_operand.vmem [shape: f32[84,120], index: 13, kind: input, shape index: {}]   ;;  %s7201_s14 = inlined_call_operand.vmem [shape: f32[84,1], index: 14, kind: input, shape index: {}]   ;;  %s7202_s15 = inlined_call_operand.vmem [shape: f32[10,84], index: 15, kind: input, shape index: {}]   ;;  %s7203_s16 = inlined_call_operand.vmem [shape: f32[10,1], index: 16, kind: input, shape index: {}]   ;;  %s7204_s17 = inlined_call_operand.vmem [shape: f32[2,2], index: 17, kind: input, shape index: {}]   ;;  %s7205_s18 = inlined_call_operand.hbm [shape: f32[2,10], index: 18, kind: output, shape index: {}]  }
   0x1   :  { %7209 = sst [smem:[#allocation5_spill]] %s7187_s0 }
   0x2   :  { %7210 = sst [smem:[#allocation6_spill]] %s7188_s1 }
   0x3   :  { %7211 = sst [smem:[#allocation7_spill]] %s7189_s2 }
   0x4   :  { %s7212_s29 = sld [smem:[#allocation6_spill]]  ;;  %vm91_vm0 = vcmask 1043456   ;;  %vm78_vm1 = vcmask 228352   ;;  %s7213_s23 = sld [smem:[#allocation5_spill]]  ;;  %vm5260_vm2 = vmmov 1  }
   0x5   :  { %vm5382_vm3 = vmpackc.low %vm91_vm0, %vm5260_vm2 }
   0xa   :  { %v3961_v0 = vld [vmem:[%s7212_s29 + $0x20] sm:$0xff]  ;;  %v3962_v1 = vld [vmem:[%s7212_s29 + $0x28] sm:$0xff]  ;;  %v3963_v2 = vld [vmem:[%s7212_s29 + $0x30] sm:$0xff] }
   0xb   :  { %v4564_v3 = vpack.c.bf16 %v3962_v1, %v3961_v0  ;;  %v3964_v4 = vld [vmem:[%s7212_s29 + $0x38] sm:$0xf]  ;;  %v3957_v5 = vld [vmem:[%s7213_s23 + $0x20] sm:$0xff]  ;;  %v65_v9 = vld [vmem:[%s7212_s29 + $0x8] sm:$0xff] }
   0xc   :  { %v4568_v6 = vpack.c.bf16 %v3964_v4, %v3963_v2  ;;  %4322 = vmatprep.mubr.msk.f32.mxu0 %vm78_vm1, %v3957_v5  ;;  %v64_v8 = vld [vmem:[%s7212_s29] sm:$0xff] }
   0xd   :  { %4565 = vmatprep.subr.bf16.mxu0 %v4564_v3  ;;  %v4574_v10 = vpack.c.bf16 %v65_v9, %v64_v8 }
   0xe   :  { %4567 = vmatpush3.bf16.msra.mxu0 %v4564_v3 }
   0xf   :  { %4570 = vmatprep.subr.msk.bf16.mxu0 %vm5382_vm3, %v4568_v6 }
  0x10   :  { %23 = vsyncpa [#allocation3], 0  ;;  %v66_v11 = vld [vmem:[%s7212_s29 + $0x10] sm:$0xff]  ;;  %v67_v12 = vld [vmem:[%s7212_s29 + $0x18] sm:$0xf]  ;;  %s7216_s21 = sld [smem:[#allocation7_spill]] }
  0x11   :  { %v3958_v13 = vld [vmem:[%s7213_s23 + $0x28] sm:$0xff]  ;;  %v3959_v14 = vld [vmem:[%s7213_s23 + $0x30] sm:$0xff]  ;;  %v4578_v15 = vpack.c.bf16 %v67_v12, %v66_v11  ;;  %v3960_v16 = vld [vmem:[%s7213_s23 + $0x38] sm:$0xf]  ;;  %v5261_v31 = vmov 0.0|0.0   ;;  %s5262_s26 = smov 124  }
  0x12   :  { %4573 = vmatpush3.bf16.msk.msra.mxu0 %vm5382_vm3, %v4568_v6  ;;  %v60_v17 = vld [vmem:[%s7213_s23] sm:$0xff]  ;;  %v61_v18 = vld [vmem:[%s7213_s23 + $0x8] sm:$0xff]  ;;  %v62_v19 = vld [vmem:[%s7213_s23 + $0x10] sm:$0xff]  ;;  %s5263_s27 = smov 126   ;;  %s5264_s28 = smov 122   ;;  %vm604_vm4 = vcmask 261120  }
  0x13   :  { %4575 = vmatprep.subr.bf16.mxu0 %v4574_v10  ;;  %v63_v20 = vld [vmem:[%s7213_s23 + $0x18] sm:$0xf]  ;;  %s5265_s30 = smov 120   ;;  %v437_v40 = vld [vmem:[%s7190_s3 + $0x8] sm:$0xff]  ;;  %v5266_v41 = vmov 0   ;;  %v478_v42 = vld [vmem:[%s7191_s4] sm:$0xff] }
  0x14   :  { %5006 = vset.pattern.permute.xlu0 %v5266_v41  ;;  %5007 = vset.pattern.permute.xlu1 %v5266_v41  ;;  %v481_v43 = vld [vmem:[%s7191_s4 + $0x18] sm:$0xff]  ;;  %v483_v44 = vld [vmem:[%s7191_s4 + $0x28] sm:$0xff]  ;;  %v480_v48 = vld [vmem:[%s7191_s4 + $0x10] sm:$0xff]  ;;  %vm1035_vm5 = vcmask 1045504   ;;  %vm5268_vm6 = vmmov 0   ;;  %vm971_vm7 = vcmask 441344  }
  0x15   :  { %4323 = vmatmul.mubr.msk.f32.vlgmr.msra.gmra.mrb[0].mxu0 %vm78_vm1, %v3958_v13  ;;  %v485_v45 = vld [vmem:[%s7191_s4 + $0x38] sm:$0xff]  ;;  %v479_v46 = vld [vmem:[%s7191_s4 + $0x8] sm:$0xff]  ;;  %v482_v50 = vld [vmem:[%s7191_s4 + $0x20] sm:$0xff]  ;;  %vm1338_vm8 = vcmask 318464   ;;  %vm1254_vm9 = vcmask 1046528   ;;  %vm1859_vm10 = vcmask 785408  }
  0x16   :  { %4577 = vmatpush3.bf16.msra.mxu0 %v4574_v10  ;;  %4325 = vmatprep.mubr.msk.f32.mxu0 %vm78_vm1, %v3959_v14  ;;  %v280_v21 = vld [vmem:[%s7216_s21] sm:$0xff]  ;;  %v281_v28 = vld [vmem:[%s7216_s21 + $0x8] sm:$0xff]  ;;  %v282_v29 = vld [vmem:[%s7216_s21 + $0x10] sm:$0xff]  ;;  %vm2434_vm11 = vcmask 1041408   ;;  %vm2373_vm12 = vcmask 146432   ;;  %vm2722_vm13 = vcmask 252928  }
  0x17   :  { %4580 = vmatprep.subr.msk.bf16.mxu0 %vm5382_vm3, %v4578_v15  ;;  %4350 = vmatprep.mubr.msk.f32.mxu1 %vm78_vm1, %v280_v21  ;;  %v283_v30 = vld [vmem:[%s7216_s21 + $0x18] sm:$0xff]  ;;  %v487_v47 = vld [vmem:[%s7191_s4 + $0x48] sm:$0xff]  ;;  %v484_v52 = vld [vmem:[%s7191_s4 + $0x30] sm:$0xff]  ;;  %vm3151_vm15 = vcmask 130048   ;;  %s5269_s20 = smov [#allocation2]  }
  0x18   :  { %v489_v49 = vld [vmem:[%s7191_s4 + $0x58] sm:$0xff]  ;;  %v491_v51 = vld [vmem:[%s7191_s4 + $0x68] sm:$0xff]  ;;  %v486_v54 = vld [vmem:[%s7191_s4 + $0x40] sm:$0xff] }
  0x19   :  { %4326 = vmatmul.mubr.msk.f32.gmra.mrb[2].mxu0 %vm78_vm1, %v3960_v16  ;;  %v493_v53 = vld [vmem:[%s7191_s4 + $0x78] sm:$0xff]  ;;  %v495_v55 = vld [vmem:[%s7191_s4 + $0x88] sm:$0xff]  ;;  %v488_v56 = vld [vmem:[%s7191_s4 + $0x50] sm:$0xff] }
  0x1a   :  { %4583 = vmatpush3.bf16.msk.msra.mxu0 %vm5382_vm3, %v4578_v15  ;;  %4336 = vmatprep.mubr.msk.f32.mxu0 %vm78_vm1, %v60_v17  ;;  %v496_v57 = vld [vmem:[%s7191_s4 + $0x90] sm:$0xff]  ;;  %v490_v58 = vld [vmem:[%s7191_s4 + $0x60] sm:$0xff]  ;;  %v497_v59 = vld [vmem:[%s7191_s4 + $0x98] sm:$0xff] }
  0x1b   :  { %4624 = vmatprep.subr.bf16.mxu0 %v5261_v31  ;;  %v492_v60 = vld [vmem:[%s7191_s4 + $0x70] sm:$0xff]  ;;  %v498_v61 = vld [vmem:[%s7191_s4 + $0xa0] sm:$0xff]  ;;  %v447_v41 = vld [vmem:[%s7190_s3 + $0x58] sm:$0xff] }
  0x1c   :  { %v494_v62 = vld [vmem:[%s7191_s4 + $0x80] sm:$0xff]  ;;  %vm4786_vm14 = vmpackc.low %vm1254_vm9, %vm5260_vm2  ;;  %vm3748_vm2 = vcmask 687104  }
  0x1d   :  { %4337 = vmatmul.mubr.msk.f32.vlgmr.msra.gmra.mrb[0].mxu0 %vm78_vm1, %v61_v18 }
  0x1e   :  { %4339 = vmatprep.mubr.msk.f32.mxu0 %vm78_vm1, %v62_v19 }
  0x21   :  { %4340 = vmatmul.mubr.msk.f32.gmra.mrb[2].mxu0 %vm78_vm1, %v63_v20 }
  0xf0   :  { %v4338_v22 = vpop.f32.mrb[0].mxu0 }
  0xf1   :  { %v261_v23 = vpop.f32.mrb[1].mxu0 }
  0xf2   :  { %v4584_v24 = vpack.c.bf16 %v4338_v22, %v261_v23 }
  0xf4   :  { %v4341_v25 = vpop.f32.mrb[2].mxu0  ;;  %4585 = vmatprep.subr.bf16.mxu1 %v4584_v24 }
  0xf5   :  { %v271_v26 = vpop.f32.mrb[3].mxu0  ;;  %4587 = vmatpush3.bf16.msra.mxu1 %v4584_v24 }
  0xf6   :  { %v4588_v27 = vpack.c.bf16 %v4341_v25, %v271_v26 }
  0xf8   :  { %4590 = vmatprep.subr.msk.bf16.mxu1 %vm5382_vm3, %v4588_v27 }
  0xf9   :  { %4593 = vmatpush3.bf16.msk.msra.mxu1 %vm5382_vm3, %v4588_v27  ;;  %vm3837_vm3 = vcmask 9216  }
  0xfa   :  { %4594 = vmatprep.subr.bf16.mxu1 %v5261_v31 }
  0xfc   :  { %4351 = vmatmul.mubr.msk.f32.vlgmr.msra.gmra.mrb[0].mxu1 %vm78_vm1, %v281_v28 }
  0xfd   :  { %4353 = vmatprep.mubr.msk.f32.mxu1 %vm78_vm1, %v282_v29 }
 0x100   :  { %4354 = vmatmul.mubr.msk.f32.gmra.mrb[2].mxu1 %vm78_vm1, %v283_v30  ;;  %vm3569_vm1 = vcmask 982016  }
 0x101   :  { %3980 = vmatprep.mubr.msk.f32.mxu1 %vm604_vm4, %v437_v40  ;;  %v444_v40 = vld [vmem:[%s7190_s3 + $0x40] sm:$0xff] }
 0x1cf   :  { %v4352_v32 = vpop.f32.mrb[0].mxu1 }
 0x1d0   :  { %v365_v33 = vpop.f32.mrb[1].mxu1 }
 0x1d1   :  { %v4976_v34 = vpack.i.bf16 %v4352_v32, %v365_v33  ;;  %v4595_v35 = vpack.c.bf16 %v4352_v32, %v365_v33  ;;  %v436_v32 = vld [vmem:[%s7190_s3] sm:$0xff]  ;;  %v439_v33 = vld [vmem:[%s7190_s3 + $0x18] sm:$0xff] }
 0x1d3   :  { %4977 = vrot.lane.b32.xlu1 %v4976_v34, %s5262_s26  ;;  %4967 = vrot.lane.b32.xlu0 %v4976_v34, %s5263_s27  ;;  %v4355_v36 = vpop.f32.mrb[2].mxu1 }
 0x1d4   :  { %4596 = vmatpush1.bf16.msra.mxu1 %v4595_v35  ;;  %v375_v37 = vpop.f32.mrb[3].mxu1  ;;  %v441_v35 = vld [vmem:[%s7190_s3 + $0x28] sm:$0xff] }
 0x1d5   :  { %4597 = vmatprep.subr.bf16.mxu1 %v5261_v31  ;;  %v4981_v38 = vpack.i.bf16 %v4355_v36, %v375_v37  ;;  %v4598_v39 = vpack.c.bf16 %v4355_v36, %v375_v37  ;;  %v440_v36 = vld [vmem:[%s7190_s3 + $0x20] sm:$0xff]  ;;  %v443_v37 = vld [vmem:[%s7190_s3 + $0x38] sm:$0xff] }
 0x1d7   :  { %4982 = vrot.lane.b32.xlu1 %v4981_v38, %s5262_s26  ;;  %4972 = vrot.lane.b32.xlu0 %v4981_v38, %s5263_s27 }
 0x1d8   :  { %4599 = vmatpush1.bf16.msra.mxu1 %v4598_v39  ;;  %v445_v39 = vld [vmem:[%s7190_s3 + $0x48] sm:$0xff] }
 0x1d9   :  { %4600 = vmatprep.subr.bf16.mxu1 %v5261_v31 }
 0x1db   :  { %4992 = vrot.lane.b32.xlu1 %v4981_v38, %s5264_s28  ;;  %4987 = vrot.lane.b32.xlu0 %v4976_v34, %s5264_s28 }
 0x1df   :  { %5002 = vrot.lane.b32.xlu1 %v4981_v38, %s5265_s30  ;;  %4997 = vrot.lane.b32.xlu0 %v4976_v34, %s5265_s30  ;;  %v438_v34 = vld [vmem:[%s7190_s3 + $0x10] sm:$0xff] }
 0x1e0   :  { %v442_v38 = vld [vmem:[%s7190_s3 + $0x30] sm:$0xff] }
 0x1e3   :  { %501 = vperm.xlu0 %5006, %v478_v42   ;;  %506 = vperm.xlu1 %5007, %v479_v46   ;;  %v446_v42 = vld [vmem:[%s7190_s3 + $0x50] sm:$0xff] }
 0x1e4   :  { %v450_v46 = vld [vmem:[%s7190_s3 + $0x70] sm:$0xff] }
 0x1e7   :  { %516 = vperm.xlu0 %5006, %v481_v43   ;;  %511 = vperm.xlu1 %5007, %v480_v48   ;;  %v449_v43 = vld [vmem:[%s7190_s3 + $0x68] sm:$0xff]  ;;  %v452_v48 = vld [vmem:[%s7190_s3 + $0x80] sm:$0xff] }
 0x1eb   :  { %526 = vperm.xlu0 %5006, %v483_v44   ;;  %521 = vperm.xlu1 %5007, %v482_v50   ;;  %v448_v44 = vld [vmem:[%s7190_s3 + $0x60] sm:$0xff]  ;;  %v454_v50 = vld [vmem:[%s7190_s3 + $0x90] sm:$0xff] }
 0x1ef   :  { %536 = vperm.xlu0 %5006, %v485_v45   ;;  %531 = vperm.xlu1 %5007, %v484_v52   ;;  %v451_v45 = vld [vmem:[%s7190_s3 + $0x78] sm:$0xff]  ;;  %v456_v52 = vld [vmem:[%s7190_s3 + $0xa0] sm:$0xff] }
 0x1f3   :  { %546 = vperm.xlu0 %5006, %v487_v47   ;;  %541 = vperm.xlu1 %5007, %v486_v54   ;;  %v453_v47 = vld [vmem:[%s7190_s3 + $0x88] sm:$0xff]  ;;  %v458_v54 = vld [vmem:[%s7190_s3 + $0xb0] sm:$0xff] }
 0x1f7   :  { %556 = vperm.xlu0 %5006, %v489_v49   ;;  %551 = vperm.xlu1 %5007, %v488_v56   ;;  %v455_v49 = vld [vmem:[%s7190_s3 + $0x98] sm:$0xff]  ;;  %v460_v56 = vld [vmem:[%s7190_s3 + $0xc0] sm:$0xff] }
 0x1fb   :  { %566 = vperm.xlu0 %5006, %v491_v51   ;;  %561 = vperm.xlu1 %5007, %v490_v58   ;;  %v457_v51 = vld [vmem:[%s7190_s3 + $0xa8] sm:$0xff]  ;;  %v462_v58 = vld [vmem:[%s7190_s3 + $0xd0] sm:$0xff] }
 0x1ff   :  { %576 = vperm.xlu0 %5006, %v493_v53   ;;  %571 = vperm.xlu1 %5007, %v492_v60   ;;  %v459_v53 = vld [vmem:[%s7190_s3 + $0xb8] sm:$0xff]  ;;  %v464_v60 = vld [vmem:[%s7190_s3 + $0xe0] sm:$0xff] }
 0x203   :  { %586 = vperm.xlu0 %5006, %v495_v55   ;;  %581 = vperm.xlu1 %5007, %v494_v62   ;;  %v461_v55 = vld [vmem:[%s7190_s3 + $0xc8] sm:$0xff]  ;;  %v466_v62 = vld [vmem:[%s7190_s3 + $0xf0] sm:$0xff] }
 0x207   :  { %591 = vperm.xlu0 %5006, %v496_v57   ;;  %v463_v57 = vld [vmem:[%s7190_s3 + $0xd8] sm:$0xff] }
 0x20b   :  { %596 = vperm.xlu0 %5006, %v497_v59   ;;  %v465_v59 = vld [vmem:[%s7190_s3 + $0xe8] sm:$0xff] }
 0x20f   :  { %601 = vperm.xlu0 %5006, %v498_v61   ;;  %v467_v61 = vld [vmem:[%s7190_s3 + $0xf8] sm:$0xff] }
 0x245   :  { %v4968_v63 = vpop.permute.xlu0 %4967  ;;  %v4978_v2 = vpop.permute.xlu1 %4977 }
 0x246   :  { %v4970_v0 = vunpack.i.h.bf16 %v4968_v63  ;;  %v4969_v1 = vunpack.i.l.bf16 %v4968_v63  ;;  %v4980_v7 = vunpack.i.h.bf16 %v4978_v2  ;;  %v4979_v8 = vunpack.i.l.bf16 %v4978_v2  ;;  %v469_v63 = vld [vmem:[%s7190_s3 + $0x108] sm:$0xff]  ;;  %v470_v2 = vld [vmem:[%s7190_s3 + $0x110] sm:$0xff] }
 0x248   :  { %v4601_v3 = vpack.c.bf16 %v4970_v0, %v4969_v1  ;;  %v4607_v11 = vpack.c.bf16 %v4980_v7, %v4979_v8  ;;  %v468_v0 = vld [vmem:[%s7190_s3 + $0x100] sm:$0xff]  ;;  %v471_v1 = vld [vmem:[%s7190_s3 + $0x118] sm:$0xff]  ;;  %v477_v7 = vld [vmem:[%s7190_s3 + $0x148] sm:$0xff] }
 0x249   :  { %v4973_v4 = vpop.permute.xlu0 %4972  ;;  %v4983_v10 = vpop.permute.xlu1 %4982  ;;  %v476_v8 = vld [vmem:[%s7190_s3 + $0x140] sm:$0xff] }
 0x24a   :  { %v4975_v5 = vunpack.i.h.bf16 %v4973_v4  ;;  %v4974_v6 = vunpack.i.l.bf16 %v4973_v4  ;;  %4602 = vmatpush1.bf16.msra.mxu1 %v4601_v3  ;;  %v4985_v12 = vunpack.i.h.bf16 %v4983_v10  ;;  %v4984_v13 = vunpack.i.l.bf16 %v4983_v10  ;;  %v473_v3 = vld [vmem:[%s7190_s3 + $0x128] sm:$0xff]  ;;  %v472_v4 = vld [vmem:[%s7190_s3 + $0x120] sm:$0xff] }
 0x24b   :  { %4603 = vmatprep.subr.bf16.mxu1 %v5261_v31  ;;  %v965_v10 = vld [vmem:[%s7192_s5 + $0x8] sm:$0xff] }
 0x24c   :  { %v4604_v9 = vpack.c.bf16 %v4975_v5, %v4974_v6  ;;  %v4610_v15 = vpack.c.bf16 %v4985_v12, %v4984_v13  ;;  %v475_v5 = vld [vmem:[%s7190_s3 + $0x138] sm:$0xff]  ;;  %v474_v6 = vld [vmem:[%s7190_s3 + $0x130] sm:$0xff] }
 0x24d   :  { %v4988_v14 = vpop.permute.xlu0 %4987  ;;  %v4993_v18 = vpop.permute.xlu1 %4992  ;;  %v967_v13 = vld [vmem:[%s7192_s5 + $0x18] sm:$0xff] }
 0x24e   :  { %4605 = vmatpush1.bf16.msra.mxu1 %v4604_v9  ;;  %v4990_v16 = vunpack.i.h.bf16 %v4988_v14  ;;  %v4989_v17 = vunpack.i.l.bf16 %v4988_v14  ;;  %v4995_v19 = vunpack.i.h.bf16 %v4993_v18  ;;  %v4994_v20 = vunpack.i.l.bf16 %v4993_v18  ;;  %v964_v9 = vld [vmem:[%s7192_s5] sm:$0xff]  ;;  %v970_v18 = vld [vmem:[%s7192_s5 + $0x30] sm:$0x3f] }
 0x24f   :  { %4606 = vmatprep.subr.bf16.mxu1 %v5261_v31  ;;  %v4625_v12 = vpack.c.bf16 %v965_v10, %v964_v9 }
 0x250   :  { %v4613_v21 = vpack.c.bf16 %v4990_v16, %v4989_v17  ;;  %v4616_v23 = vpack.c.bf16 %v4995_v19, %v4994_v20  ;;  %v969_v16 = vld [vmem:[%s7192_s5 + $0x28] sm:$0xff]  ;;  %v5267_v19 = vmov 0.0  }
 0x251   :  { %v4998_v22 = vpop.permute.xlu0 %4997  ;;  %v5003_v26 = vpop.permute.xlu1 %5002  ;;  %4626 = vmatpush3.bf16.msra.mxu0 %v4625_v12  ;;  %4370 = vmatprep.mubr.msk.f32.mxu0 %vm5268_vm6, %v5267_v19 }
 0x252   :  { %4608 = vmatpush1.bf16.msra.mxu1 %v4607_v11  ;;  %v5000_v24 = vunpack.i.h.bf16 %v4998_v22  ;;  %v4999_v25 = vunpack.i.l.bf16 %v4998_v22  ;;  %v5005_v27 = vunpack.i.h.bf16 %v5003_v26  ;;  %v5004_v28 = vunpack.i.l.bf16 %v5003_v26  ;;  %v966_v11 = vld [vmem:[%s7192_s5 + $0x10] sm:$0xff]  ;;  %4627 = vmatprep.subr.bf16.mxu0 %v5261_v31 }
 0x253   :  { %4609 = vmatprep.subr.bf16.mxu1 %v5261_v31  ;;  %v4628_v14 = vpack.c.bf16 %v967_v13, %v966_v11 }
 0x254   :  { %v4619_v29 = vpack.c.bf16 %v5000_v24, %v4999_v25  ;;  %v4622_v30 = vpack.c.bf16 %v5005_v27, %v5004_v28 }
 0x255   :  { %4629 = vmatpush3.bf16.msra.mxu0 %v4628_v14 }
 0x256   :  { %4611 = vmatpush1.bf16.msra.mxu1 %v4610_v15  ;;  %v968_v15 = vld [vmem:[%s7192_s5 + $0x20] sm:$0xff]  ;;  %4630 = vmatprep.subr.bf16.mxu0 %v5261_v31 }
 0x257   :  { %4612 = vmatprep.subr.bf16.mxu1 %v5261_v31  ;;  %v4631_v17 = vpack.c.bf16 %v969_v16, %v968_v15 }
 0x259   :  { %4632 = vmatpush3.bf16.msra.mxu0 %v4631_v17 }
 0x25a   :  { %4614 = vmatpush1.bf16.msra.mxu1 %v4613_v21  ;;  %4368 = vmatprep.subr.mxu0 %v5267_v19 }
 0x25b   :  { %4615 = vmatprep.subr.bf16.mxu1 %v5261_v31 }
 0x25d   :  { %4369 = vmatpush3.msk.msra.mxu0 %vm1035_vm5, %v970_v18  ;;  %vm3941_vm5 = vcmask 74752  }
 0x25e   :  { %4617 = vmatpush1.bf16.msra.mxu1 %v4616_v23  ;;  %4633 = vmatprep.subr.bf16.mxu0 %v5261_v31 }
 0x25f   :  { %4618 = vmatprep.subr.bf16.mxu1 %v5261_v31 }
 0x262   :  { %4620 = vmatpush1.bf16.msra.mxu1 %v4619_v29  ;;  %v502_v20 = vpop.permute.xlu0 %501  ;;  %v507_v24 = vpop.permute.xlu1 %506 }
 0x263   :  { %4621 = vmatprep.subr.bf16.mxu1 %v5261_v31 }
 0x266   :  { %4623 = vmatpush1.bf16.msra.mxu1 %v4622_v30  ;;  %v512_v30 = vpop.permute.xlu1 %511 }
 0x267   :  { %4663 = vmatprep.subr.bf16.mxu1 %v5261_v31 }
 0x269   :  { %733 = vmatmul.mubr.f32.vlgmr.msra.gmra.mrb[4].mxu1 %v436_v32 }
 0x26a   :  { %3981 = vmatprep.mubr.msk.f32.mxu1 %vm604_vm4, %v439_v33 }
 0x26d   :  { %738 = vmatmul.mubr.f32.gmra.mrb[6].mxu1 %v438_v34 }
 0x26e   :  { %3982 = vmatprep.mubr.msk.f32.mxu1 %vm604_vm4, %v441_v35 }
 0x271   :  { %743 = vmatmul.mubr.f32.gmra.mrb[8].mxu1 %v440_v36  ;;  %v517_v36 = vpop.permute.xlu0 %516 }
 0x272   :  { %3983 = vmatprep.mubr.msk.f32.mxu1 %vm604_vm4, %v443_v37 }
 0x275   :  { %748 = vmatmul.mubr.f32.gmra.mrb[10].mxu1 %v442_v38 }
 0x276   :  { %3984 = vmatprep.mubr.msk.f32.mxu1 %vm604_vm4, %v445_v39 }
 0x279   :  { %753 = vmatmul.mubr.f32.gmra.mrb[12].mxu1 %v444_v40 }
 0x27a   :  { %3985 = vmatprep.mubr.msk.f32.mxu1 %vm604_vm4, %v447_v41  ;;  %v522_v41 = vpop.permute.xlu1 %521 }
 0x27d   :  { %758 = vmatmul.mubr.f32.gmra.mrb[14].mxu1 %v446_v42 }
 0x27e   :  { %3986 = vmatprep.mubr.msk.f32.mxu1 %vm604_vm4, %v449_v43 }
 0x281   :  { %763 = vmatmul.mubr.f32.gmra.mrb[16].mxu1 %v448_v44 }
 0x282   :  { %3987 = vmatprep.mubr.msk.f32.mxu1 %vm604_vm4, %v451_v45 }
 0x285   :  { %768 = vmatmul.mubr.f32.gmra.mrb[18].mxu1 %v450_v46  ;;  %v527_v46 = vpop.permute.xlu0 %526 }
 0x286   :  { %3988 = vmatprep.mubr.msk.f32.mxu1 %vm604_vm4, %v453_v47 }
 0x289   :  { %773 = vmatmul.mubr.f32.gmra.mrb[20].mxu1 %v452_v48 }
 0x28a   :  { %3989 = vmatprep.mubr.msk.f32.mxu1 %vm604_vm4, %v455_v49 }
 0x28d   :  { %778 = vmatmul.mubr.f32.gmra.mrb[22].mxu1 %v454_v50 }
 0x28e   :  { %3990 = vmatprep.mubr.msk.f32.mxu1 %vm604_vm4, %v457_v51  ;;  %v532_v51 = vpop.permute.xlu1 %531 }
 0x291   :  { %783 = vmatmul.mubr.f32.gmra.mrb[24].mxu1 %v456_v52 }
 0x292   :  { %3991 = vmatprep.mubr.msk.f32.mxu1 %vm604_vm4, %v459_v53 }
 0x295   :  { %788 = vmatmul.mubr.f32.gmra.mrb[26].mxu1 %v458_v54 }
 0x296   :  { %3992 = vmatprep.mubr.msk.f32.mxu1 %vm604_vm4, %v461_v55 }
 0x299   :  { %793 = vmatmul.mubr.f32.gmra.mrb[28].mxu1 %v460_v56  ;;  %v537_v56 = vpop.permute.xlu0 %536 }
 0x29a   :  { %3993 = vmatprep.mubr.msk.f32.mxu1 %vm604_vm4, %v463_v57 }
 0x29d   :  { %798 = vmatmul.mubr.f32.gmra.mrb[30].mxu1 %v462_v58 }
 0x29e   :  { %3994 = vmatprep.mubr.msk.f32.mxu1 %vm604_vm4, %v465_v59 }
 0x2a1   :  { %803 = vmatmul.mubr.f32.gmra.mrb[32].mxu1 %v464_v60 }
 0x2a2   :  { %3995 = vmatprep.mubr.msk.f32.mxu1 %vm604_vm4, %v467_v61  ;;  %v542_v61 = vpop.permute.xlu1 %541 }
 0x2a5   :  { %808 = vmatmul.mubr.f32.gmra.mrb[34].mxu1 %v466_v62 }
 0x2a6   :  { %3996 = vmatprep.mubr.msk.f32.mxu1 %vm604_vm4, %v469_v63 }
 0x2a9   :  { %813 = vmatmul.mubr.f32.gmra.mrb[36].mxu1 %v468_v0 }
 0x2aa   :  { %3997 = vmatprep.mubr.msk.f32.mxu1 %vm604_vm4, %v471_v1 }
 0x2ad   :  { %818 = vmatmul.mubr.f32.gmra.mrb[38].mxu1 %v470_v2  ;;  %v547_v2 = vpop.permute.xlu0 %546 }
 0x2ae   :  { %3998 = vmatprep.mubr.msk.f32.mxu1 %vm604_vm4, %v473_v3 }
 0x2b1   :  { %823 = vmatmul.mubr.f32.gmra.mrb[40].mxu1 %v472_v4  ;;  %v557_v11 = vpop.permute.xlu0 %556 }
 0x2b2   :  { %3999 = vmatprep.mubr.msk.f32.mxu1 %vm604_vm4, %v475_v5 }
 0x2b5   :  { %828 = vmatmul.mubr.f32.gmra.mrb[42].mxu1 %v474_v6 }
 0x2b6   :  { %4000 = vmatprep.mubr.msk.f32.mxu1 %vm604_vm4, %v477_v7  ;;  %v552_v7 = vpop.permute.xlu1 %551  ;;  %vm3833_vm4 = vcmask 15360  }
 0x2b9   :  { %833 = vmatmul.mubr.f32.gmra.mrb[44].mxu1 %v476_v8 }
 0x2ba   :  { %v562_v17 = vpop.permute.xlu1 %561 }
 0x33c   :  { %v734_v21 = vpop.f32.mrb[4].mxu1 }
 0x33d   :  { %v5712_v22 = vadd.f32 %v734_v21, %v502_v20  ;;  %v736_v23 = vpop.f32.mrb[5].mxu1  ;;  %v567_v20 = vpop.permute.xlu0 %566 }
 0x33f   :  { %v838_v25 = vmax.f32 %v5712_v22, 0.0 }
 0x340   :  { %v739_v26 = vpop.f32.mrb[6].mxu1 }
 0x341   :  { %v5715_v27 = vadd.f32 %v739_v26, %v507_v24  ;;  %v741_v28 = vpop.f32.mrb[7].mxu1  ;;  %880 = vrot.lane.b32.xlu1 %v838_v25, %s5263_s27 }
 0x343   :  { %v839_v29 = vmax.f32 %v5715_v27, 0.0 }
 0x344   :  { %v744_v32 = vpop.f32.mrb[8].mxu1 }
 0x345   :  { %v5721_v33 = vadd.f32 %v744_v32, %v512_v30  ;;  %v746_v34 = vpop.f32.mrb[9].mxu1  ;;  %882 = vrot.lane.b32.xlu1 %v839_v29, %s5263_s27  ;;  %v577_v32 = vpop.permute.xlu0 %576 }
 0x347   :  { %v840_v35 = vmax.f32 %v5721_v33, 0.0 }
 0x348   :  { %v749_v37 = vpop.f32.mrb[10].mxu1 }
 0x349   :  { %v5727_v38 = vadd.f32 %v749_v37, %v517_v36  ;;  %v751_v39 = vpop.f32.mrb[11].mxu1  ;;  %884 = vrot.lane.b32.xlu1 %v840_v35, %s5263_s27  ;;  %v572_v36 = vpop.permute.xlu1 %571 }
 0x34b   :  { %v841_v40 = vmax.f32 %v5727_v38, 0.0 }
 0x34c   :  { %v754_v42 = vpop.f32.mrb[12].mxu1 }
 0x34d   :  { %v5733_v43 = vadd.f32 %v754_v42, %v522_v41  ;;  %v756_v44 = vpop.f32.mrb[13].mxu1  ;;  %886 = vrot.lane.b32.xlu1 %v841_v40, %s5263_s27 }
 0x34f   :  { %v842_v45 = vmax.f32 %v5733_v43, 0.0 }
 0x350   :  { %v759_v47 = vpop.f32.mrb[14].mxu1 }
 0x351   :  { %v5739_v48 = vadd.f32 %v759_v47, %v527_v46  ;;  %v761_v49 = vpop.f32.mrb[15].mxu1  ;;  %888 = vrot.lane.b32.xlu0 %v842_v45, %s5263_s27 }
 0x352   :  { %v587_v49 = vpop.permute.xlu0 %586 }
 0x353   :  { %v843_v50 = vmax.f32 %v5739_v48, 0.0 }
 0x354   :  { %v764_v52 = vpop.f32.mrb[16].mxu1 }
 0x355   :  { %v5745_v53 = vadd.f32 %v764_v52, %v532_v51  ;;  %v766_v54 = vpop.f32.mrb[17].mxu1  ;;  %890 = vrot.lane.b32.xlu1 %v843_v50, %s5263_s27  ;;  %v582_v52 = vpop.permute.xlu1 %581 }
 0x357   :  { %v844_v55 = vmax.f32 %v5745_v53, 0.0 }
 0x358   :  { %v769_v57 = vpop.f32.mrb[18].mxu1 }
 0x359   :  { %v5751_v58 = vadd.f32 %v769_v57, %v537_v56  ;;  %v771_v59 = vpop.f32.mrb[19].mxu1  ;;  %892 = vrot.lane.b32.xlu0 %v844_v55, %s5263_s27 }
 0x35b   :  { %v845_v60 = vmax.f32 %v5751_v58, 0.0 }
 0x35c   :  { %v774_v62 = vpop.f32.mrb[20].mxu1 }
 0x35d   :  { %v5757_v63 = vadd.f32 %v774_v62, %v542_v61  ;;  %v776_v0 = vpop.f32.mrb[21].mxu1  ;;  %894 = vrot.lane.b32.xlu1 %v845_v60, %s5263_s27  ;;  %v592_v61 = vpop.permute.xlu0 %591 }
 0x35f   :  { %v846_v1 = vmax.f32 %v5757_v63, 0.0 }
 0x360   :  { %v779_v3 = vpop.f32.mrb[22].mxu1 }
 0x361   :  { %v5763_v4 = vadd.f32 %v779_v3, %v547_v2  ;;  %v781_v5 = vpop.f32.mrb[23].mxu1  ;;  %896 = vrot.lane.b32.xlu0 %v846_v1, %s5263_s27 }
 0x363   :  { %v847_v6 = vmax.f32 %v5763_v4, 0.0 }
 0x364   :  { %v784_v8 = vpop.f32.mrb[24].mxu1 }
 0x365   :  { %v5769_v9 = vadd.f32 %v784_v8, %v552_v7  ;;  %v786_v10 = vpop.f32.mrb[25].mxu1  ;;  %898 = vrot.lane.b32.xlu1 %v847_v6, %s5263_s27 }
 0x366   :  { %v597_v10 = vpop.permute.xlu0 %596 }
 0x367   :  { %v848_v12 = vmax.f32 %v5769_v9, 0.0 }
 0x368   :  { %v789_v13 = vpop.f32.mrb[26].mxu1 }
 0x369   :  { %v5775_v14 = vadd.f32 %v789_v13, %v557_v11  ;;  %v791_v15 = vpop.f32.mrb[27].mxu1  ;;  %900 = vrot.lane.b32.xlu0 %v848_v12, %s5263_s27 }
 0x36b   :  { %v849_v16 = vmax.f32 %v5775_v14, 0.0 }
 0x36c   :  { %v794_v18 = vpop.f32.mrb[28].mxu1 }
 0x36d   :  { %v5781_v21 = vadd.f32 %v794_v18, %v562_v17  ;;  %v796_v23 = vpop.f32.mrb[29].mxu1  ;;  %902 = vrot.lane.b32.xlu1 %v849_v16, %s5263_s27 }
 0x36f   :  { %v850_v24 = vmax.f32 %v5781_v21, 0.0 }
 0x370   :  { %v799_v26 = vpop.f32.mrb[30].mxu1 }
 0x371   :  { %v5787_v28 = vadd.f32 %v799_v26, %v567_v20  ;;  %v801_v30 = vpop.f32.mrb[31].mxu1  ;;  %904 = vrot.lane.b32.xlu0 %v850_v24, %s5263_s27  ;;  %v602_v20 = vpop.permute.xlu0 %601 }
 0x373   :  { %v851_v34 = vmax.f32 %v5787_v28, 0.0 }
 0x374   :  { %v804_v37 = vpop.f32.mrb[32].mxu1 }
 0x375   :  { %v5793_v39 = vadd.f32 %v804_v37, %v572_v36  ;;  %v806_v41 = vpop.f32.mrb[33].mxu1  ;;  %906 = vrot.lane.b32.xlu1 %v851_v34, %s5263_s27 }
 0x377   :  { %v852_v42 = vmax.f32 %v5793_v39, 0.0 }
 0x378   :  { %v809_v44 = vpop.f32.mrb[34].mxu1 }
 0x379   :  { %v5799_v46 = vadd.f32 %v809_v44, %v577_v32  ;;  %v811_v47 = vpop.f32.mrb[35].mxu1  ;;  %908 = vrot.lane.b32.xlu0 %v852_v42, %s5263_s27 }
 0x37b   :  { %v853_v51 = vmax.f32 %v5799_v46, 0.0 }
 0x37c   :  { %v814_v54 = vpop.f32.mrb[36].mxu1 }
 0x37d   :  { %v5805_v56 = vadd.f32 %v814_v54, %v582_v52  ;;  %v816_v57 = vpop.f32.mrb[37].mxu1  ;;  %910 = vrot.lane.b32.xlu1 %v853_v51, %s5263_s27 }
 0x37f   :  { %v854_v59 = vmax.f32 %v5805_v56, 0.0 }
 0x380   :  { %v819_v62 = vpop.f32.mrb[38].mxu1 }
 0x381   :  { %v5811_v0 = vadd.f32 %v819_v62, %v587_v49  ;;  %v821_v2 = vpop.f32.mrb[39].mxu1  ;;  %912 = vrot.lane.b32.xlu0 %v854_v59, %s5263_s27 }
 0x383   :  { %v855_v3 = vmax.f32 %v5811_v0, 0.0 }
 0x384   :  { %v824_v5 = vpop.f32.mrb[40].mxu1 }
 0x385   :  { %v5817_v7 = vadd.f32 %v824_v5, %v592_v61  ;;  %v826_v8 = vpop.f32.mrb[41].mxu1  ;;  %914 = vrot.lane.b32.xlu1 %v855_v3, %s5263_s27 }
 0x387   :  { %v856_v11 = vmax.f32 %v5817_v7, 0.0 }
 0x388   :  { %v829_v13 = vpop.f32.mrb[42].mxu1 }
 0x389   :  { %v5823_v15 = vadd.f32 %v829_v13, %v597_v10  ;;  %v831_v17 = vpop.f32.mrb[43].mxu1  ;;  %916 = vrot.lane.b32.xlu0 %v856_v11, %s5263_s27 }
 0x38b   :  { %v857_v18 = vmax.f32 %v5823_v15, 0.0 }
 0x38c   :  { %v834_v23 = vpop.f32.mrb[44].mxu1 }
 0x38d   :  { %v5829_v26 = vadd.f32 %v834_v23, %v602_v20  ;;  %v836_v30 = vpop.f32.mrb[45].mxu1  ;;  %918 = vrot.lane.b32.xlu1 %v857_v18, %s5263_s27 }
 0x38f   :  { %v858_v32 = vmax.f32 %v5829_v26, 0.0 }
 0x391   :  { %920 = vrot.lane.b32.xlu0 %v858_v32, %s5263_s27 }
 0x3b3   :  { %v881_v36 = vpop.permute.xlu1 %880 }
 0x3b4   :  { %v943_v37 = vmax.f32 %v838_v25, %v881_v36 }
 0x3b6   :  { %4371 = vmatmul.mubr.msk.f32.vlgmr.msra.gmra.mrb[4].mxu0 %vm971_vm7, %v943_v37 }
 0x3b7   :  { %v883_v41 = vpop.permute.xlu1 %882  ;;  %4373 = vmatprep.mubr.msk.f32.mxu0 %vm5268_vm6, %v5267_v19 }
 0x3b8   :  { %v944_v44 = vmax.f32 %v839_v29, %v883_v41 }
 0x3ba   :  { %4374 = vmatmul.mubr.msk.f32.gmra.mrb[6].mxu0 %vm971_vm7, %v944_v44 }
 0x3bb   :  { %v885_v47 = vpop.permute.xlu1 %884  ;;  %4376 = vmatprep.mubr.msk.f32.mxu0 %vm5268_vm6, %v5267_v19 }
 0x3bc   :  { %v945_v49 = vmax.f32 %v840_v35, %v885_v47 }
 0x3be   :  { %4377 = vmatmul.mubr.msk.f32.gmra.mrb[8].mxu0 %vm971_vm7, %v945_v49 }
 0x3bf   :  { %v887_v22 = vpop.permute.xlu1 %886  ;;  %4379 = vmatprep.mubr.msk.f32.mxu0 %vm5268_vm6, %v5267_v19 }
 0x3c0   :  { %v946_v25 = vmax.f32 %v841_v40, %v887_v22 }
 0x3c2   :  { %4380 = vmatmul.mubr.msk.f32.gmra.mrb[10].mxu0 %vm971_vm7, %v946_v25 }
 0x3c3   :  { %v889_v27 = vpop.permute.xlu0 %888  ;;  %4382 = vmatprep.mubr.msk.f32.mxu0 %vm5268_vm6, %v5267_v19 }
 0x3c4   :  { %v947_v29 = vmax.f32 %v842_v45, %v889_v27 }
 0x3c6   :  { %4383 = vmatmul.mubr.msk.f32.gmra.mrb[12].mxu0 %vm971_vm7, %v947_v29 }
 0x3c7   :  { %v891_v33 = vpop.permute.xlu1 %890  ;;  %4385 = vmatprep.mubr.msk.f32.mxu0 %vm5268_vm6, %v5267_v19 }
 0x3c8   :  { %v948_v35 = vmax.f32 %v843_v50, %v891_v33 }
 0x3ca   :  { %4386 = vmatmul.mubr.msk.f32.gmra.mrb[14].mxu0 %vm971_vm7, %v948_v35 }
 0x3cb   :  { %v893_v38 = vpop.permute.xlu0 %892  ;;  %4388 = vmatprep.mubr.msk.f32.mxu0 %vm5268_vm6, %v5267_v19 }
 0x3cc   :  { %v949_v40 = vmax.f32 %v844_v55, %v893_v38 }
 0x3ce   :  { %4389 = vmatmul.mubr.msk.f32.gmra.mrb[16].mxu0 %vm971_vm7, %v949_v40 }
 0x3cf   :  { %v895_v43 = vpop.permute.xlu1 %894  ;;  %4391 = vmatprep.mubr.msk.f32.mxu0 %vm5268_vm6, %v5267_v19 }
 0x3d0   :  { %v950_v45 = vmax.f32 %v845_v60, %v895_v43 }
 0x3d2   :  { %4392 = vmatmul.mubr.msk.f32.gmra.mrb[18].mxu0 %vm971_vm7, %v950_v45 }
 0x3d3   :  { %v897_v48 = vpop.permute.xlu0 %896  ;;  %4394 = vmatprep.mubr.msk.f32.mxu0 %vm5268_vm6, %v5267_v19 }
 0x3d4   :  { %v951_v50 = vmax.f32 %v846_v1, %v897_v48 }
 0x3d6   :  { %4395 = vmatmul.mubr.msk.f32.gmra.mrb[20].mxu0 %vm971_vm7, %v951_v50 }
 0x3d7   :  { %v899_v53 = vpop.permute.xlu1 %898  ;;  %4397 = vmatprep.mubr.msk.f32.mxu0 %vm5268_vm6, %v5267_v19 }
 0x3d8   :  { %v952_v55 = vmax.f32 %v847_v6, %v899_v53 }
 0x3da   :  { %4398 = vmatmul.mubr.msk.f32.gmra.mrb[22].mxu0 %vm971_vm7, %v952_v55 }
 0x3db   :  { %v901_v58 = vpop.permute.xlu0 %900  ;;  %4400 = vmatprep.mubr.msk.f32.mxu0 %vm5268_vm6, %v5267_v19 }
 0x3dc   :  { %v953_v60 = vmax.f32 %v848_v12, %v901_v58 }
 0x3de   :  { %4401 = vmatmul.mubr.msk.f32.gmra.mrb[24].mxu0 %vm971_vm7, %v953_v60 }
 0x3df   :  { %v903_v63 = vpop.permute.xlu1 %902  ;;  %4403 = vmatprep.mubr.msk.f32.mxu0 %vm5268_vm6, %v5267_v19 }
 0x3e0   :  { %v954_v1 = vmax.f32 %v849_v16, %v903_v63 }
 0x3e2   :  { %4404 = vmatmul.mubr.msk.f32.gmra.mrb[26].mxu0 %vm971_vm7, %v954_v1 }
 0x3e3   :  { %v905_v4 = vpop.permute.xlu0 %904  ;;  %4406 = vmatprep.mubr.msk.f32.mxu0 %vm5268_vm6, %v5267_v19 }
 0x3e4   :  { %v955_v6 = vmax.f32 %v850_v24, %v905_v4 }
 0x3e6   :  { %4407 = vmatmul.mubr.msk.f32.gmra.mrb[28].mxu0 %vm971_vm7, %v955_v6 }
 0x3e7   :  { %v907_v9 = vpop.permute.xlu1 %906  ;;  %4409 = vmatprep.mubr.msk.f32.mxu0 %vm5268_vm6, %v5267_v19 }
 0x3e8   :  { %v956_v12 = vmax.f32 %v851_v34, %v907_v9 }
 0x3ea   :  { %4410 = vmatmul.mubr.msk.f32.gmra.mrb[30].mxu0 %vm971_vm7, %v956_v12 }
 0x3eb   :  { %v909_v14 = vpop.permute.xlu0 %908  ;;  %4412 = vmatprep.mubr.msk.f32.mxu0 %vm5268_vm6, %v5267_v19 }
 0x3ec   :  { %v957_v16 = vmax.f32 %v852_v42, %v909_v14 }
 0x3ee   :  { %4413 = vmatmul.mubr.msk.f32.gmra.mrb[32].mxu0 %vm971_vm7, %v957_v16 }
 0x3ef   :  { %v911_v21 = vpop.permute.xlu1 %910  ;;  %4415 = vmatprep.mubr.msk.f32.mxu0 %vm5268_vm6, %v5267_v19 }
 0x3f0   :  { %v958_v24 = vmax.f32 %v853_v51, %v911_v21 }
 0x3f2   :  { %4416 = vmatmul.mubr.msk.f32.gmra.mrb[34].mxu0 %vm971_vm7, %v958_v24 }
 0x3f3   :  { %v913_v28 = vpop.permute.xlu0 %912  ;;  %4418 = vmatprep.mubr.msk.f32.mxu0 %vm5268_vm6, %v5267_v19 }
 0x3f4   :  { %v959_v34 = vmax.f32 %v854_v59, %v913_v28  ;;  %v1210_v59 = vld [vmem:[%s7193_s6 + $0x8] sm:$0xff] }
 0x3f6   :  { %4419 = vmatmul.mubr.msk.f32.gmra.mrb[36].mxu0 %vm971_vm7, %v959_v34 }
 0x3f7   :  { %v915_v39 = vpop.permute.xlu1 %914  ;;  %4421 = vmatprep.mubr.msk.f32.mxu0 %vm5268_vm6, %v5267_v19 }
 0x3f8   :  { %v960_v42 = vmax.f32 %v855_v3, %v915_v39 }
 0x3fa   :  { %4422 = vmatmul.mubr.msk.f32.gmra.mrb[38].mxu0 %vm971_vm7, %v960_v42 }
 0x3fb   :  { %v917_v46 = vpop.permute.xlu0 %916  ;;  %4424 = vmatprep.mubr.msk.f32.mxu0 %vm5268_vm6, %v5267_v19 }
 0x3fc   :  { %v961_v51 = vmax.f32 %v856_v11, %v917_v46 }
 0x3fe   :  { %4425 = vmatmul.mubr.msk.f32.gmra.mrb[40].mxu0 %vm971_vm7, %v961_v51 }
 0x3ff   :  { %v919_v52 = vpop.permute.xlu1 %918  ;;  %4427 = vmatprep.mubr.msk.f32.mxu0 %vm5268_vm6, %v5267_v19 }
 0x400   :  { %v962_v54 = vmax.f32 %v857_v18, %v919_v52 }
 0x402   :  { %4428 = vmatmul.mubr.msk.f32.gmra.mrb[42].mxu0 %vm971_vm7, %v962_v54 }
 0x403   :  { %v921_v56 = vpop.permute.xlu0 %920  ;;  %4430 = vmatprep.mubr.msk.f32.mxu0 %vm5268_vm6, %v5267_v19 }
 0x404   :  { %v963_v57 = vmax.f32 %v858_v32, %v921_v56 }
 0x406   :  { %4431 = vmatmul.mubr.msk.f32.gmra.mrb[44].mxu0 %vm971_vm7, %v963_v57 }
 0x407   :  { %4024 = vmatprep.mubr.msk.f32.mxu0 %vm1338_vm8, %v1210_v59 }
 0x489   :  { %v1105_v61 = vpop.f32.mrb[4].mxu0 }
 0x48a   :  { %v4372_v62 = vpop.f32.mrb[5].mxu0  ;;  %v1255_v2 = vrot.slane %v1105_v61, 1 }
 0x48d   :  { %v1110_v0 = vpop.f32.mrb[6].mxu0 }
 0x48e   :  { %v1256_v3 = vrot.slane %v1110_v0, 1  ;;  %v4375_v5 = vpop.f32.mrb[7].mxu0 }
 0x490   :  { %v1257_v7 = vsel %vm1254_vm9, %v1255_v2, %v1256_v3 }
 0x491   :  { %v1317_v8 = vmax.f32 %v1105_v61, %v1257_v7  ;;  %v1115_v10 = vpop.f32.mrb[8].mxu0 }
 0x492   :  { %v1258_v11 = vrot.slane %v1115_v10, 1  ;;  %v4378_v13 = vpop.f32.mrb[9].mxu0 }
 0x494   :  { %v1259_v15 = vsel %vm1254_vm9, %v1256_v3, %v1258_v11 }
 0x495   :  { %v1318_v17 = vmax.f32 %v1110_v0, %v1259_v15  ;;  %v1120_v18 = vpop.f32.mrb[10].mxu0 }
 0x496   :  { %v1260_v20 = vrot.slane %v1120_v18, 1  ;;  %v4381_v23 = vpop.f32.mrb[11].mxu0 }
 0x497   :  { %v4634_v26 = vpack.c.bf16 %v1318_v17, %v1317_v8 }
 0x498   :  { %v1261_v30 = vsel %vm1254_vm9, %v1258_v11, %v1260_v20 }
 0x499   :  { %v1319_v32 = vmax.f32 %v1115_v10, %v1261_v30  ;;  %v1125_v36 = vpop.f32.mrb[12].mxu0  ;;  %4635 = vmatpush1.bf16.msra.mxu0 %v4634_v26 }
 0x49a   :  { %v1262_v37 = vrot.slane %v1125_v36, 1  ;;  %v4384_v41 = vpop.f32.mrb[13].mxu0  ;;  %4636 = vmatprep.subr.bf16.mxu0 %v5261_v31 }
 0x49c   :  { %v1263_v44 = vsel %vm1254_vm9, %v1260_v20, %v1262_v37 }
 0x49d   :  { %v1320_v47 = vmax.f32 %v1120_v18, %v1263_v44  ;;  %v1130_v49 = vpop.f32.mrb[14].mxu0 }
 0x49e   :  { %v1264_v22 = vrot.slane %v1130_v49, 1  ;;  %v4387_v25 = vpop.f32.mrb[15].mxu0 }
 0x49f   :  { %v4637_v27 = vpack.c.bf16 %v1320_v47, %v1319_v32 }
 0x4a0   :  { %v1265_v29 = vsel %vm1254_vm9, %v1262_v37, %v1264_v22 }
 0x4a1   :  { %v1321_v33 = vmax.f32 %v1125_v36, %v1265_v29  ;;  %v1135_v35 = vpop.f32.mrb[16].mxu0  ;;  %4638 = vmatpush1.bf16.msra.mxu0 %v4637_v27 }
 0x4a2   :  { %v1266_v38 = vrot.slane %v1135_v35, 1  ;;  %v4390_v40 = vpop.f32.mrb[17].mxu0  ;;  %4639 = vmatprep.subr.bf16.mxu0 %v5261_v31 }
 0x4a4   :  { %v1267_v43 = vsel %vm1254_vm9, %v1264_v22, %v1266_v38 }
 0x4a5   :  { %v1322_v45 = vmax.f32 %v1130_v49, %v1267_v43  ;;  %v1140_v48 = vpop.f32.mrb[18].mxu0 }
 0x4a6   :  { %v1268_v50 = vrot.slane %v1140_v48, 1  ;;  %v4393_v53 = vpop.f32.mrb[19].mxu0 }
 0x4a7   :  { %v4640_v55 = vpack.c.bf16 %v1322_v45, %v1321_v33 }
 0x4a8   :  { %v1269_v58 = vsel %vm1254_vm9, %v1266_v38, %v1268_v50 }
 0x4a9   :  { %v1323_v60 = vmax.f32 %v1135_v35, %v1269_v58  ;;  %v1145_v63 = vpop.f32.mrb[20].mxu0  ;;  %4641 = vmatpush1.bf16.msra.mxu0 %v4640_v55 }
 0x4aa   :  { %v1270_v1 = vrot.slane %v1145_v63, 1  ;;  %v4396_v4 = vpop.f32.mrb[21].mxu0  ;;  %4642 = vmatprep.subr.bf16.mxu0 %v5261_v31 }
 0x4ac   :  { %v1271_v6 = vsel %vm1254_vm9, %v1268_v50, %v1270_v1 }
 0x4ad   :  { %v1324_v9 = vmax.f32 %v1140_v48, %v1271_v6  ;;  %v1150_v12 = vpop.f32.mrb[22].mxu0 }
 0x4ae   :  { %v1272_v14 = vrot.slane %v1150_v12, 1  ;;  %v4399_v16 = vpop.f32.mrb[23].mxu0 }
 0x4af   :  { %v4643_v21 = vpack.c.bf16 %v1324_v9, %v1323_v60 }
 0x4b0   :  { %v1273_v24 = vsel %vm1254_vm9, %v1270_v1, %v1272_v14 }
 0x4b1   :  { %v1325_v28 = vmax.f32 %v1145_v63, %v1273_v24  ;;  %v1155_v34 = vpop.f32.mrb[24].mxu0  ;;  %4644 = vmatpush1.bf16.msra.mxu0 %v4643_v21 }
 0x4b2   :  { %v1274_v39 = vrot.slane %v1155_v34, 1  ;;  %v4402_v42 = vpop.f32.mrb[25].mxu0  ;;  %4645 = vmatprep.subr.bf16.mxu0 %v5261_v31 }
 0x4b3   :  { %v1211_v42 = vld [vmem:[%s7193_s6 + $0x10] sm:$0xff] }
 0x4b4   :  { %v1275_v46 = vsel %vm1254_vm9, %v1272_v14, %v1274_v39 }
 0x4b5   :  { %v1326_v51 = vmax.f32 %v1150_v12, %v1275_v46  ;;  %v1160_v52 = vpop.f32.mrb[26].mxu0  ;;  %v1214_v46 = vld [vmem:[%s7193_s6 + $0x28] sm:$0xff] }
 0x4b6   :  { %v1276_v54 = vrot.slane %v1160_v52, 1  ;;  %v4405_v56 = vpop.f32.mrb[27].mxu0 }
 0x4b7   :  { %v4646_v57 = vpack.c.bf16 %v1326_v51, %v1325_v28  ;;  %v1213_v51 = vld [vmem:[%s7193_s6 + $0x20] sm:$0xff]  ;;  %v1218_v56 = vld [vmem:[%s7193_s6 + $0x48] sm:$0xff] }
 0x4b8   :  { %v1277_v59 = vsel %vm1254_vm9, %v1274_v39, %v1276_v54  ;;  %v1212_v39 = vld [vmem:[%s7193_s6 + $0x18] sm:$0xff] }
 0x4b9   :  { %v1327_v61 = vmax.f32 %v1155_v34, %v1277_v59  ;;  %v1165_v62 = vpop.f32.mrb[28].mxu0  ;;  %4647 = vmatpush1.bf16.msra.mxu0 %v4646_v57  ;;  %v1209_v34 = vld [vmem:[%s7193_s6] sm:$0xff]  ;;  %v1220_v59 = vld [vmem:[%s7193_s6 + $0x58] sm:$0xff] }
 0x4ba   :  { %v1278_v0 = vrot.slane %v1165_v62, 1  ;;  %v4408_v2 = vpop.f32.mrb[29].mxu0  ;;  %4648 = vmatprep.subr.bf16.mxu0 %v5261_v31  ;;  %v1217_v57 = vld [vmem:[%s7193_s6 + $0x40] sm:$0xff] }
 0x4bb   :  { %v1224_v2 = vld [vmem:[%s7193_s6 + $0x78] sm:$0xff] }
 0x4bc   :  { %v1279_v3 = vsel %vm1254_vm9, %v1276_v54, %v1278_v0  ;;  %v1215_v54 = vld [vmem:[%s7193_s6 + $0x30] sm:$0xff] }
 0x4bd   :  { %v1328_v5 = vmax.f32 %v1160_v52, %v1279_v3  ;;  %v1170_v7 = vpop.f32.mrb[30].mxu0  ;;  %v1216_v52 = vld [vmem:[%s7193_s6 + $0x38] sm:$0xff]  ;;  %v1223_v3 = vld [vmem:[%s7193_s6 + $0x70] sm:$0xff] }
 0x4be   :  { %v1280_v8 = vrot.slane %v1170_v7, 1  ;;  %v4411_v10 = vpop.f32.mrb[31].mxu0 }
 0x4bf   :  { %v4649_v11 = vpack.c.bf16 %v1328_v5, %v1327_v61  ;;  %v1219_v61 = vld [vmem:[%s7193_s6 + $0x50] sm:$0xff]  ;;  %v1226_v5 = vld [vmem:[%s7193_s6 + $0x88] sm:$0xff] }
 0x4c0   :  { %v1281_v13 = vsel %vm1254_vm9, %v1278_v0, %v1280_v8  ;;  %v1221_v0 = vld [vmem:[%s7193_s6 + $0x60] sm:$0xff]  ;;  %v1227_v10 = vld [vmem:[%s7193_s6 + $0x90] sm:$0xff] }
 0x4c1   :  { %v1329_v15 = vmax.f32 %v1165_v62, %v1281_v13  ;;  %v1175_v17 = vpop.f32.mrb[32].mxu0  ;;  %4650 = vmatpush1.bf16.msra.mxu0 %v4649_v11  ;;  %v1222_v62 = vld [vmem:[%s7193_s6 + $0x68] sm:$0xff]  ;;  %v1229_v13 = vld [vmem:[%s7193_s6 + $0xa0] sm:$0xff] }
 0x4c2   :  { %v1282_v18 = vrot.slane %v1175_v17, 1  ;;  %v4414_v20 = vpop.f32.mrb[33].mxu0  ;;  %4651 = vmatprep.subr.bf16.mxu0 %v5261_v31  ;;  %v1230_v11 = vld [vmem:[%s7193_s6 + $0xa8] sm:$0xff] }
 0x4c4   :  { %v1283_v23 = vsel %vm1254_vm9, %v1280_v8, %v1282_v18  ;;  %v1228_v8 = vld [vmem:[%s7193_s6 + $0x98] sm:$0xff] }
 0x4c5   :  { %v1330_v26 = vmax.f32 %v1170_v7, %v1283_v23  ;;  %v1180_v30 = vpop.f32.mrb[34].mxu0  ;;  %v1225_v7 = vld [vmem:[%s7193_s6 + $0x80] sm:$0xff] }
 0x4c6   :  { %v1284_v32 = vrot.slane %v1180_v30, 1  ;;  %v4417_v36 = vpop.f32.mrb[35].mxu0 }
 0x4c7   :  { %v4652_v37 = vpack.c.bf16 %v1330_v26, %v1329_v15  ;;  %v1232_v15 = vld [vmem:[%s7193_s6 + $0xb8] sm:$0xff] }
 0x4c8   :  { %v1285_v41 = vsel %vm1254_vm9, %v1282_v18, %v1284_v32 }
 0x4c9   :  { %v1331_v44 = vmax.f32 %v1175_v17, %v1285_v41  ;;  %v1185_v47 = vpop.f32.mrb[36].mxu0  ;;  %4653 = vmatpush1.bf16.msra.mxu0 %v4652_v37  ;;  %v1231_v17 = vld [vmem:[%s7193_s6 + $0xb0] sm:$0xff] }
 0x4ca   :  { %v1286_v49 = vrot.slane %v1185_v47, 1  ;;  %v4420_v22 = vpop.f32.mrb[37].mxu0  ;;  %4654 = vmatprep.subr.bf16.mxu0 %v5261_v31 }
 0x4cc   :  { %v1287_v25 = vsel %vm1254_vm9, %v1284_v32, %v1286_v49 }
 0x4cd   :  { %v1332_v27 = vmax.f32 %v1180_v30, %v1287_v25  ;;  %v1190_v29 = vpop.f32.mrb[38].mxu0 }
 0x4ce   :  { %v1288_v33 = vrot.slane %v1190_v29, 1  ;;  %v4423_v35 = vpop.f32.mrb[39].mxu0 }
 0x4cf   :  { %v4655_v38 = vpack.c.bf16 %v1332_v27, %v1331_v44 }
 0x4d0   :  { %v1289_v40 = vsel %vm1254_vm9, %v1286_v49, %v1288_v33 }
 0x4d1   :  { %v1333_v43 = vmax.f32 %v1185_v47, %v1289_v40  ;;  %v1195_v45 = vpop.f32.mrb[40].mxu0  ;;  %4656 = vmatpush1.bf16.msra.mxu0 %v4655_v38 }
 0x4d2   :  { %v1290_v48 = vrot.slane %v1195_v45, 1  ;;  %v4426_v50 = vpop.f32.mrb[41].mxu0  ;;  %4657 = vmatprep.subr.bf16.mxu0 %v5261_v31 }
 0x4d4   :  { %v1291_v53 = vsel %vm1254_vm9, %v1288_v33, %v1290_v48 }
 0x4d5   :  { %v1334_v55 = vmax.f32 %v1190_v29, %v1291_v53  ;;  %v1200_v58 = vpop.f32.mrb[42].mxu0 }
 0x4d6   :  { %v1292_v60 = vrot.slane %v1200_v58, 1  ;;  %v4429_v63 = vpop.f32.mrb[43].mxu0 }
 0x4d7   :  { %v4658_v1 = vpack.c.bf16 %v1334_v55, %v1333_v43 }
 0x4d8   :  { %v1293_v4 = vsel %vm1254_vm9, %v1290_v48, %v1292_v60 }
 0x4d9   :  { %v1335_v6 = vmax.f32 %v1195_v45, %v1293_v4  ;;  %v1205_v9 = vpop.f32.mrb[44].mxu0  ;;  %4659 = vmatpush1.bf16.msra.mxu0 %v4658_v1 }
 0x4da   :  { %v1294_v12 = vrot.slane %v1205_v9, 1  ;;  %v4432_v14 = vpop.f32.mrb[45].mxu0  ;;  %4660 = vmatprep.subr.bf16.mxu0 %v5261_v31 }
 0x4dc   :  { %v1295_v16 = vsel %vm1254_vm9, %v1292_v60, %v1294_v12  ;;  %v1337_v28 = vmax.f32 %v1205_v9, %v1294_v12 }
 0x4dd   :  { %v1336_v21 = vmax.f32 %v1200_v58, %v1295_v16 }
 0x4df   :  { %v4661_v24 = vpack.c.bf16 %v1336_v21, %v1335_v6  ;;  %v1660_v21 = vld [vmem:[%s7194_s7 + $0x8] sm:$0xff] }
 0x4e0   :  { %1984 = vmatprep.mubr.f32.mxu1 %v1660_v21 }
 0x4e1   :  { %4662 = vmatpush1.bf16.msra.mxu0 %v4661_v24  ;;  %v1739_v24 = vld [vmem:[%s7195_s8] sm:$0xff] }
 0x4e2   :  { %1418 = vmatprep.subr.mxu0 %v5267_v19 }
 0x4e5   :  { %4023 = vmatpush1.msk.msra.mxu0 %vm1254_vm9, %v1337_v28  ;;  %v1741_v28 = vld [vmem:[%s7195_s8 + $0x10] sm:$0xff] }
 0x4e6   :  { %1443 = vmatmul.mubr.f32.vlgmr.msra.gmra.mrb[46].mxu0 %v1209_v34  ;;  %v1743_v34 = vld [vmem:[%s7195_s8 + $0x20] sm:$0xff] }
 0x4e7   :  { %4025 = vmatprep.mubr.msk.f32.mxu0 %vm1338_vm8, %v1212_v39  ;;  %v1740_v39 = vld [vmem:[%s7195_s8 + $0x8] sm:$0xff] }
 0x4ea   :  { %1448 = vmatmul.mubr.f32.gmra.mrb[48].mxu0 %v1211_v42  ;;  %v1745_v42 = vld [vmem:[%s7195_s8 + $0x30] sm:$0xff] }
 0x4eb   :  { %4026 = vmatprep.mubr.msk.f32.mxu0 %vm1338_vm8, %v1214_v46  ;;  %v1742_v46 = vld [vmem:[%s7195_s8 + $0x18] sm:$0xff] }
 0x4ee   :  { %1453 = vmatmul.mubr.f32.gmra.mrb[50].mxu0 %v1213_v51  ;;  %v1747_v51 = vld [vmem:[%s7195_s8 + $0x40] sm:$0xff] }
 0x4ef   :  { %4027 = vmatprep.mubr.msk.f32.mxu0 %vm1338_vm8, %v1216_v52  ;;  %v1744_v52 = vld [vmem:[%s7195_s8 + $0x28] sm:$0xff] }
 0x4f2   :  { %1458 = vmatmul.mubr.f32.gmra.mrb[52].mxu0 %v1215_v54  ;;  %v1749_v54 = vld [vmem:[%s7195_s8 + $0x50] sm:$0xff] }
 0x4f3   :  { %4028 = vmatprep.mubr.msk.f32.mxu0 %vm1338_vm8, %v1218_v56  ;;  %v1746_v56 = vld [vmem:[%s7195_s8 + $0x38] sm:$0xff] }
 0x4f6   :  { %1463 = vmatmul.mubr.f32.gmra.mrb[54].mxu0 %v1217_v57  ;;  %v1751_v57 = vld [vmem:[%s7195_s8 + $0x60] sm:$0xff] }
 0x4f7   :  { %4029 = vmatprep.mubr.msk.f32.mxu0 %vm1338_vm8, %v1220_v59  ;;  %v1748_v59 = vld [vmem:[%s7195_s8 + $0x48] sm:$0xff] }
 0x4fa   :  { %1468 = vmatmul.mubr.f32.gmra.mrb[56].mxu0 %v1219_v61  ;;  %v1753_v61 = vld [vmem:[%s7195_s8 + $0x70] sm:$0xff] }
 0x4fb   :  { %4030 = vmatprep.mubr.msk.f32.mxu0 %vm1338_vm8, %v1222_v62  ;;  %v1750_v62 = vld [vmem:[%s7195_s8 + $0x58] sm:$0xff] }
 0x4fe   :  { %1473 = vmatmul.mubr.f32.gmra.mrb[58].mxu0 %v1221_v0  ;;  %v1755_v0 = vld [vmem:[%s7195_s8 + $0x80] sm:$0xff] }
 0x4ff   :  { %4031 = vmatprep.mubr.msk.f32.mxu0 %vm1338_vm8, %v1224_v2  ;;  %v1752_v2 = vld [vmem:[%s7195_s8 + $0x68] sm:$0xff] }
 0x502   :  { %1478 = vmatmul.mubr.f32.gmra.mrb[60].mxu0 %v1223_v3  ;;  %v1757_v3 = vld [vmem:[%s7195_s8 + $0x90] sm:$0xff] }
 0x503   :  { %4032 = vmatprep.mubr.msk.f32.mxu0 %vm1338_vm8, %v1226_v5  ;;  %v1754_v5 = vld [vmem:[%s7195_s8 + $0x78] sm:$0xff] }
 0x506   :  { %1483 = vmatmul.mubr.f32.gmra.mrb[62].mxu0 %v1225_v7  ;;  %v1756_v7 = vld [vmem:[%s7195_s8 + $0x88] sm:$0xff] }
 0x507   :  { %4033 = vmatprep.mubr.msk.f32.mxu0 %vm1338_vm8, %v1228_v8  ;;  %v1758_v8 = vld [vmem:[%s7195_s8 + $0x98] sm:$0xff] }
 0x50a   :  { %1488 = vmatmul.mubr.f32.gmra.mrb[64].mxu0 %v1227_v10 }
 0x50b   :  { %4034 = vmatprep.mubr.msk.f32.mxu0 %vm1338_vm8, %v1230_v11 }
 0x50e   :  { %1493 = vmatmul.mubr.f32.gmra.mrb[66].mxu0 %v1229_v13 }
 0x50f   :  { %4035 = vmatprep.mubr.msk.f32.mxu0 %vm1338_vm8, %v1232_v15 }
 0x512   :  { %1498 = vmatmul.mubr.f32.gmra.mrb[68].mxu0 %v1231_v17 }
 0x5b9   :  { %v1444_v18 = vpop.f32.mrb[46].mxu0 }
 0x5ba   :  { %v1446_v20 = vpop.f32.mrb[47].mxu0 }
 0x5bd   :  { %v1449_v23 = vpop.f32.mrb[48].mxu0 }
 0x5be   :  { %v1451_v26 = vpop.f32.mrb[49].mxu0  ;;  %v5008_v30 = vpack.i.bf16 %v1449_v23, %v1444_v18  ;;  %v4664_v32 = vpack.c.bf16 %v1449_v23, %v1444_v18 }
 0x5c0   :  { %5009 = vrot.lane.b32.xlu1 %v5008_v30, %s5263_s27  ;;  %4665 = vmatpush1.bf16.msra.mxu1 %v4664_v32 }
 0x5c1   :  { %v1454_v36 = vpop.f32.mrb[50].mxu0  ;;  %4666 = vmatprep.subr.bf16.mxu1 %v5261_v31 }
 0x5c2   :  { %v1456_v37 = vpop.f32.mrb[51].mxu0 }
 0x5c5   :  { %v1459_v41 = vpop.f32.mrb[52].mxu0 }
 0x5c6   :  { %v1461_v44 = vpop.f32.mrb[53].mxu0  ;;  %v5013_v47 = vpack.i.bf16 %v1459_v41, %v1454_v36  ;;  %v4667_v49 = vpack.c.bf16 %v1459_v41, %v1454_v36 }
 0x5c8   :  { %5014 = vrot.lane.b32.xlu0 %v5013_v47, %s5263_s27  ;;  %4668 = vmatpush1.bf16.msra.mxu1 %v4667_v49 }
 0x5c9   :  { %v1464_v22 = vpop.f32.mrb[54].mxu0  ;;  %4669 = vmatprep.subr.bf16.mxu1 %v5261_v31 }
 0x5ca   :  { %v1466_v25 = vpop.f32.mrb[55].mxu0 }
 0x5cd   :  { %v1469_v27 = vpop.f32.mrb[56].mxu0 }
 0x5ce   :  { %v1471_v29 = vpop.f32.mrb[57].mxu0  ;;  %v5018_v33 = vpack.i.bf16 %v1469_v27, %v1464_v22  ;;  %v4670_v35 = vpack.c.bf16 %v1469_v27, %v1464_v22 }
 0x5d0   :  { %5019 = vrot.lane.b32.xlu1 %v5018_v33, %s5263_s27  ;;  %4671 = vmatpush1.bf16.msra.mxu1 %v4670_v35 }
 0x5d1   :  { %v1474_v38 = vpop.f32.mrb[58].mxu0  ;;  %4672 = vmatprep.subr.bf16.mxu1 %v5261_v31 }
 0x5d2   :  { %v1476_v40 = vpop.f32.mrb[59].mxu0 }
 0x5d5   :  { %v1479_v43 = vpop.f32.mrb[60].mxu0 }
 0x5d6   :  { %v1481_v45 = vpop.f32.mrb[61].mxu0  ;;  %v5023_v48 = vpack.i.bf16 %v1479_v43, %v1474_v38  ;;  %v4673_v50 = vpack.c.bf16 %v1479_v43, %v1474_v38 }
 0x5d8   :  { %5024 = vrot.lane.b32.xlu0 %v5023_v48, %s5263_s27  ;;  %4674 = vmatpush1.bf16.msra.mxu1 %v4673_v50 }
 0x5d9   :  { %v1484_v53 = vpop.f32.mrb[62].mxu0  ;;  %4675 = vmatprep.subr.bf16.mxu1 %v5261_v31 }
 0x5da   :  { %v1486_v55 = vpop.f32.mrb[63].mxu0 }
 0x5dd   :  { %v1489_v58 = vpop.f32.mrb[64].mxu0 }
 0x5de   :  { %v1491_v60 = vpop.f32.mrb[65].mxu0  ;;  %v5028_v63 = vpack.i.bf16 %v1489_v58, %v1484_v53  ;;  %v4676_v1 = vpack.c.bf16 %v1489_v58, %v1484_v53 }
 0x5e0   :  { %5029 = vrot.lane.b32.xlu1 %v5028_v63, %s5263_s27  ;;  %4677 = vmatpush1.bf16.msra.mxu1 %v4676_v1 }
 0x5e1   :  { %v1494_v4 = vpop.f32.mrb[66].mxu0  ;;  %4678 = vmatprep.subr.bf16.mxu1 %v5261_v31 }
 0x5e2   :  { %v1496_v6 = vpop.f32.mrb[67].mxu0 }
 0x5e4   :  { %5039 = vrot.lane.b32.xlu1 %v5008_v30, %s5262_s26 }
 0x5e5   :  { %v1499_v9 = vpop.f32.mrb[68].mxu0 }
 0x5e6   :  { %v1501_v12 = vpop.f32.mrb[69].mxu0  ;;  %v5033_v14 = vpack.i.bf16 %v1499_v9, %v1494_v4  ;;  %v4679_v16 = vpack.c.bf16 %v1499_v9, %v1494_v4 }
 0x5e8   :  { %5049 = vrot.lane.b32.xlu1 %v5018_v33, %s5262_s26  ;;  %5034 = vrot.lane.b32.xlu0 %v5033_v14, %s5263_s27 }
 0x5e9   :  { %4680 = vmatpush1.bf16.msra.mxu1 %v4679_v16 }
 0x5ea   :  { %4681 = vmatprep.subr.bf16.mxu1 %v5261_v31 }
 0x5ec   :  { %5059 = vrot.lane.b32.xlu1 %v5028_v63, %s5262_s26  ;;  %5044 = vrot.lane.b32.xlu0 %v5013_v47, %s5262_s26 }
 0x5f0   :  { %5069 = vrot.lane.b32.xlu1 %v5008_v30, %s5264_s28  ;;  %5054 = vrot.lane.b32.xlu0 %v5023_v48, %s5262_s26 }
 0x5f4   :  { %5079 = vrot.lane.b32.xlu1 %v5018_v33, %s5264_s28  ;;  %5064 = vrot.lane.b32.xlu0 %v5033_v14, %s5262_s26 }
 0x5f8   :  { %5089 = vrot.lane.b32.xlu1 %v5028_v63, %s5264_s28  ;;  %5074 = vrot.lane.b32.xlu0 %v5013_v47, %s5264_s28 }
 0x5fc   :  { %5099 = vrot.lane.b32.xlu1 %v5008_v30, %s5265_s30  ;;  %5084 = vrot.lane.b32.xlu0 %v5023_v48, %s5264_s28 }
 0x600   :  { %5109 = vrot.lane.b32.xlu1 %v5018_v33, %s5265_s30  ;;  %5094 = vrot.lane.b32.xlu0 %v5033_v14, %s5264_s28 }
 0x604   :  { %5119 = vrot.lane.b32.xlu1 %v5028_v63, %s5265_s30  ;;  %5104 = vrot.lane.b32.xlu0 %v5013_v47, %s5265_s30 }
 0x608   :  { %1761 = vperm.xlu1 %5007, %v1739_v24   ;;  %5114 = vrot.lane.b32.xlu0 %v5023_v48, %s5265_s30 }
 0x60c   :  { %1771 = vperm.xlu1 %5007, %v1741_v28   ;;  %5124 = vrot.lane.b32.xlu0 %v5033_v14, %s5265_s30 }
 0x610   :  { %1781 = vperm.xlu1 %5007, %v1743_v34   ;;  %1766 = vperm.xlu0 %5006, %v1740_v39   ;;  %v1659_v34 = vld [vmem:[%s7194_s7] sm:$0xff]  ;;  %v1664_v39 = vld [vmem:[%s7194_s7 + $0x28] sm:$0xff] }
 0x614   :  { %1791 = vperm.xlu1 %5007, %v1745_v42   ;;  %1776 = vperm.xlu0 %5006, %v1742_v46  }
 0x618   :  { %1801 = vperm.xlu1 %5007, %v1747_v51   ;;  %1786 = vperm.xlu0 %5006, %v1744_v52  }
 0x61c   :  { %1811 = vperm.xlu1 %5007, %v1749_v54   ;;  %1796 = vperm.xlu0 %5006, %v1746_v56   ;;  %v1663_v54 = vld [vmem:[%s7194_s7 + $0x20] sm:$0xff]  ;;  %v1668_v56 = vld [vmem:[%s7194_s7 + $0x48] sm:$0xff] }
 0x620   :  { %1821 = vperm.xlu1 %5007, %v1751_v57   ;;  %1806 = vperm.xlu0 %5006, %v1748_v59  }
 0x624   :  { %1831 = vperm.xlu1 %5007, %v1753_v61   ;;  %1816 = vperm.xlu0 %5006, %v1750_v62  }
 0x628   :  { %1841 = vperm.xlu1 %5007, %v1755_v0   ;;  %1826 = vperm.xlu0 %5006, %v1752_v2   ;;  %v1667_v0 = vld [vmem:[%s7194_s7 + $0x40] sm:$0xff]  ;;  %v1672_v2 = vld [vmem:[%s7194_s7 + $0x68] sm:$0xff] }
 0x62c   :  { %1851 = vperm.xlu1 %5007, %v1757_v3   ;;  %1836 = vperm.xlu0 %5006, %v1754_v5  }
 0x630   :  { %1846 = vperm.xlu0 %5006, %v1756_v7  }
 0x632   :  { %v5010_v10 = vpop.permute.xlu1 %5009 }
 0x633   :  { %v5012_v11 = vunpack.i.h.bf16 %v5010_v10  ;;  %v5011_v13 = vunpack.i.l.bf16 %v5010_v10  ;;  %v1671_v10 = vld [vmem:[%s7194_s7 + $0x60] sm:$0xff] }
 0x634   :  { %1856 = vperm.xlu0 %5006, %v1758_v8  }
 0x635   :  { %v4682_v15 = vpack.c.bf16 %v5012_v11, %v5011_v13  ;;  %v1676_v11 = vld [vmem:[%s7194_s7 + $0x88] sm:$0xff] }
 0x637   :  { %4683 = vmatpush1.bf16.msra.mxu1 %v4682_v15 }
 0x638   :  { %4684 = vmatprep.subr.bf16.mxu1 %v5261_v31 }
 0x63a   :  { %v5015_v17 = vpop.permute.xlu0 %5014 }
 0x63b   :  { %v5017_v18 = vunpack.i.h.bf16 %v5015_v17  ;;  %v5016_v20 = vunpack.i.l.bf16 %v5015_v17 }
 0x63d   :  { %v4685_v23 = vpack.c.bf16 %v5017_v18, %v5016_v20  ;;  %v1675_v20 = vld [vmem:[%s7194_s7 + $0x80] sm:$0xff] }
 0x63f   :  { %4686 = vmatpush1.bf16.msra.mxu1 %v4685_v23  ;;  %v1680_v23 = vld [vmem:[%s7194_s7 + $0xa8] sm:$0xff] }
 0x640   :  { %4687 = vmatprep.subr.bf16.mxu1 %v5261_v31 }
 0x642   :  { %v5020_v26 = vpop.permute.xlu1 %5019 }
 0x643   :  { %v5022_v30 = vunpack.i.h.bf16 %v5020_v26  ;;  %v5021_v32 = vunpack.i.l.bf16 %v5020_v26 }
 0x645   :  { %v4688_v36 = vpack.c.bf16 %v5022_v30, %v5021_v32 }
 0x647   :  { %4689 = vmatpush1.bf16.msra.mxu1 %v4688_v36 }
 0x648   :  { %4690 = vmatprep.subr.bf16.mxu1 %v5261_v31 }
 0x64a   :  { %v5025_v37 = vpop.permute.xlu0 %5024 }
 0x64b   :  { %v5027_v41 = vunpack.i.h.bf16 %v5025_v37  ;;  %v5026_v44 = vunpack.i.l.bf16 %v5025_v37  ;;  %v1679_v37 = vld [vmem:[%s7194_s7 + $0xa0] sm:$0xff] }
 0x64d   :  { %v4691_v47 = vpack.c.bf16 %v5027_v41, %v5026_v44  ;;  %v1684_v41 = vld [vmem:[%s7194_s7 + $0xc8] sm:$0xff] }
 0x64f   :  { %4692 = vmatpush1.bf16.msra.mxu1 %v4691_v47 }
 0x650   :  { %4693 = vmatprep.subr.bf16.mxu1 %v5261_v31 }
 0x652   :  { %v5030_v49 = vpop.permute.xlu1 %5029 }
 0x653   :  { %v5032_v22 = vunpack.i.h.bf16 %v5030_v49  ;;  %v5031_v25 = vunpack.i.l.bf16 %v5030_v49 }
 0x655   :  { %v4694_v27 = vpack.c.bf16 %v5032_v22, %v5031_v25  ;;  %v1683_v25 = vld [vmem:[%s7194_s7 + $0xc0] sm:$0xff] }
 0x656   :  { %v5040_v29 = vpop.permute.xlu1 %5039 }
 0x657   :  { %4695 = vmatpush1.bf16.msra.mxu1 %v4694_v27  ;;  %v5042_v40 = vunpack.i.h.bf16 %v5040_v29  ;;  %v5041_v43 = vunpack.i.l.bf16 %v5040_v29  ;;  %v1688_v27 = vld [vmem:[%s7194_s7 + $0xe8] sm:$0xff] }
 0x658   :  { %4696 = vmatprep.subr.bf16.mxu1 %v5261_v31 }
 0x659   :  { %v4700_v50 = vpack.c.bf16 %v5042_v40, %v5041_v43  ;;  %v1687_v40 = vld [vmem:[%s7194_s7 + $0xe0] sm:$0xff]  ;;  %v1692_v43 = vld [vmem:[%s7194_s7 + $0x108] sm:$0xff] }
 0x65a   :  { %v5035_v33 = vpop.permute.xlu0 %5034  ;;  %v5050_v58 = vpop.permute.xlu1 %5049 }
 0x65b   :  { %v5037_v35 = vunpack.i.h.bf16 %v5035_v33  ;;  %v5036_v38 = vunpack.i.l.bf16 %v5035_v33  ;;  %v5052_v60 = vunpack.i.h.bf16 %v5050_v58  ;;  %v5051_v63 = vunpack.i.l.bf16 %v5050_v58  ;;  %v1696_v58 = vld [vmem:[%s7194_s7 + $0x128] sm:$0xff] }
 0x65d   :  { %v4697_v45 = vpack.c.bf16 %v5037_v35, %v5036_v38  ;;  %v4706_v6 = vpack.c.bf16 %v5052_v60, %v5051_v63 }
 0x65e   :  { %v5045_v48 = vpop.permute.xlu0 %5044  ;;  %v5060_v14 = vpop.permute.xlu1 %5059 }
 0x65f   :  { %4698 = vmatpush1.bf16.msra.mxu1 %v4697_v45  ;;  %v5047_v53 = vunpack.i.h.bf16 %v5045_v48  ;;  %v5046_v55 = vunpack.i.l.bf16 %v5045_v48  ;;  %v5062_v16 = vunpack.i.h.bf16 %v5060_v14  ;;  %v5061_v21 = vunpack.i.l.bf16 %v5060_v14 }
 0x660   :  { %4699 = vmatprep.subr.bf16.mxu1 %v5261_v31 }
 0x661   :  { %v4703_v1 = vpack.c.bf16 %v5047_v53, %v5046_v55  ;;  %v4712_v42 = vpack.c.bf16 %v5062_v16, %v5061_v21  ;;  %v1691_v55 = vld [vmem:[%s7194_s7 + $0x100] sm:$0xff] }
 0x662   :  { %v5055_v4 = vpop.permute.xlu0 %5054  ;;  %v5070_v52 = vpop.permute.xlu1 %5069 }
 0x663   :  { %4701 = vmatpush1.bf16.msra.mxu1 %v4700_v50  ;;  %v5057_v9 = vunpack.i.h.bf16 %v5055_v4  ;;  %v5056_v12 = vunpack.i.l.bf16 %v5055_v4  ;;  %v5072_v57 = vunpack.i.h.bf16 %v5070_v52  ;;  %v5071_v59 = vunpack.i.l.bf16 %v5070_v52  ;;  %v1708_v52 = vld [vmem:[%s7194_s7 + $0x188] sm:$0xff] }
 0x664   :  { %4702 = vmatprep.subr.bf16.mxu1 %v5261_v31 }
 0x665   :  { %v4709_v24 = vpack.c.bf16 %v5057_v9, %v5056_v12  ;;  %v4718_v3 = vpack.c.bf16 %v5072_v57, %v5071_v59  ;;  %v1700_v9 = vld [vmem:[%s7194_s7 + $0x148] sm:$0xff] }
 0x666   :  { %v5065_v28 = vpop.permute.xlu0 %5064  ;;  %v5080_v8 = vpop.permute.xlu1 %5079 }
 0x667   :  { %4704 = vmatpush1.bf16.msra.mxu1 %v4703_v1  ;;  %v5067_v46 = vunpack.i.h.bf16 %v5065_v28  ;;  %v5066_v51 = vunpack.i.l.bf16 %v5065_v28  ;;  %v5082_v13 = vunpack.i.h.bf16 %v5080_v8  ;;  %v5081_v15 = vunpack.i.l.bf16 %v5080_v8  ;;  %v1704_v28 = vld [vmem:[%s7194_s7 + $0x168] sm:$0xff] }
 0x668   :  { %4705 = vmatprep.subr.bf16.mxu1 %v5261_v31 }
 0x669   :  { %v4715_v61 = vpack.c.bf16 %v5067_v46, %v5066_v51  ;;  %v4724_v26 = vpack.c.bf16 %v5082_v13, %v5081_v15  ;;  %v1703_v51 = vld [vmem:[%s7194_s7 + $0x160] sm:$0xff]  ;;  %v1724_v15 = vld [vmem:[%s7194_s7 + $0x208] sm:$0xff] }
 0x66a   :  { %v5075_v62 = vpop.permute.xlu0 %5074  ;;  %v5090_v36 = vpop.permute.xlu1 %5089  ;;  %v1719_v13 = vld [vmem:[%s7194_s7 + $0x1e0] sm:$0xff] }
 0x66b   :  { %4707 = vmatpush1.bf16.msra.mxu1 %v4706_v6  ;;  %v5077_v5 = vunpack.i.h.bf16 %v5075_v62  ;;  %v5076_v7 = vunpack.i.l.bf16 %v5075_v62  ;;  %v5092_v44 = vunpack.i.h.bf16 %v5090_v36  ;;  %v5091_v47 = vunpack.i.l.bf16 %v5090_v36  ;;  %v1695_v6 = vld [vmem:[%s7194_s7 + $0x120] sm:$0xff]  ;;  %v1712_v62 = vld [vmem:[%s7194_s7 + $0x1a8] sm:$0xff]  ;;  %v1662_v36 = vld [vmem:[%s7194_s7 + $0x18] sm:$0xff] }
 0x66c   :  { %4708 = vmatprep.subr.bf16.mxu1 %v5261_v31 }
 0x66d   :  { %v4721_v17 = vpack.c.bf16 %v5077_v5, %v5076_v7  ;;  %v4730_v29 = vpack.c.bf16 %v5092_v44, %v5091_v47  ;;  %v1711_v5 = vld [vmem:[%s7194_s7 + $0x1a0] sm:$0xff]  ;;  %v1716_v7 = vld [vmem:[%s7194_s7 + $0x1c8] sm:$0xff]  ;;  %v1665_v44 = vld [vmem:[%s7194_s7 + $0x30] sm:$0xff] }
 0x66e   :  { %v5085_v18 = vpop.permute.xlu0 %5084  ;;  %v5100_v38 = vpop.permute.xlu1 %5099  ;;  %v1670_v47 = vld [vmem:[%s7194_s7 + $0x58] sm:$0xff] }
 0x66f   :  { %4710 = vmatpush1.bf16.msra.mxu1 %v4709_v24  ;;  %v5087_v30 = vunpack.i.h.bf16 %v5085_v18  ;;  %v5086_v32 = vunpack.i.l.bf16 %v5085_v18  ;;  %v5102_v45 = vunpack.i.h.bf16 %v5100_v38  ;;  %v5101_v48 = vunpack.i.l.bf16 %v5100_v38  ;;  %v1699_v24 = vld [vmem:[%s7194_s7 + $0x140] sm:$0xff]  ;;  %v1728_v18 = vld [vmem:[%s7194_s7 + $0x228] sm:$0xff]  ;;  %v1686_v38 = vld [vmem:[%s7194_s7 + $0xd8] sm:$0xff] }
 0x670   :  { %4711 = vmatprep.subr.bf16.mxu1 %v5261_v31 }
 0x671   :  { %v4727_v49 = vpack.c.bf16 %v5087_v30, %v5086_v32  ;;  %v4736_v60 = vpack.c.bf16 %v5102_v45, %v5101_v48  ;;  %v1736_v30 = vld [vmem:[%s7194_s7 + $0x268] sm:$0xff]  ;;  %v1735_v32 = vld [vmem:[%s7194_s7 + $0x260] sm:$0xff]  ;;  %v1689_v45 = vld [vmem:[%s7194_s7 + $0xf0] sm:$0xff] }
 0x672   :  { %1985 = vmatmul.mubr.f32.vlgmr.msra.gmra.mrb[46].mxu1 %v1659_v34  ;;  %v5095_v22 = vpop.permute.xlu0 %5094  ;;  %v5110_v4 = vpop.permute.xlu1 %5109  ;;  %v1694_v48 = vld [vmem:[%s7194_s7 + $0x118] sm:$0xff] }
 0x673   :  { %4713 = vmatpush1.bf16.msra.mxu1 %v4712_v42  ;;  %1989 = vmatprep.mubr.f32.mxu1 %v1664_v39  ;;  %v5097_v33 = vunpack.i.h.bf16 %v5095_v22  ;;  %v5096_v35 = vunpack.i.l.bf16 %v5095_v22  ;;  %v5112_v12 = vunpack.i.h.bf16 %v5110_v4  ;;  %v5111_v14 = vunpack.i.l.bf16 %v5110_v4  ;;  %v1674_v22 = vld [vmem:[%s7194_s7 + $0x78] sm:$0xff] }
 0x674   :  { %4714 = vmatprep.subr.bf16.mxu1 %v5261_v31  ;;  %v1710_v4 = vld [vmem:[%s7194_s7 + $0x198] sm:$0xff] }
 0x675   :  { %v4733_v50 = vpack.c.bf16 %v5097_v33, %v5096_v35  ;;  %v4742_v34 = vpack.c.bf16 %v5112_v12, %v5111_v14  ;;  %v1682_v33 = vld [vmem:[%s7194_s7 + $0xb8] sm:$0xff]  ;;  %v1681_v35 = vld [vmem:[%s7194_s7 + $0xb0] sm:$0xff] }
 0x676   :  { %1990 = vmatmul.mubr.f32.gmra.mrb[48].mxu1 %v1663_v54  ;;  %v5105_v53 = vpop.permute.xlu0 %5104  ;;  %v5120_v46 = vpop.permute.xlu1 %5119  ;;  %v1713_v12 = vld [vmem:[%s7194_s7 + $0x1b0] sm:$0xff]  ;;  %v1718_v14 = vld [vmem:[%s7194_s7 + $0x1d8] sm:$0xff] }
 0x677   :  { %4716 = vmatpush1.bf16.msra.mxu1 %v4715_v61  ;;  %1994 = vmatprep.mubr.f32.mxu1 %v1668_v56  ;;  %v5107_v63 = vunpack.i.h.bf16 %v5105_v53  ;;  %v5106_v1 = vunpack.i.l.bf16 %v5105_v53  ;;  %v5122_v54 = vunpack.i.h.bf16 %v5120_v46  ;;  %v5121_v56 = vunpack.i.l.bf16 %v5120_v46  ;;  %v1707_v61 = vld [vmem:[%s7194_s7 + $0x180] sm:$0xff]  ;;  %v1698_v53 = vld [vmem:[%s7194_s7 + $0x138] sm:$0xff] }
 0x678   :  { %4717 = vmatprep.subr.bf16.mxu1 %v5261_v31  ;;  %v1734_v46 = vld [vmem:[%s7194_s7 + $0x258] sm:$0xff] }
 0x679   :  { %v4739_v16 = vpack.c.bf16 %v5107_v63, %v5106_v1  ;;  %v1706_v63 = vld [vmem:[%s7194_s7 + $0x178] sm:$0xff]  ;;  %v1705_v1 = vld [vmem:[%s7194_s7 + $0x170] sm:$0xff] }
 0x67a   :  { %1995 = vmatmul.mubr.f32.gmra.mrb[50].mxu1 %v1667_v0  ;;  %v5115_v21 = vpop.permute.xlu0 %5114  ;;  %v4748_v0 = vpack.c.bf16 %v5122_v54, %v5121_v56  ;;  %v1737_v54 = vld [vmem:[%s7194_s7 + $0x270] sm:$0xff]  ;;  %v2370_v56 = vld [vmem:[%s7196_s9] sm:$0xff] }
 0x67b   :  { %4719 = vmatpush1.bf16.msra.mxu1 %v4718_v3  ;;  %1999 = vmatprep.mubr.f32.mxu1 %v1672_v2  ;;  %v5117_v39 = vunpack.i.h.bf16 %v5115_v21  ;;  %v5116_v42 = vunpack.i.l.bf16 %v5115_v21  ;;  %v1722_v21 = vld [vmem:[%s7194_s7 + $0x1f8] sm:$0xff] }
 0x67c   :  { %4720 = vmatprep.subr.bf16.mxu1 %v5261_v31 }
 0x67d   :  { %v4745_v57 = vpack.c.bf16 %v5117_v39, %v5116_v42  ;;  %v1730_v39 = vld [vmem:[%s7194_s7 + $0x238] sm:$0xff]  ;;  %v1729_v42 = vld [vmem:[%s7194_s7 + $0x230] sm:$0xff] }
 0x67e   :  { %2000 = vmatmul.mubr.f32.gmra.mrb[52].mxu1 %v1671_v10  ;;  %v5125_v59 = vpop.permute.xlu0 %5124  ;;  %v1715_v10 = vld [vmem:[%s7194_s7 + $0x1c0] sm:$0xff] }
 0x67f   :  { %4722 = vmatpush1.bf16.msra.mxu1 %v4721_v17  ;;  %2004 = vmatprep.mubr.f32.mxu1 %v1676_v11  ;;  %v5127_v2 = vunpack.i.h.bf16 %v5125_v59  ;;  %v5126_v3 = vunpack.i.l.bf16 %v5125_v59  ;;  %v1720_v11 = vld [vmem:[%s7194_s7 + $0x1e8] sm:$0xff]  ;;  %v1723_v17 = vld [vmem:[%s7194_s7 + $0x200] sm:$0xff] }
 0x680   :  { %4723 = vmatprep.subr.bf16.mxu1 %v5261_v31 }
 0x681   :  { %v4751_v8 = vpack.c.bf16 %v5127_v2, %v5126_v3 }
 0x682   :  { %2005 = vmatmul.mubr.f32.gmra.mrb[54].mxu1 %v1675_v20  ;;  %v1727_v20 = vld [vmem:[%s7194_s7 + $0x220] sm:$0xff] }
 0x683   :  { %4725 = vmatpush1.bf16.msra.mxu1 %v4724_v26  ;;  %2009 = vmatprep.mubr.f32.mxu1 %v1680_v23  ;;  %v1732_v23 = vld [vmem:[%s7194_s7 + $0x248] sm:$0xff]  ;;  %v1731_v26 = vld [vmem:[%s7194_s7 + $0x240] sm:$0xff] }
 0x684   :  { %4726 = vmatprep.subr.bf16.mxu1 %v5261_v31 }
 0x686   :  { %2010 = vmatmul.mubr.f32.gmra.mrb[56].mxu1 %v1679_v37  ;;  %v1661_v37 = vld [vmem:[%s7194_s7 + $0x10] sm:$0xff] }
 0x687   :  { %4728 = vmatpush1.bf16.msra.mxu1 %v4727_v49  ;;  %2014 = vmatprep.mubr.f32.mxu1 %v1684_v41  ;;  %v1666_v41 = vld [vmem:[%s7194_s7 + $0x38] sm:$0xff]  ;;  %v1669_v49 = vld [vmem:[%s7194_s7 + $0x50] sm:$0xff] }
 0x688   :  { %4729 = vmatprep.subr.bf16.mxu1 %v5261_v31 }
 0x68a   :  { %2015 = vmatmul.mubr.f32.gmra.mrb[58].mxu1 %v1683_v25  ;;  %v1673_v25 = vld [vmem:[%s7194_s7 + $0x70] sm:$0xff] }
 0x68b   :  { %4731 = vmatpush1.bf16.msra.mxu1 %v4730_v29  ;;  %2019 = vmatprep.mubr.f32.mxu1 %v1688_v27  ;;  %v1678_v27 = vld [vmem:[%s7194_s7 + $0x98] sm:$0xff]  ;;  %v1677_v29 = vld [vmem:[%s7194_s7 + $0x90] sm:$0xff] }
 0x68c   :  { %4732 = vmatprep.subr.bf16.mxu1 %v5261_v31 }
 0x68e   :  { %2020 = vmatmul.mubr.f32.gmra.mrb[60].mxu1 %v1687_v40  ;;  %v1685_v40 = vld [vmem:[%s7194_s7 + $0xd0] sm:$0xff] }
 0x68f   :  { %4734 = vmatpush1.bf16.msra.mxu1 %v4733_v50  ;;  %2024 = vmatprep.mubr.f32.mxu1 %v1692_v43  ;;  %v1690_v43 = vld [vmem:[%s7194_s7 + $0xf8] sm:$0xff]  ;;  %v1693_v50 = vld [vmem:[%s7194_s7 + $0x110] sm:$0xff] }
 0x690   :  { %4735 = vmatprep.subr.bf16.mxu1 %v5261_v31 }
 0x692   :  { %2025 = vmatmul.mubr.f32.gmra.mrb[62].mxu1 %v1691_v55  ;;  %v1697_v55 = vld [vmem:[%s7194_s7 + $0x130] sm:$0xff] }
 0x693   :  { %4737 = vmatpush1.bf16.msra.mxu1 %v4736_v60  ;;  %2029 = vmatprep.mubr.f32.mxu1 %v1696_v58  ;;  %v1702_v58 = vld [vmem:[%s7194_s7 + $0x158] sm:$0xff]  ;;  %v1701_v60 = vld [vmem:[%s7194_s7 + $0x150] sm:$0xff] }
 0x694   :  { %4738 = vmatprep.subr.bf16.mxu1 %v5261_v31 }
 0x696   :  { %2030 = vmatmul.mubr.f32.gmra.mrb[64].mxu1 %v1695_v6  ;;  %v1709_v6 = vld [vmem:[%s7194_s7 + $0x190] sm:$0xff] }
 0x697   :  { %4740 = vmatpush1.bf16.msra.mxu1 %v4739_v16  ;;  %2034 = vmatprep.mubr.f32.mxu1 %v1700_v9  ;;  %v1714_v9 = vld [vmem:[%s7194_s7 + $0x1b8] sm:$0xff]  ;;  %v1717_v16 = vld [vmem:[%s7194_s7 + $0x1d0] sm:$0xff] }
 0x698   :  { %4741 = vmatprep.subr.bf16.mxu1 %v5261_v31 }
 0x69a   :  { %2035 = vmatmul.mubr.f32.gmra.mrb[66].mxu1 %v1699_v24  ;;  %v1721_v24 = vld [vmem:[%s7194_s7 + $0x1f0] sm:$0xff] }
 0x69b   :  { %4743 = vmatpush1.bf16.msra.mxu1 %v4742_v34  ;;  %2039 = vmatprep.mubr.f32.mxu1 %v1704_v28  ;;  %v1726_v28 = vld [vmem:[%s7194_s7 + $0x218] sm:$0xff]  ;;  %v1725_v34 = vld [vmem:[%s7194_s7 + $0x210] sm:$0xff] }
 0x69c   :  { %4744 = vmatprep.subr.bf16.mxu1 %v5261_v31 }
 0x69e   :  { %2040 = vmatmul.mubr.f32.gmra.mrb[68].mxu1 %v1703_v51  ;;  %v1733_v51 = vld [vmem:[%s7194_s7 + $0x250] sm:$0xff] }
 0x69f   :  { %4746 = vmatpush1.bf16.msra.mxu1 %v4745_v57  ;;  %2044 = vmatprep.mubr.f32.mxu1 %v1708_v52  ;;  %v1738_v52 = vld [vmem:[%s7194_s7 + $0x278] sm:$0xff]  ;;  %v2371_v57 = vld [vmem:[%s7196_s9 + $0x8] sm:$0xff] }
 0x6a0   :  { %4747 = vmatprep.subr.bf16.mxu1 %v5261_v31  ;;  %v4753_v59 = vpack.c.bf16 %v2371_v57, %v2370_v56 }
 0x6a2   :  { %2045 = vmatmul.mubr.f32.gmra.mrb[70].mxu1 %v1707_v61  ;;  %4754 = vmatprep.subr.bf16.mxu0 %v4753_v59  ;;  %v2372_v61 = vld [vmem:[%s7196_s9 + $0x10] sm:$0x3] }
 0x6a3   :  { %4749 = vmatpush1.bf16.msra.mxu1 %v4748_v0  ;;  %2049 = vmatprep.mubr.f32.mxu1 %v1712_v62  ;;  %v1762_v62 = vpop.permute.xlu1 %1761 }
 0x6a4   :  { %4750 = vmatprep.subr.bf16.mxu1 %v5261_v31  ;;  %4756 = vmatpush3.bf16.msra.mxu0 %v4753_v59 }
 0x6a5   :  { %4437 = vmatprep.subr.msk.mxu0 %vm2434_vm11, %v2372_v61 }
 0x6a6   :  { %2050 = vmatmul.mubr.f32.gmra.mrb[72].mxu1 %v1711_v5 }
 0x6a7   :  { %4752 = vmatpush1.bf16.msra.mxu1 %v4751_v8  ;;  %2054 = vmatprep.mubr.f32.mxu1 %v1716_v7  ;;  %v1767_v7 = vpop.permute.xlu0 %1766 }
 0x6a8   :  { %4820 = vmatprep.subr.bf16.mxu1 %v5261_v31  ;;  %4438 = vmatpush3.msk.msra.mxu0 %vm2434_vm11, %v2372_v61 }
 0x6a9   :  { %4757 = vmatprep.subr.bf16.mxu0 %v5261_v31 }
 0x6aa   :  { %2055 = vmatmul.mubr.f32.gmra.mrb[74].mxu1 %v1715_v10 }
 0x6ab   :  { %2059 = vmatprep.mubr.f32.mxu1 %v1720_v11 }
 0x6ae   :  { %2060 = vmatmul.mubr.f32.gmra.mrb[76].mxu1 %v1719_v13 }
 0x6af   :  { %2064 = vmatprep.mubr.f32.mxu1 %v1724_v15  ;;  %v1772_v15 = vpop.permute.xlu1 %1771 }
 0x6b2   :  { %2065 = vmatmul.mubr.f32.gmra.mrb[78].mxu1 %v1723_v17 }
 0x6b3   :  { %2069 = vmatprep.mubr.f32.mxu1 %v1728_v18 }
 0x6b6   :  { %2070 = vmatmul.mubr.f32.gmra.mrb[80].mxu1 %v1727_v20 }
 0x6b7   :  { %2074 = vmatprep.mubr.f32.mxu1 %v1732_v23 }
 0x6ba   :  { %2075 = vmatmul.mubr.f32.gmra.mrb[82].mxu1 %v1731_v26  ;;  %v1777_v26 = vpop.permute.xlu0 %1776 }
 0x6bb   :  { %2079 = vmatprep.mubr.f32.mxu1 %v1736_v30 }
 0x6be   :  { %2080 = vmatmul.mubr.f32.gmra.mrb[84].mxu1 %v1735_v32 }
 0x6bf   :  { %4036 = vmatprep.mubr.msk.f32.mxu1 %vm1859_vm10, %v1662_v36 }
 0x6c2   :  { %2150 = vmatmul.mubr.f32.vlgmr.msra.gmra.mrb[46].mxu1 %v1661_v37 }
 0x6c3   :  { %4037 = vmatprep.mubr.msk.f32.mxu1 %vm1859_vm10, %v1666_v41  ;;  %v1782_v41 = vpop.permute.xlu1 %1781 }
 0x6c6   :  { %2155 = vmatmul.mubr.f32.gmra.mrb[48].mxu1 %v1665_v44 }
 0x6c7   :  { %4038 = vmatprep.mubr.msk.f32.mxu1 %vm1859_vm10, %v1670_v47 }
 0x6ca   :  { %2160 = vmatmul.mubr.f32.gmra.mrb[50].mxu1 %v1669_v49 }
 0x6cb   :  { %4039 = vmatprep.mubr.msk.f32.mxu1 %vm1859_vm10, %v1674_v22 }
 0x6ce   :  { %2165 = vmatmul.mubr.f32.gmra.mrb[52].mxu1 %v1673_v25  ;;  %v1787_v25 = vpop.permute.xlu0 %1786 }
 0x6cf   :  { %4040 = vmatprep.mubr.msk.f32.mxu1 %vm1859_vm10, %v1678_v27 }
 0x6d2   :  { %2170 = vmatmul.mubr.f32.gmra.mrb[54].mxu1 %v1677_v29 }
 0x6d3   :  { %4041 = vmatprep.mubr.msk.f32.mxu1 %vm1859_vm10, %v1682_v33 }
 0x6d6   :  { %2175 = vmatmul.mubr.f32.gmra.mrb[56].mxu1 %v1681_v35 }
 0x6d7   :  { %4042 = vmatprep.mubr.msk.f32.mxu1 %vm1859_vm10, %v1686_v38  ;;  %v1792_v38 = vpop.permute.xlu1 %1791 }
 0x6da   :  { %2180 = vmatmul.mubr.f32.gmra.mrb[58].mxu1 %v1685_v40 }
 0x6db   :  { %4043 = vmatprep.mubr.msk.f32.mxu1 %vm1859_vm10, %v1690_v43 }
 0x6de   :  { %2185 = vmatmul.mubr.f32.gmra.mrb[60].mxu1 %v1689_v45 }
 0x6df   :  { %4044 = vmatprep.mubr.msk.f32.mxu1 %vm1859_vm10, %v1694_v48 }
 0x6e2   :  { %2190 = vmatmul.mubr.f32.gmra.mrb[62].mxu1 %v1693_v50  ;;  %v1797_v50 = vpop.permute.xlu0 %1796 }
 0x6e3   :  { %4045 = vmatprep.mubr.msk.f32.mxu1 %vm1859_vm10, %v1698_v53 }
 0x6e6   :  { %2195 = vmatmul.mubr.f32.gmra.mrb[64].mxu1 %v1697_v55 }
 0x6e7   :  { %4046 = vmatprep.mubr.msk.f32.mxu1 %vm1859_vm10, %v1702_v58 }
 0x6ea   :  { %2200 = vmatmul.mubr.f32.gmra.mrb[66].mxu1 %v1701_v60 }
 0x6eb   :  { %4047 = vmatprep.mubr.msk.f32.mxu1 %vm1859_vm10, %v1706_v63  ;;  %v1802_v63 = vpop.permute.xlu1 %1801 }
 0x6ee   :  { %2205 = vmatmul.mubr.f32.gmra.mrb[68].mxu1 %v1705_v1 }
 0x6ef   :  { %4048 = vmatprep.mubr.msk.f32.mxu1 %vm1859_vm10, %v1710_v4 }
 0x6f2   :  { %2210 = vmatmul.mubr.f32.gmra.mrb[70].mxu1 %v1709_v6 }
 0x6f3   :  { %4049 = vmatprep.mubr.msk.f32.mxu1 %vm1859_vm10, %v1714_v9 }
 0x6f6   :  { %2215 = vmatmul.mubr.f32.gmra.mrb[72].mxu1 %v1713_v12  ;;  %v1807_v12 = vpop.permute.xlu0 %1806 }
 0x6f7   :  { %4050 = vmatprep.mubr.msk.f32.mxu1 %vm1859_vm10, %v1718_v14 }
 0x6fa   :  { %2220 = vmatmul.mubr.f32.gmra.mrb[74].mxu1 %v1717_v16 }
 0x6fb   :  { %4051 = vmatprep.mubr.msk.f32.mxu1 %vm1859_vm10, %v1722_v21 }
 0x6fe   :  { %2225 = vmatmul.mubr.f32.gmra.mrb[76].mxu1 %v1721_v24 }
 0x6ff   :  { %4052 = vmatprep.mubr.msk.f32.mxu1 %vm1859_vm10, %v1726_v28  ;;  %v1812_v28 = vpop.permute.xlu1 %1811 }
 0x702   :  { %2230 = vmatmul.mubr.f32.gmra.mrb[78].mxu1 %v1725_v34 }
 0x703   :  { %4053 = vmatprep.mubr.msk.f32.mxu1 %vm1859_vm10, %v1730_v39  ;;  %v1822_v59 = vpop.permute.xlu1 %1821 }
 0x706   :  { %2235 = vmatmul.mubr.f32.gmra.mrb[80].mxu1 %v1729_v42 }
 0x707   :  { %4054 = vmatprep.mubr.msk.f32.mxu1 %vm1859_vm10, %v1734_v46 }
 0x70a   :  { %2240 = vmatmul.mubr.f32.gmra.mrb[82].mxu1 %v1733_v51  ;;  %v1817_v51 = vpop.permute.xlu0 %1816 }
 0x70b   :  { %4055 = vmatprep.mubr.msk.f32.mxu1 %vm1859_vm10, %v1738_v52 }
 0x70e   :  { %2245 = vmatmul.mubr.f32.gmra.mrb[84].mxu1 %v1737_v54 }
 0x795   :  { %v2151_v0 = vpop.f32.mrb[46].mxu1 }
 0x796   :  { %v6440_v2 = vadd.f32 %v2151_v0, %v1762_v62  ;;  %v2153_v3 = vpop.f32.mrb[47].mxu1 }
 0x798   :  { %v2250_v5 = vmax.f32 %v6440_v2, 0.0 }
 0x799   :  { %v2156_v8 = vpop.f32.mrb[48].mxu1 }
 0x79a   :  { %v6443_v10 = vadd.f32 %v2156_v8, %v1767_v7  ;;  %v2158_v11 = vpop.f32.mrb[49].mxu1  ;;  %2290 = vrot.lane.b32.xlu1 %v2250_v5, %s5263_s27  ;;  %v1827_v7 = vpop.permute.xlu0 %1826 }
 0x79c   :  { %v2251_v13 = vmax.f32 %v6443_v10, 0.0 }
 0x79d   :  { %v2161_v17 = vpop.f32.mrb[50].mxu1 }
 0x79e   :  { %v6449_v18 = vadd.f32 %v2161_v17, %v1772_v15  ;;  %v2163_v20 = vpop.f32.mrb[51].mxu1  ;;  %2292 = vrot.lane.b32.xlu0 %v2251_v13, %s5263_s27 }
 0x79f   :  { %v1832_v20 = vpop.permute.xlu1 %1831 }
 0x7a0   :  { %v2252_v23 = vmax.f32 %v6449_v18, 0.0 }
 0x7a1   :  { %v2166_v30 = vpop.f32.mrb[52].mxu1 }
 0x7a2   :  { %v6455_v32 = vadd.f32 %v2166_v30, %v1777_v26  ;;  %v2168_v36 = vpop.f32.mrb[53].mxu1  ;;  %2294 = vrot.lane.b32.xlu1 %v2252_v23, %s5263_s27 }
 0x7a4   :  { %v2253_v37 = vmax.f32 %v6455_v32, 0.0 }
 0x7a5   :  { %v2171_v44 = vpop.f32.mrb[54].mxu1 }
 0x7a6   :  { %v6461_v47 = vadd.f32 %v2171_v44, %v1782_v41  ;;  %v2173_v49 = vpop.f32.mrb[55].mxu1  ;;  %2296 = vrot.lane.b32.xlu0 %v2253_v37, %s5263_s27  ;;  %v1837_v44 = vpop.permute.xlu0 %1836 }
 0x7a8   :  { %v2254_v22 = vmax.f32 %v6461_v47, 0.0 }
 0x7a9   :  { %v2176_v27 = vpop.f32.mrb[56].mxu1 }
 0x7aa   :  { %v6467_v29 = vadd.f32 %v2176_v27, %v1787_v25  ;;  %v2178_v33 = vpop.f32.mrb[57].mxu1  ;;  %2298 = vrot.lane.b32.xlu1 %v2254_v22, %s5263_s27 }
 0x7ac   :  { %v2255_v35 = vmax.f32 %v6467_v29, 0.0 }
 0x7ad   :  { %v2181_v40 = vpop.f32.mrb[58].mxu1 }
 0x7ae   :  { %v6473_v43 = vadd.f32 %v2181_v40, %v1792_v38  ;;  %v2183_v45 = vpop.f32.mrb[59].mxu1  ;;  %2300 = vrot.lane.b32.xlu0 %v2255_v35, %s5263_s27  ;;  %v1842_v38 = vpop.permute.xlu1 %1841 }
 0x7b0   :  { %v2256_v48 = vmax.f32 %v6473_v43, 0.0 }
 0x7b1   :  { %v2186_v53 = vpop.f32.mrb[60].mxu1 }
 0x7b2   :  { %v6479_v55 = vadd.f32 %v2186_v53, %v1797_v50  ;;  %v2188_v58 = vpop.f32.mrb[61].mxu1  ;;  %2302 = vrot.lane.b32.xlu1 %v2256_v48, %s5263_s27 }
 0x7b3   :  { %v1847_v58 = vpop.permute.xlu0 %1846 }
 0x7b4   :  { %v2257_v60 = vmax.f32 %v6479_v55, 0.0 }
 0x7b5   :  { %v2191_v1 = vpop.f32.mrb[62].mxu1 }
 0x7b6   :  { %v6485_v4 = vadd.f32 %v2191_v1, %v1802_v63  ;;  %v2193_v6 = vpop.f32.mrb[63].mxu1  ;;  %2304 = vrot.lane.b32.xlu0 %v2257_v60, %s5263_s27 }
 0x7b8   :  { %v2258_v9 = vmax.f32 %v6485_v4, 0.0 }
 0x7b9   :  { %v2196_v14 = vpop.f32.mrb[64].mxu1 }
 0x7ba   :  { %v6491_v16 = vadd.f32 %v2196_v14, %v1807_v12  ;;  %v2198_v21 = vpop.f32.mrb[65].mxu1  ;;  %2306 = vrot.lane.b32.xlu1 %v2258_v9, %s5263_s27  ;;  %v1852_v14 = vpop.permute.xlu1 %1851 }
 0x7bc   :  { %v2259_v24 = vmax.f32 %v6491_v16, 0.0 }
 0x7bd   :  { %v2201_v34 = vpop.f32.mrb[66].mxu1 }
 0x7be   :  { %v6497_v39 = vadd.f32 %v2201_v34, %v1812_v28  ;;  %v2203_v42 = vpop.f32.mrb[67].mxu1  ;;  %2308 = vrot.lane.b32.xlu0 %v2259_v24, %s5263_s27 }
 0x7c0   :  { %v2260_v46 = vmax.f32 %v6497_v39, 0.0 }
 0x7c1   :  { %v2206_v52 = vpop.f32.mrb[68].mxu1 }
 0x7c2   :  { %v6503_v54 = vadd.f32 %v2206_v52, %v1817_v51  ;;  %v2208_v56 = vpop.f32.mrb[69].mxu1  ;;  %2310 = vrot.lane.b32.xlu1 %v2260_v46, %s5263_s27  ;;  %v1857_v51 = vpop.permute.xlu0 %1856 }
 0x7c4   :  { %v2261_v57 = vmax.f32 %v6503_v54, 0.0 }
 0x7c5   :  { %v2211_v61 = vpop.f32.mrb[70].mxu1 }
 0x7c6   :  { %v6509_v62 = vadd.f32 %v2211_v61, %v1822_v59  ;;  %v2213_v0 = vpop.f32.mrb[71].mxu1  ;;  %2312 = vrot.lane.b32.xlu0 %v2261_v57, %s5263_s27 }
 0x7c8   :  { %v2262_v3 = vmax.f32 %v6509_v62, 0.0 }
 0x7c9   :  { %v2216_v8 = vpop.f32.mrb[72].mxu1 }
 0x7ca   :  { %v6515_v11 = vadd.f32 %v2216_v8, %v1827_v7  ;;  %v2218_v15 = vpop.f32.mrb[73].mxu1  ;;  %2314 = vrot.lane.b32.xlu1 %v2262_v3, %s5263_s27 }
 0x7cc   :  { %v2263_v17 = vmax.f32 %v6515_v11, 0.0 }
 0x7cd   :  { %v2221_v26 = vpop.f32.mrb[74].mxu1 }
 0x7ce   :  { %v6521_v30 = vadd.f32 %v2221_v26, %v1832_v20  ;;  %v2223_v36 = vpop.f32.mrb[75].mxu1  ;;  %2316 = vrot.lane.b32.xlu0 %v2263_v17, %s5263_s27 }
 0x7d0   :  { %v2264_v41 = vmax.f32 %v6521_v30, 0.0 }
 0x7d1   :  { %v2226_v49 = vpop.f32.mrb[76].mxu1 }
 0x7d2   :  { %v6527_v25 = vadd.f32 %v2226_v49, %v1837_v44  ;;  %v2228_v27 = vpop.f32.mrb[77].mxu1  ;;  %2318 = vrot.lane.b32.xlu1 %v2264_v41, %s5263_s27 }
 0x7d3   :  { %v2604_v27 = vld [vmem:[%s7197_s10 + $0x8] sm:$0xff] }
 0x7d4   :  { %v2265_v33 = vmax.f32 %v6527_v25, 0.0 }
 0x7d5   :  { %v2231_v40 = vpop.f32.mrb[78].mxu1 }
 0x7d6   :  { %v6533_v45 = vadd.f32 %v2231_v40, %v1842_v38  ;;  %v2233_v50 = vpop.f32.mrb[79].mxu1  ;;  %2320 = vrot.lane.b32.xlu0 %v2265_v33, %s5263_s27 }
 0x7d8   :  { %v2266_v53 = vmax.f32 %v6533_v45, 0.0 }
 0x7d9   :  { %v2236_v63 = vpop.f32.mrb[80].mxu1 }
 0x7da   :  { %v6539_v1 = vadd.f32 %v2236_v63, %v1847_v58  ;;  %v2238_v6 = vpop.f32.mrb[81].mxu1  ;;  %2322 = vrot.lane.b32.xlu1 %v2266_v53, %s5263_s27 }
 0x7dc   :  { %v2267_v12 = vmax.f32 %v6539_v1, 0.0 }
 0x7dd   :  { %v2241_v21 = vpop.f32.mrb[82].mxu1 }
 0x7de   :  { %v6545_v28 = vadd.f32 %v2241_v21, %v1852_v14  ;;  %v2243_v34 = vpop.f32.mrb[83].mxu1  ;;  %2324 = vrot.lane.b32.xlu0 %v2267_v12, %s5263_s27 }
 0x7e0   :  { %v2268_v42 = vmax.f32 %v6545_v28, 0.0 }
 0x7e1   :  { %v2246_v52 = vpop.f32.mrb[84].mxu1 }
 0x7e2   :  { %v6551_v56 = vadd.f32 %v2246_v52, %v1857_v51  ;;  %v2248_v59 = vpop.f32.mrb[85].mxu1  ;;  %2326 = vrot.lane.b32.xlu1 %v2268_v42, %s5263_s27 }
 0x7e4   :  { %v2269_v61 = vmax.f32 %v6551_v56, 0.0 }
 0x7e6   :  { %2328 = vrot.lane.b32.xlu0 %v2269_v61, %s5263_s27 }
 0x80c   :  { %v2291_v0 = vpop.permute.xlu1 %2290 }
 0x80d   :  { %v2350_v7 = vmax.f32 %v2250_v5, %v2291_v0 }
 0x80f   :  { %4439 = vmatprep.mubr.msk.f32.mxu0 %vm2373_vm12, %v2350_v7 }
 0x810   :  { %v2293_v8 = vpop.permute.xlu0 %2292 }
 0x811   :  { %v2351_v15 = vmax.f32 %v2251_v13, %v2293_v8 }
 0x813   :  { %4440 = vmatmul.mubr.msk.f32.vlgmr.msra.gmra.mrb[70].mxu0 %vm2373_vm12, %v2351_v15 }
 0x814   :  { %v2295_v20 = vpop.permute.xlu1 %2294 }
 0x815   :  { %v2352_v26 = vmax.f32 %v2252_v23, %v2295_v20 }
 0x817   :  { %4442 = vmatprep.mubr.msk.f32.mxu0 %vm2373_vm12, %v2352_v26 }
 0x818   :  { %v2297_v36 = vpop.permute.xlu0 %2296 }
 0x819   :  { %v2353_v44 = vmax.f32 %v2253_v37, %v2297_v36 }
 0x81b   :  { %4443 = vmatmul.mubr.msk.f32.gmra.mrb[72].mxu0 %vm2373_vm12, %v2353_v44 }
 0x81c   :  { %v2299_v2 = vpop.permute.xlu1 %2298 }
 0x81d   :  { %v2354_v5 = vmax.f32 %v2254_v22, %v2299_v2 }
 0x81f   :  { %4445 = vmatprep.mubr.msk.f32.mxu0 %vm2373_vm12, %v2354_v5 }
 0x820   :  { %v2301_v10 = vpop.permute.xlu0 %2300 }
 0x821   :  { %v2355_v13 = vmax.f32 %v2255_v35, %v2301_v10 }
 0x823   :  { %4446 = vmatmul.mubr.msk.f32.gmra.mrb[74].mxu0 %vm2373_vm12, %v2355_v13 }
 0x824   :  { %v2303_v18 = vpop.permute.xlu1 %2302 }
 0x825   :  { %v2356_v23 = vmax.f32 %v2256_v48, %v2303_v18 }
 0x827   :  { %4448 = vmatprep.mubr.msk.f32.mxu0 %vm2373_vm12, %v2356_v23 }
 0x828   :  { %v2305_v32 = vpop.permute.xlu0 %2304 }
 0x829   :  { %v2357_v37 = vmax.f32 %v2257_v60, %v2305_v32 }
 0x82b   :  { %4449 = vmatmul.mubr.msk.f32.gmra.mrb[76].mxu0 %vm2373_vm12, %v2357_v37 }
 0x82c   :  { %v2307_v47 = vpop.permute.xlu1 %2306 }
 0x82d   :  { %v2358_v22 = vmax.f32 %v2258_v9, %v2307_v47 }
 0x82f   :  { %4451 = vmatprep.mubr.msk.f32.mxu0 %vm2373_vm12, %v2358_v22 }
 0x830   :  { %v2309_v29 = vpop.permute.xlu0 %2308 }
 0x831   :  { %v2359_v35 = vmax.f32 %v2259_v24, %v2309_v29 }
 0x833   :  { %4452 = vmatmul.mubr.msk.f32.gmra.mrb[78].mxu0 %vm2373_vm12, %v2359_v35 }
 0x834   :  { %v2311_v43 = vpop.permute.xlu1 %2310 }
 0x835   :  { %v2360_v48 = vmax.f32 %v2260_v46, %v2311_v43 }
 0x837   :  { %4454 = vmatprep.mubr.msk.f32.mxu0 %vm2373_vm12, %v2360_v48 }
 0x838   :  { %v2313_v55 = vpop.permute.xlu0 %2312 }
 0x839   :  { %v2361_v60 = vmax.f32 %v2261_v57, %v2313_v55 }
 0x83b   :  { %4455 = vmatmul.mubr.msk.f32.gmra.mrb[80].mxu0 %vm2373_vm12, %v2361_v60 }
 0x83c   :  { %v2315_v4 = vpop.permute.xlu1 %2314 }
 0x83d   :  { %v2362_v9 = vmax.f32 %v2262_v3, %v2315_v4 }
 0x83f   :  { %4457 = vmatprep.mubr.msk.f32.mxu0 %vm2373_vm12, %v2362_v9 }
 0x840   :  { %v2317_v16 = vpop.permute.xlu0 %2316 }
 0x841   :  { %v2363_v24 = vmax.f32 %v2263_v17, %v2317_v16 }
 0x843   :  { %4458 = vmatmul.mubr.msk.f32.gmra.mrb[82].mxu0 %vm2373_vm12, %v2363_v24 }
 0x844   :  { %v2319_v39 = vpop.permute.xlu1 %2318 }
 0x845   :  { %v2364_v46 = vmax.f32 %v2264_v41, %v2319_v39 }
 0x847   :  { %4460 = vmatprep.mubr.msk.f32.mxu0 %vm2373_vm12, %v2364_v46 }
 0x848   :  { %v2321_v54 = vpop.permute.xlu0 %2320 }
 0x849   :  { %v2365_v57 = vmax.f32 %v2265_v33, %v2321_v54 }
 0x84b   :  { %4461 = vmatmul.mubr.msk.f32.gmra.mrb[84].mxu0 %vm2373_vm12, %v2365_v57 }
 0x84c   :  { %v2323_v62 = vpop.permute.xlu1 %2322 }
 0x84d   :  { %v2366_v3 = vmax.f32 %v2266_v53, %v2323_v62 }
 0x84f   :  { %4463 = vmatprep.mubr.msk.f32.mxu0 %vm2373_vm12, %v2366_v3 }
 0x850   :  { %v2325_v11 = vpop.permute.xlu0 %2324 }
 0x851   :  { %v2367_v17 = vmax.f32 %v2267_v12, %v2325_v11 }
 0x853   :  { %4464 = vmatmul.mubr.msk.f32.gmra.mrb[86].mxu0 %vm2373_vm12, %v2367_v17 }
 0x854   :  { %v2327_v30 = vpop.permute.xlu1 %2326 }
 0x855   :  { %v2368_v41 = vmax.f32 %v2268_v42, %v2327_v30 }
 0x857   :  { %4466 = vmatprep.mubr.msk.f32.mxu0 %vm2373_vm12, %v2368_v41 }
 0x858   :  { %v2329_v49 = vpop.permute.xlu0 %2328 }
 0x859   :  { %v2369_v25 = vmax.f32 %v2269_v61, %v2329_v49 }
 0x85b   :  { %4467 = vmatmul.mubr.msk.f32.gmra.mrb[88].mxu0 %vm2373_vm12, %v2369_v25 }
 0x85c   :  { %4078 = vmatprep.mubr.msk.f32.mxu0 %vm2722_vm13, %v2604_v27 }
 0x8e6   :  { %v4441_v33 = vpop.f32.mrb[70].mxu0 }
 0x8e7   :  { %v2644_v38 = vrot.slane %v4441_v33, 1  ;;  %v2504_v40 = vpop.f32.mrb[71].mxu0 }
 0x8e8   :  { %v2643_v45 = vrot.slane %v2504_v40, 1 }
 0x8ea   :  { %v2645_v50 = vsel %vm1254_vm9, %v2643_v45, %v2644_v38 }
 0x8eb   :  { %v2702_v53 = vmax.f32 %v2504_v40, %v2645_v50 }
 0x8ee   :  { %v4444_v58 = vpop.f32.mrb[72].mxu0 }
 0x8ef   :  { %v2648_v63 = vrot.slane %v4444_v58, 1  ;;  %v2514_v1 = vpop.f32.mrb[73].mxu0 }
 0x8f0   :  { %v2646_v6 = vrot.slane %v2514_v1, 1 }
 0x8f2   :  { %v2647_v12 = vsel %vm1254_vm9, %v2644_v38, %v2646_v6  ;;  %v2649_v14 = vsel %vm1254_vm9, %v2646_v6, %v2648_v63 }
 0x8f3   :  { %v2703_v21 = vmax.f32 %v4441_v33, %v2647_v12  ;;  %v2704_v28 = vmax.f32 %v2514_v1, %v2649_v14 }
 0x8f5   :  { %v4758_v34 = vpack.c.bf16 %v2703_v21, %v2702_v53 }
 0x8f6   :  { %v4447_v42 = vpop.f32.mrb[74].mxu0 }
 0x8f7   :  { %v2652_v51 = vrot.slane %v4447_v42, 1  ;;  %v2524_v52 = vpop.f32.mrb[75].mxu0  ;;  %4759 = vmatpush1.bf16.msra.mxu0 %v4758_v34 }
 0x8f8   :  { %v2650_v56 = vrot.slane %v2524_v52, 1  ;;  %4760 = vmatprep.subr.bf16.mxu0 %v5261_v31 }
 0x8fa   :  { %v2651_v59 = vsel %vm1254_vm9, %v2648_v63, %v2650_v56  ;;  %v2653_v61 = vsel %vm1254_vm9, %v2650_v56, %v2652_v51 }
 0x8fb   :  { %v2705_v0 = vmax.f32 %v4444_v58, %v2651_v59  ;;  %v2706_v7 = vmax.f32 %v2524_v52, %v2653_v61 }
 0x8fd   :  { %v4761_v8 = vpack.c.bf16 %v2705_v0, %v2704_v28 }
 0x8fe   :  { %v4450_v15 = vpop.f32.mrb[76].mxu0 }
 0x8ff   :  { %v2656_v20 = vrot.slane %v4450_v15, 1  ;;  %v2534_v26 = vpop.f32.mrb[77].mxu0  ;;  %4762 = vmatpush1.bf16.msra.mxu0 %v4761_v8 }
 0x900   :  { %v2654_v36 = vrot.slane %v2534_v26, 1  ;;  %4763 = vmatprep.subr.bf16.mxu0 %v5261_v31 }
 0x902   :  { %v2655_v44 = vsel %vm1254_vm9, %v2652_v51, %v2654_v36  ;;  %v2657_v2 = vsel %vm1254_vm9, %v2654_v36, %v2656_v20  ;;  %v2603_v36 = vld [vmem:[%s7197_s10] sm:$0xff] }
 0x903   :  { %v2707_v5 = vmax.f32 %v4447_v42, %v2655_v44  ;;  %v2708_v10 = vmax.f32 %v2534_v26, %v2657_v2  ;;  %v2606_v44 = vld [vmem:[%s7197_s10 + $0x18] sm:$0xff]  ;;  %v2605_v2 = vld [vmem:[%s7197_s10 + $0x10] sm:$0xff] }
 0x905   :  { %v4764_v13 = vpack.c.bf16 %v2707_v5, %v2706_v7  ;;  %v2608_v5 = vld [vmem:[%s7197_s10 + $0x28] sm:$0xff] }
 0x906   :  { %v4453_v18 = vpop.f32.mrb[78].mxu0 }
 0x907   :  { %v2660_v23 = vrot.slane %v4453_v18, 1  ;;  %v2544_v32 = vpop.f32.mrb[79].mxu0  ;;  %4765 = vmatpush1.bf16.msra.mxu0 %v4764_v13  ;;  %v2610_v13 = vld [vmem:[%s7197_s10 + $0x38] sm:$0xff] }
 0x908   :  { %v2658_v37 = vrot.slane %v2544_v32, 1  ;;  %4766 = vmatprep.subr.bf16.mxu0 %v5261_v31 }
 0x90a   :  { %v2659_v47 = vsel %vm1254_vm9, %v2656_v20, %v2658_v37  ;;  %v2661_v22 = vsel %vm1254_vm9, %v2658_v37, %v2660_v23  ;;  %v2614_v37 = vld [vmem:[%s7197_s10 + $0x58] sm:$0xff] }
 0x90b   :  { %v2709_v29 = vmax.f32 %v4450_v15, %v2659_v47  ;;  %v2710_v35 = vmax.f32 %v2544_v32, %v2661_v22  ;;  %v2611_v32 = vld [vmem:[%s7197_s10 + $0x40] sm:$0xff]  ;;  %v2613_v47 = vld [vmem:[%s7197_s10 + $0x50] sm:$0xff]  ;;  %v2616_v22 = vld [vmem:[%s7197_s10 + $0x68] sm:$0xff] }
 0x90d   :  { %v4767_v43 = vpack.c.bf16 %v2709_v29, %v2708_v10  ;;  %v2607_v10 = vld [vmem:[%s7197_s10 + $0x20] sm:$0xff] }
 0x90e   :  { %v4456_v48 = vpop.f32.mrb[80].mxu0  ;;  %v2615_v29 = vld [vmem:[%s7197_s10 + $0x60] sm:$0xff] }
 0x90f   :  { %v2664_v55 = vrot.slane %v4456_v48, 1  ;;  %v2554_v60 = vpop.f32.mrb[81].mxu0  ;;  %4768 = vmatpush1.bf16.msra.mxu0 %v4767_v43  ;;  %v2617_v43 = vld [vmem:[%s7197_s10 + $0x70] sm:$0xff] }
 0x910   :  { %v2662_v4 = vrot.slane %v2554_v60, 1  ;;  %4769 = vmatprep.subr.bf16.mxu0 %v5261_v31 }
 0x912   :  { %v2663_v9 = vsel %vm1254_vm9, %v2660_v23, %v2662_v4  ;;  %v2665_v16 = vsel %vm1254_vm9, %v2662_v4, %v2664_v55  ;;  %v2612_v23 = vld [vmem:[%s7197_s10 + $0x48] sm:$0xff]  ;;  %v2621_v4 = vld [vmem:[%s7197_s10 + $0x90] sm:$0xff] }
 0x913   :  { %v2711_v24 = vmax.f32 %v4453_v18, %v2663_v9  ;;  %v2712_v39 = vmax.f32 %v2554_v60, %v2665_v16  ;;  %v2609_v18 = vld [vmem:[%s7197_s10 + $0x30] sm:$0xff]  ;;  %v2622_v60 = vld [vmem:[%s7197_s10 + $0x98] sm:$0xff] }
 0x915   :  { %v4770_v46 = vpack.c.bf16 %v2711_v24, %v2710_v35  ;;  %v2618_v35 = vld [vmem:[%s7197_s10 + $0x78] sm:$0xff] }
 0x916   :  { %v4459_v54 = vpop.f32.mrb[82].mxu0 }
 0x917   :  { %v2668_v57 = vrot.slane %v4459_v54, 1  ;;  %v2564_v62 = vpop.f32.mrb[83].mxu0  ;;  %4771 = vmatpush1.bf16.msra.mxu0 %v4770_v46 }
 0x918   :  { %v2666_v3 = vrot.slane %v2564_v62, 1  ;;  %4772 = vmatprep.subr.bf16.mxu0 %v5261_v31 }
 0x91a   :  { %v2667_v11 = vsel %vm1254_vm9, %v2664_v55, %v2666_v3  ;;  %v2669_v17 = vsel %vm1254_vm9, %v2666_v3, %v2668_v57  ;;  %v2619_v55 = vld [vmem:[%s7197_s10 + $0x80] sm:$0xff] }
 0x91b   :  { %v2713_v30 = vmax.f32 %v4456_v48, %v2667_v11  ;;  %v2714_v41 = vmax.f32 %v2564_v62, %v2669_v17  ;;  %v2620_v48 = vld [vmem:[%s7197_s10 + $0x88] sm:$0xff] }
 0x91d   :  { %v4773_v49 = vpack.c.bf16 %v2713_v30, %v2712_v39 }
 0x91e   :  { %v4462_v25 = vpop.f32.mrb[84].mxu0 }
 0x91f   :  { %v2672_v27 = vrot.slane %v4462_v25, 1  ;;  %v2574_v33 = vpop.f32.mrb[85].mxu0  ;;  %4774 = vmatpush1.bf16.msra.mxu0 %v4773_v49 }
 0x920   :  { %v2670_v38 = vrot.slane %v2574_v33, 1  ;;  %4775 = vmatprep.subr.bf16.mxu0 %v5261_v31 }
 0x922   :  { %v2671_v40 = vsel %vm1254_vm9, %v2668_v57, %v2670_v38  ;;  %v2673_v45 = vsel %vm1254_vm9, %v2670_v38, %v2672_v27 }
 0x923   :  { %v2715_v50 = vmax.f32 %v4459_v54, %v2671_v40  ;;  %v2716_v53 = vmax.f32 %v2574_v33, %v2673_v45 }
 0x925   :  { %v4776_v58 = vpack.c.bf16 %v2715_v50, %v2714_v41 }
 0x926   :  { %v4465_v63 = vpop.f32.mrb[86].mxu0 }
 0x927   :  { %v2676_v1 = vrot.slane %v4465_v63, 1  ;;  %v2584_v6 = vpop.f32.mrb[87].mxu0  ;;  %4777 = vmatpush1.bf16.msra.mxu0 %v4776_v58 }
 0x928   :  { %v2674_v12 = vrot.slane %v2584_v6, 1  ;;  %4778 = vmatprep.subr.bf16.mxu0 %v5261_v31 }
 0x92a   :  { %v2675_v14 = vsel %vm1254_vm9, %v2672_v27, %v2674_v12  ;;  %v2677_v21 = vsel %vm1254_vm9, %v2674_v12, %v2676_v1 }
 0x92b   :  { %v2717_v28 = vmax.f32 %v4462_v25, %v2675_v14  ;;  %v2718_v34 = vmax.f32 %v2584_v6, %v2677_v21 }
 0x92d   :  { %v4779_v42 = vpack.c.bf16 %v2717_v28, %v2716_v53 }
 0x92e   :  { %v4468_v51 = vpop.f32.mrb[88].mxu0 }
 0x92f   :  { %v2680_v52 = vrot.slane %v4468_v51, 1  ;;  %v2594_v56 = vpop.f32.mrb[89].mxu0  ;;  %4780 = vmatpush1.bf16.msra.mxu0 %v4779_v42  ;;  %v3062_v42 = vld [vmem:[%s7199_s12 + $0x8] sm:$0xff] }
 0x930   :  { %v2678_v59 = vrot.slane %v2594_v56, 1  ;;  %4781 = vmatprep.subr.bf16.mxu0 %v5261_v31 }
 0x931   :  { %v2721_v7 = vmax.f32 %v4468_v51, %v2680_v52  ;;  %v3004_v51 = vld [vmem:[%s7198_s11 + $0x18] sm:$0xff] }
 0x932   :  { %v2679_v61 = vsel %vm1254_vm9, %v2676_v1, %v2678_v59  ;;  %v2681_v0 = vsel %vm1254_vm9, %v2678_v59, %v2680_v52  ;;  %v3064_v52 = vld [vmem:[%s7199_s12 + $0x18] sm:$0xff]  ;;  %4088 = vmatprep.mubr.msk.f32.mxu1 %vm3151_vm15, %v3004_v51  ;;  %v3061_v59 = vld [vmem:[%s7199_s12] sm:$0xff] }
 0x933   :  { %v2719_v8 = vmax.f32 %v4465_v63, %v2679_v61  ;;  %v2720_v15 = vmax.f32 %v2594_v56, %v2681_v0  ;;  %v3066_v56 = vld [vmem:[%s7199_s12 + $0x28] sm:$0xff]  ;;  %v3068_v61 = vld [vmem:[%s7199_s12 + $0x38] sm:$0xff]  ;;  %v3063_v0 = vld [vmem:[%s7199_s12 + $0x10] sm:$0xff] }
 0x935   :  { %v4785_v20 = vpack.c.bf16 %v2721_v7, %v2720_v15  ;;  %v4782_v26 = vpack.c.bf16 %v2719_v8, %v2718_v34  ;;  %v3002_v34 = vld [vmem:[%s7198_s11 + $0x8] sm:$0xff]  ;;  %v3065_v8 = vld [vmem:[%s7199_s12 + $0x20] sm:$0xff]  ;;  %v3072_v15 = vld [vmem:[%s7199_s12 + $0x58] sm:$0xff] }
 0x936   :  { %v3070_v7 = vld [vmem:[%s7199_s12 + $0x48] sm:$0xff] }
 0x937   :  { %4783 = vmatpush1.bf16.msra.mxu0 %v4782_v26  ;;  %v3074_v26 = vld [vmem:[%s7199_s12 + $0x68] sm:$0xff] }
 0x938   :  { %4784 = vmatprep.subr.bf16.mxu0 %v5261_v31 }
 0x93b   :  { %4787 = vmatpush1.bf16.msk.msra.mxu0 %vm4786_vm14, %v4785_v20  ;;  %v3067_v20 = vld [vmem:[%s7199_s12 + $0x30] sm:$0xff] }
 0x93e   :  { %2821 = vmatmul.mubr.f32.vlgmr.msra.gmra.mrb[90].mxu0 %v2603_v36  ;;  %v3069_v36 = vld [vmem:[%s7199_s12 + $0x40] sm:$0xff] }
 0x93f   :  { %4079 = vmatprep.mubr.msk.f32.mxu0 %vm2722_vm13, %v2606_v44  ;;  %v3503_v44 = vld [vmem:[%s7201_s14] sm:$0xff] }
 0x942   :  { %2826 = vmatmul.mubr.f32.gmra.mrb[92].mxu0 %v2605_v2  ;;  %v3071_v2 = vld [vmem:[%s7199_s12 + $0x50] sm:$0xff] }
 0x943   :  { %4080 = vmatprep.mubr.msk.f32.mxu0 %vm2722_vm13, %v2608_v5  ;;  %v3505_v5 = vld [vmem:[%s7201_s14 + $0x10] sm:$0xff] }
 0x946   :  { %2831 = vmatmul.mubr.f32.gmra.mrb[94].mxu0 %v2607_v10  ;;  %v3073_v10 = vld [vmem:[%s7199_s12 + $0x60] sm:$0xff] }
 0x947   :  { %4081 = vmatprep.mubr.msk.f32.mxu0 %vm2722_vm13, %v2610_v13  ;;  %v3507_v13 = vld [vmem:[%s7201_s14 + $0x20] sm:$0xff] }
 0x94a   :  { %2836 = vmatmul.mubr.f32.gmra.mrb[96].mxu0 %v2609_v18  ;;  %v3075_v18 = vld [vmem:[%s7199_s12 + $0x70] sm:$0xff] }
 0x94b   :  { %4082 = vmatprep.mubr.msk.f32.mxu0 %vm2722_vm13, %v2612_v23  ;;  %v3509_v23 = vld [vmem:[%s7201_s14 + $0x30] sm:$0xff] }
 0x94e   :  { %2841 = vmatmul.mubr.f32.gmra.mrb[98].mxu0 %v2611_v32  ;;  %v3504_v32 = vld [vmem:[%s7201_s14 + $0x8] sm:$0xff] }
 0x94f   :  { %4083 = vmatprep.mubr.msk.f32.mxu0 %vm2722_vm13, %v2614_v37  ;;  %v3511_v37 = vld [vmem:[%s7201_s14 + $0x40] sm:$0xff] }
 0x952   :  { %2846 = vmatmul.mubr.f32.gmra.mrb[100].mxu0 %v2613_v47  ;;  %v3506_v47 = vld [vmem:[%s7201_s14 + $0x18] sm:$0xff] }
 0x953   :  { %4084 = vmatprep.mubr.msk.f32.mxu0 %vm2722_vm13, %v2616_v22  ;;  %v3513_v22 = vld [vmem:[%s7201_s14 + $0x50] sm:$0xf] }
 0x956   :  { %2851 = vmatmul.mubr.f32.gmra.mrb[102].mxu0 %v2615_v29  ;;  %v3508_v29 = vld [vmem:[%s7201_s14 + $0x28] sm:$0xff] }
 0x957   :  { %4085 = vmatprep.mubr.msk.f32.mxu0 %vm2722_vm13, %v2618_v35  ;;  %v3737_v35 = vld [vmem:[%s7203_s16 + $0x8] sm:$0x3] }
 0x95a   :  { %2856 = vmatmul.mubr.f32.gmra.mrb[104].mxu0 %v2617_v43  ;;  %v3510_v43 = vld [vmem:[%s7201_s14 + $0x38] sm:$0xff] }
 0x95b   :  { %4086 = vmatprep.mubr.msk.f32.mxu0 %vm2722_vm13, %v2620_v48  ;;  %v3512_v48 = vld [vmem:[%s7201_s14 + $0x48] sm:$0xff] }
 0x95e   :  { %2861 = vmatmul.mubr.f32.gmra.mrb[106].mxu0 %v2619_v55  ;;  %v3736_v55 = vld [vmem:[%s7203_s16] sm:$0xff] }
 0x95f   :  { %4087 = vmatprep.mubr.msk.f32.mxu0 %vm2722_vm13, %v2622_v60 }
 0x962   :  { %2866 = vmatmul.mubr.f32.gmra.mrb[108].mxu0 %v2621_v4 }
 0x963   :  { %3261 = vmatprep.mubr.f32.mxu0 %v3002_v34 }
 0xa11   :  { %v6716_v9 = vpop.f32.mrb[90].mxu0 }
 0xa12   :  { %v2824_v16 = vpop.f32.mrb[91].mxu0 }
 0xa15   :  { %v6718_v24 = vpop.f32.mrb[92].mxu0 }
 0xa16   :  { %v2829_v39 = vpop.f32.mrb[93].mxu0  ;;  %v5128_v46 = vpack.i.bf16 %v6718_v24, %v6716_v9  ;;  %v4790_v54 = vpack.c.bf16 %v6718_v24, %v6716_v9 }
 0xa18   :  { %5129 = vrot.lane.b32.xlu1 %v5128_v46, %s5262_s26 }
 0xa19   :  { %v6725_v57 = vpop.f32.mrb[94].mxu0 }
 0xa1a   :  { %v2834_v62 = vpop.f32.mrb[95].mxu0 }
 0xa1d   :  { %v6727_v3 = vpop.f32.mrb[96].mxu0 }
 0xa1e   :  { %v2839_v11 = vpop.f32.mrb[97].mxu0  ;;  %v5133_v17 = vpack.i.bf16 %v6727_v3, %v6725_v57  ;;  %v4794_v30 = vpack.c.bf16 %v6727_v3, %v6725_v57 }
 0xa20   :  { %5134 = vrot.lane.b32.xlu0 %v5133_v17, %s5264_s28 }
 0xa21   :  { %v6734_v41 = vpop.f32.mrb[98].mxu0 }
 0xa22   :  { %v2844_v49 = vpop.f32.mrb[99].mxu0 }
 0xa25   :  { %v6736_v25 = vpop.f32.mrb[100].mxu0 }
 0xa26   :  { %v2849_v27 = vpop.f32.mrb[101].mxu0  ;;  %v5138_v33 = vpack.i.bf16 %v6736_v25, %v6734_v41  ;;  %v4798_v38 = vpack.c.bf16 %v6736_v25, %v6734_v41 }
 0xa28   :  { %5139 = vrot.lane.b32.xlu0 %v5138_v33, %s5264_s28 }
 0xa29   :  { %v6743_v40 = vpop.f32.mrb[102].mxu0 }
 0xa2a   :  { %v2854_v45 = vpop.f32.mrb[103].mxu0 }
 0xa2d   :  { %v6745_v50 = vpop.f32.mrb[104].mxu0 }
 0xa2e   :  { %v2859_v53 = vpop.f32.mrb[105].mxu0  ;;  %v5148_v58 = vpack.i.bf16 %v6745_v50, %v6743_v40  ;;  %v4802_v63 = vpack.c.bf16 %v6745_v50, %v6743_v40 }
 0xa30   :  { %5149 = vrot.lane.b32.xlu0 %v5148_v58, %s5264_s28  ;;  %5144 = vrot.lane.b32.xlu1 %v5148_v58, %s5263_s27 }
 0xa31   :  { %v6753_v1 = vpop.f32.mrb[106].mxu0 }
 0xa32   :  { %v2864_v6 = vpop.f32.mrb[107].mxu0 }
 0xa34   :  { %5169 = vrot.lane.b32.xlu0 %v5128_v46, %s5265_s30 }
 0xa35   :  { %v6756_v12 = vpop.f32.mrb[108].mxu0 }
 0xa36   :  { %v2869_v14 = vpop.f32.mrb[109].mxu0  ;;  %v5178_v21 = vpack.i.bf16 %v6756_v12, %v6753_v1  ;;  %v4806_v28 = vpack.c.bf16 %v6756_v12, %v6753_v1 }
 0xa38   :  { %5179 = vrot.lane.b32.xlu0 %v5178_v21, %s5264_s28  ;;  %5154 = vrot.lane.b32.xlu1 %v5178_v21, %s5263_s27 }
 0xa3c   :  { %5184 = vrot.lane.b32.xlu0 %v5128_v46, %s5263_s27  ;;  %5159 = vrot.lane.b32.xlu1 %v5133_v17, %s5262_s26 }
 0xa40   :  { %5199 = vrot.lane.b32.xlu0 %v5178_v21, %s5262_s26  ;;  %5164 = vrot.lane.b32.xlu1 %v5138_v33, %s5262_s26 }
 0xa44   :  { %5204 = vrot.lane.b32.xlu0 %v5138_v33, %s5265_s30  ;;  %5174 = vrot.lane.b32.xlu1 %v5148_v58, %s5262_s26 }
 0xa48   :  { %5214 = vrot.lane.b32.xlu0 %v5138_v33, %s5263_s27  ;;  %5189 = vrot.lane.b32.xlu1 %v5133_v17, %s5265_s30 }
 0xa4c   :  { %5224 = vrot.lane.b32.xlu0 %v5178_v21, %s5265_s30  ;;  %5194 = vrot.lane.b32.xlu1 %v5133_v17, %s5263_s27 }
 0xa50   :  { %3083 = vperm.xlu0 %5006, %v3062_v42   ;;  %5209 = vrot.lane.b32.xlu1 %v5128_v46, %s5264_s28 }
 0xa54   :  { %3093 = vperm.xlu0 %5006, %v3064_v52   ;;  %5219 = vrot.lane.b32.xlu1 %v5148_v58, %s5265_s30 }
 0xa58   :  { %3103 = vperm.xlu0 %5006, %v3066_v56   ;;  %3078 = vperm.xlu1 %5007, %v3061_v59  }
 0xa5c   :  { %3113 = vperm.xlu0 %5006, %v3068_v61   ;;  %3088 = vperm.xlu1 %5007, %v3063_v0  }
 0xa60   :  { %3123 = vperm.xlu0 %5006, %v3070_v7   ;;  %3098 = vperm.xlu1 %5007, %v3065_v8  }
 0xa64   :  { %3133 = vperm.xlu0 %5006, %v3072_v15   ;;  %3108 = vperm.xlu1 %5007, %v3067_v20  }
 0xa68   :  { %3143 = vperm.xlu0 %5006, %v3074_v26   ;;  %3118 = vperm.xlu1 %5007, %v3069_v36  }
 0xa6c   :  { %3516 = vperm.xlu0 %5006, %v3503_v44   ;;  %3128 = vperm.xlu1 %5007, %v3071_v2  }
 0xa70   :  { %3526 = vperm.xlu0 %5006, %v3505_v5   ;;  %3138 = vperm.xlu1 %5007, %v3073_v10  }
 0xa74   :  { %3536 = vperm.xlu0 %5006, %v3507_v13   ;;  %3148 = vperm.xlu1 %5007, %v3075_v18  }
 0xa78   :  { %3546 = vperm.xlu0 %5006, %v3509_v23   ;;  %3521 = vperm.xlu1 %5007, %v3504_v32  }
 0xa7c   :  { %3556 = vperm.xlu0 %5006, %v3511_v37   ;;  %3531 = vperm.xlu1 %5007, %v3506_v47  }
 0xa80   :  { %3566 = vperm.xlu0 %5006, %v3513_v22   ;;  %3541 = vperm.xlu1 %5007, %v3508_v29  }
 0xa84   :  { %3745 = vperm.xlu0 %5006, %v3737_v35   ;;  %3551 = vperm.xlu1 %5007, %v3510_v43  }
 0xa88   :  { %3561 = vperm.xlu1 %5007, %v3512_v48  }
 0xa8a   :  { %v5130_v49 = vpop.permute.xlu1 %5129 }
 0xa8b   :  { %v5132_v42 = vunpack.i.h.bf16 %v5130_v49  ;;  %v5131_v51 = vunpack.i.l.bf16 %v5130_v49 }
 0xa8c   :  { %3740 = vperm.xlu1 %5007, %v3736_v55  }
 0xa8d   :  { %v4796_v2 = vpack.c.bf16 %v5132_v42, %v5131_v51  ;;  %v3006_v42 = vld [vmem:[%s7198_s11 + $0x28] sm:$0xff]  ;;  %v3005_v51 = vld [vmem:[%s7198_s11 + $0x20] sm:$0xff] }
 0xa92   :  { %v5135_v60 = vpop.permute.xlu0 %5134 }
 0xa93   :  { %v5137_v4 = vunpack.i.h.bf16 %v5135_v60  ;;  %v5136_v16 = vunpack.i.l.bf16 %v5135_v60 }
 0xa95   :  { %v4821_v39 = vpack.c.bf16 %v5137_v4, %v5136_v16 }
 0xa97   :  { %4822 = vmatpush1.bf16.msra.mxu1 %v4821_v39 }
 0xa98   :  { %4823 = vmatprep.subr.bf16.mxu1 %v5261_v31 }
 0xa9a   :  { %v5140_v46 = vpop.permute.xlu0 %5139 }
 0xa9b   :  { %v5142_v62 = vunpack.i.h.bf16 %v5140_v46  ;;  %v5141_v11 = vunpack.i.l.bf16 %v5140_v46 }
 0xa9d   :  { %v4824_v17 = vpack.c.bf16 %v5142_v62, %v5141_v11 }
 0xa9f   :  { %4825 = vmatpush1.bf16.msra.mxu1 %v4824_v17 }
 0xaa0   :  { %4826 = vmatprep.subr.bf16.mxu1 %v5261_v31 }
 0xaa2   :  { %v5150_v27 = vpop.permute.xlu0 %5149  ;;  %v5145_v33 = vpop.permute.xlu1 %5144 }
 0xaa3   :  { %v5152_v45 = vunpack.i.h.bf16 %v5150_v27  ;;  %v5151_v53 = vunpack.i.l.bf16 %v5150_v27  ;;  %v5147_v58 = vunpack.i.h.bf16 %v5145_v33  ;;  %v5146_v6 = vunpack.i.l.bf16 %v5145_v33 }
 0xaa5   :  { %v4827_v14 = vpack.c.bf16 %v5152_v45, %v5151_v53  ;;  %v4788_v21 = vpack.c.bf16 %v5147_v58, %v5146_v6  ;;  %v3001_v6 = vld [vmem:[%s7198_s11] sm:$0xff] }
 0xaa6   :  { %v5170_v34 = vpop.permute.xlu0 %5169 }
 0xaa7   :  { %4789 = vmatprep.subr.bf16.mxu0 %v4788_v21  ;;  %4828 = vmatpush1.bf16.msra.mxu1 %v4827_v14  ;;  %v5172_v8 = vunpack.i.h.bf16 %v5170_v34  ;;  %v5171_v15 = vunpack.i.l.bf16 %v5170_v34 }
 0xaa8   :  { %4791 = vmatpush3.bf16.msra.mxu0 %v4790_v54  ;;  %4829 = vmatprep.subr.bf16.mxu1 %v5261_v31 }
 0xaa9   :  { %v4833_v24 = vpack.c.bf16 %v5172_v8, %v5171_v15  ;;  %v3007_v8 = vld [vmem:[%s7198_s11 + $0x30] sm:$0xff]  ;;  %v3013_v15 = vld [vmem:[%s7198_s11 + $0x60] sm:$0xff] }
 0xaaa   :  { %v5180_v52 = vpop.permute.xlu0 %5179  ;;  %v5155_v56 = vpop.permute.xlu1 %5154 }
 0xaab   :  { %v5182_v59 = vunpack.i.h.bf16 %v5180_v52  ;;  %v5181_v61 = vunpack.i.l.bf16 %v5180_v52  ;;  %v5157_v0 = vunpack.i.h.bf16 %v5155_v56  ;;  %v5156_v7 = vunpack.i.l.bf16 %v5155_v56  ;;  %v3010_v56 = vld [vmem:[%s7198_s11 + $0x48] sm:$0xff] }
 0xaad   :  { %v4830_v20 = vpack.c.bf16 %v5182_v59, %v5181_v61  ;;  %v4792_v26 = vpack.c.bf16 %v5157_v0, %v5156_v7  ;;  %v3003_v59 = vld [vmem:[%s7198_s11 + $0x10] sm:$0xff]  ;;  %v3009_v61 = vld [vmem:[%s7198_s11 + $0x40] sm:$0xff]  ;;  %v3008_v0 = vld [vmem:[%s7198_s11 + $0x38] sm:$0xff] }
 0xaae   :  { %v5185_v36 = vpop.permute.xlu0 %5184  ;;  %v5160_v44 = vpop.permute.xlu1 %5159  ;;  %v3014_v7 = vld [vmem:[%s7198_s11 + $0x68] sm:$0xff] }
 0xaaf   :  { %v5162_v5 = vunpack.i.h.bf16 %v5160_v44  ;;  %v5161_v9 = vunpack.i.l.bf16 %v5160_v44  ;;  %4793 = vmatprep.subr.bf16.mxu0 %v4792_v26  ;;  %4831 = vmatpush1.bf16.msra.mxu1 %v4830_v20  ;;  %v5187_v47 = vunpack.i.h.bf16 %v5185_v36  ;;  %v5186_v22 = vunpack.i.l.bf16 %v5185_v36  ;;  %v3012_v20 = vld [vmem:[%s7198_s11 + $0x58] sm:$0xff]  ;;  %v3018_v26 = vld [vmem:[%s7198_s11 + $0x88] sm:$0xff]  ;;  %v3011_v36 = vld [vmem:[%s7198_s11 + $0x50] sm:$0xff] }
 0xab0   :  { %4795 = vmatpush3.bf16.msra.mxu0 %v4794_v30  ;;  %4832 = vmatprep.subr.bf16.mxu1 %v5261_v31  ;;  %v3017_v44 = vld [vmem:[%s7198_s11 + $0x80] sm:$0xff] }
 0xab1   :  { %4797 = vmatprep.subr.bf16.mxu0 %v4796_v2  ;;  %v4800_v10 = vpack.c.bf16 %v5162_v5, %v5161_v9  ;;  %v4810_v40 = vpack.c.bf16 %v5187_v47, %v5186_v22  ;;  %v3016_v2 = vld [vmem:[%s7198_s11 + $0x78] sm:$0xff]  ;;  %v3022_v5 = vld [vmem:[%s7198_s11 + $0xa8] sm:$0xff]  ;;  %v3015_v9 = vld [vmem:[%s7198_s11 + $0x70] sm:$0xff] }
 0xab2   :  { %v5165_v54 = vpop.permute.xlu1 %5164  ;;  %v5200_v13 = vpop.permute.xlu0 %5199  ;;  %v3027_v47 = vld [vmem:[%s7198_s11 + $0xd0] sm:$0xff]  ;;  %v3033_v22 = vld [vmem:[%s7198_s11 + $0x100] sm:$0xff] }
 0xab3   :  { %v5167_v18 = vunpack.i.h.bf16 %v5165_v54  ;;  %v5166_v23 = vunpack.i.l.bf16 %v5165_v54  ;;  %4834 = vmatpush1.bf16.msra.mxu1 %v4833_v24  ;;  %v5202_v29 = vunpack.i.h.bf16 %v5200_v13  ;;  %v5201_v43 = vunpack.i.l.bf16 %v5200_v13  ;;  %v3021_v24 = vld [vmem:[%s7198_s11 + $0xa0] sm:$0xff]  ;;  %v3020_v54 = vld [vmem:[%s7198_s11 + $0x98] sm:$0xff]  ;;  %v3019_v13 = vld [vmem:[%s7198_s11 + $0x90] sm:$0xff] }
 0xab4   :  { %4799 = vmatpush3.bf16.msra.mxu0 %v4798_v38  ;;  %4835 = vmatprep.subr.bf16.mxu1 %v5261_v31 }
 0xab5   :  { %4801 = vmatprep.subr.bf16.mxu0 %v4800_v10  ;;  %v4804_v57 = vpack.c.bf16 %v5167_v18, %v5166_v23  ;;  %v3026_v10 = vld [vmem:[%s7198_s11 + $0xc8] sm:$0xff]  ;;  %v3025_v18 = vld [vmem:[%s7198_s11 + $0xc0] sm:$0xff]  ;;  %v3024_v23 = vld [vmem:[%s7198_s11 + $0xb8] sm:$0xff] }
 0xab6   :  { %v5175_v32 = vpop.permute.xlu1 %5174  ;;  %v5205_v37 = vpop.permute.xlu0 %5204 }
 0xab7   :  { %v5177_v3 = vunpack.i.h.bf16 %v5175_v32  ;;  %v5176_v30 = vunpack.i.l.bf16 %v5175_v32  ;;  %v5207_v48 = vunpack.i.h.bf16 %v5205_v37  ;;  %v5206_v55 = vunpack.i.l.bf16 %v5205_v37  ;;  %v3030_v32 = vld [vmem:[%s7198_s11 + $0xe8] sm:$0xff] }
 0xab8   :  { %4803 = vmatpush3.bf16.msra.mxu0 %v4802_v63  ;;  %v4812_v63 = vpack.c.bf16 %v5202_v29, %v5201_v43  ;;  %v3034_v37 = vld [vmem:[%s7198_s11 + $0x108] sm:$0xff]  ;;  %v3032_v29 = vld [vmem:[%s7198_s11 + $0xf8] sm:$0xff]  ;;  %v3031_v43 = vld [vmem:[%s7198_s11 + $0xf0] sm:$0xff] }
 0xab9   :  { %4805 = vmatprep.subr.bf16.mxu0 %v4804_v57  ;;  %v4808_v41 = vpack.c.bf16 %v5177_v3, %v5176_v30  ;;  %v4839_v46 = vpack.c.bf16 %v5207_v48, %v5206_v55  ;;  %v3023_v57 = vld [vmem:[%s7198_s11 + $0xb0] sm:$0xff]  ;;  %v3029_v3 = vld [vmem:[%s7198_s11 + $0xe0] sm:$0xff]  ;;  %v3028_v30 = vld [vmem:[%s7198_s11 + $0xd8] sm:$0xff] }
 0xaba   :  { %v5190_v35 = vpop.permute.xlu1 %5189  ;;  %v5215_v4 = vpop.permute.xlu0 %5214  ;;  %v3035_v48 = vld [vmem:[%s7198_s11 + $0x110] sm:$0xff]  ;;  %v3041_v55 = vld [vmem:[%s7198_s11 + $0x140] sm:$0xff] }
 0xabb   :  { %v5192_v25 = vunpack.i.h.bf16 %v5190_v35  ;;  %v5191_v38 = vunpack.i.l.bf16 %v5190_v35  ;;  %v5217_v11 = vunpack.i.h.bf16 %v5215_v4  ;;  %v5216_v1 = vunpack.i.l.bf16 %v5215_v4  ;;  %v3038_v35 = vld [vmem:[%s7198_s11 + $0x128] sm:$0xff]  ;;  %v3044_v4 = vld [vmem:[%s7198_s11 + $0x158] sm:$0xff] }
 0xabc   :  { %4807 = vmatpush3.bf16.msra.mxu0 %v4806_v28 }
 0xabd   :  { %v4836_v60 = vpack.c.bf16 %v5192_v25, %v5191_v38  ;;  %4809 = vmatprep.subr.bf16.mxu0 %v4808_v41  ;;  %v4818_v27 = vpack.c.bf16 %v5217_v11, %v5216_v1  ;;  %v3037_v41 = vld [vmem:[%s7198_s11 + $0x120] sm:$0xff]  ;;  %v3036_v25 = vld [vmem:[%s7198_s11 + $0x118] sm:$0xff]  ;;  %v3042_v38 = vld [vmem:[%s7198_s11 + $0x148] sm:$0xff] }
 0xabe   :  { %v5195_v50 = vpop.permute.xlu1 %5194  ;;  %v5225_v33 = vpop.permute.xlu0 %5224  ;;  %v3054_v11 = vld [vmem:[%s7198_s11 + $0x1a8] sm:$0xff]  ;;  %v3047_v1 = vld [vmem:[%s7198_s11 + $0x170] sm:$0xff] }
 0xabf   :  { %v5197_v16 = vunpack.i.h.bf16 %v5195_v50  ;;  %v5196_v39 = vunpack.i.l.bf16 %v5195_v50  ;;  %4837 = vmatpush1.bf16.msra.mxu1 %v4836_v60  ;;  %v5227_v14 = vunpack.i.h.bf16 %v5225_v33  ;;  %v5226_v21 = vunpack.i.l.bf16 %v5225_v33  ;;  %v3040_v60 = vld [vmem:[%s7198_s11 + $0x138] sm:$0xff]  ;;  %v3039_v50 = vld [vmem:[%s7198_s11 + $0x130] sm:$0xff] }
 0xac0   :  { %4811 = vmatpush3.bf16.msra.mxu0 %v4810_v40  ;;  %4838 = vmatprep.subr.bf16.mxu1 %v5261_v31  ;;  %v3046_v40 = vld [vmem:[%s7198_s11 + $0x168] sm:$0xff]  ;;  %v3056_v33 = vld [vmem:[%s7198_s11 + $0x1b8] sm:$0xff] }
 0xac1   :  { %v4814_v62 = vpack.c.bf16 %v5197_v16, %v5196_v39  ;;  %4813 = vmatprep.subr.bf16.mxu0 %v4812_v63  ;;  %v4845_v52 = vpack.c.bf16 %v5227_v14, %v5226_v21  ;;  %v3045_v63 = vld [vmem:[%s7198_s11 + $0x160] sm:$0xff]  ;;  %v3050_v16 = vld [vmem:[%s7198_s11 + $0x188] sm:$0xff]  ;;  %v3043_v39 = vld [vmem:[%s7198_s11 + $0x150] sm:$0xff] }
 0xac2   :  { %v5210_v12 = vpop.permute.xlu1 %5209 }
 0xac3   :  { %v5212_v28 = vunpack.i.h.bf16 %v5210_v12  ;;  %v5211_v17 = vunpack.i.l.bf16 %v5210_v12  ;;  %4840 = vmatpush1.bf16.msra.mxu1 %v4839_v46  ;;  %v3049_v46 = vld [vmem:[%s7198_s11 + $0x180] sm:$0xff] }
 0xac4   :  { %4815 = vmatpush3.bf16.msra.mxu0 %v4814_v62  ;;  %4841 = vmatprep.subr.bf16.mxu1 %v5261_v31  ;;  %v3048_v62 = vld [vmem:[%s7198_s11 + $0x178] sm:$0xff]  ;;  %v3053_v12 = vld [vmem:[%s7198_s11 + $0x1a0] sm:$0xff] }
 0xac5   :  { %v4816_v49 = vpack.c.bf16 %v5212_v28, %v5211_v17  ;;  %v3052_v28 = vld [vmem:[%s7198_s11 + $0x198] sm:$0xff]  ;;  %v3058_v17 = vld [vmem:[%s7198_s11 + $0x1c8] sm:$0xff] }
 0xac6   :  { %v5220_v45 = vpop.permute.xlu1 %5219 }
 0xac7   :  { %v5222_v53 = vunpack.i.h.bf16 %v5220_v45  ;;  %v5221_v58 = vunpack.i.l.bf16 %v5220_v45  ;;  %4817 = vmatprep.subr.bf16.mxu0 %v4816_v49  ;;  %v3051_v49 = vld [vmem:[%s7198_s11 + $0x190] sm:$0xff] }
 0xac8   :  { %4819 = vmatpush3.bf16.msra.mxu0 %v4818_v27  ;;  %v3057_v27 = vld [vmem:[%s7198_s11 + $0x1c0] sm:$0xff]  ;;  %v3055_v45 = vld [vmem:[%s7198_s11 + $0x1b0] sm:$0xff] }
 0xac9   :  { %v4842_v34 = vpack.c.bf16 %v5222_v53, %v5221_v58  ;;  %4847 = vmatprep.subr.bf16.mxu0 %v5261_v31  ;;  %v3060_v53 = vld [vmem:[%s7198_s11 + $0x1d8] sm:$0xff]  ;;  %v3059_v58 = vld [vmem:[%s7198_s11 + $0x1d0] sm:$0xff]  ;;  %s3949_s11 = sshll.u32 %s5269_s20, 4  ;;  %s3950_s11 = int_to_ptr.vmem [resolvable:$true] %s3949_s11 }
 0xaca   :  { %s5236_s10 = scalar_lea.vmem %s3950_s11, 32  ;;  %p5241_p1 = scmp.lt.s32.totalorder %s3950_s11, %s3950_s11 }
 0xacb   :  { %3262 = vmatmul.mubr.f32.vlgmr.msra.gmra.mrb[110].mxu0 %v3001_v6  ;;  %4843 = vmatpush1.bf16.msra.mxu1 %v4842_v34  ;;  %p5237_p0 = scmp.ne.s32.totalorder %s3950_s11, %s5236_s10  ;;  %p5242_p2 = scmp.lt.s32.totalorder %s5236_s10, %s5236_s10 }
 0xacc   :  { %3266 = vmatprep.mubr.f32.mxu0 %v3006_v42  ;;  %4844 = vmatprep.subr.bf16.mxu1 %v5261_v31 }
 0xacd   :  { %p5243_p3 = por %p5242_p2, %p5241_p1 }
 0xacf   :  { %3267 = vmatmul.mubr.f32.gmra.mrb[112].mxu0 %v3005_v51  ;;  %4846 = vmatpush1.bf16.msra.mxu1 %v4845_v52  ;;  %p5244_p4 = pnand %p5243_p3, %p5237_p0 }
 0xad0   :  { %3271 = vmatprep.mubr.f32.mxu0 %v3010_v56  ;;  %4888 = vmatprep.subr.bf16.mxu1 %v5261_v31 }
 0xad2   :  { %3402 = vmatmul.mubr.f32.vlgmr.msra.gmra.mrb[86].mxu1 %v3003_v59 }
 0xad3   :  { %3272 = vmatmul.mubr.f32.gmra.mrb[114].mxu0 %v3009_v61  ;;  %4089 = vmatprep.mubr.msk.f32.mxu1 %vm3151_vm15, %v3008_v0 }
 0xad4   :  { %3276 = vmatprep.mubr.f32.mxu0 %v3014_v7 }
 0xad6   :  { %3407 = vmatmul.mubr.f32.gmra.mrb[88].mxu1 %v3007_v8  ;;  %v3084_v8 = vpop.permute.xlu0 %3083 }
 0xad7   :  { %3277 = vmatmul.mubr.f32.gmra.mrb[116].mxu0 %v3013_v15  ;;  %4090 = vmatprep.mubr.msk.f32.mxu1 %vm3151_vm15, %v3012_v20  ;;  %v3079_v42 = vpop.permute.xlu1 %3078 }
 0xad8   :  { %3281 = vmatprep.mubr.f32.mxu0 %v3018_v26 }
 0xada   :  { %3412 = vmatmul.mubr.f32.gmra.mrb[90].mxu1 %v3011_v36 }
 0xadb   :  { %3282 = vmatmul.mubr.f32.gmra.mrb[118].mxu0 %v3017_v44  ;;  %4091 = vmatprep.mubr.msk.f32.mxu1 %vm3151_vm15, %v3016_v2 }
 0xadc   :  { %3286 = vmatprep.mubr.f32.mxu0 %v3022_v5 }
 0xade   :  { %3417 = vmatmul.mubr.f32.gmra.mrb[92].mxu1 %v3015_v9  ;;  %v3089_v9 = vpop.permute.xlu1 %3088 }
 0xadf   :  { %3287 = vmatmul.mubr.f32.gmra.mrb[120].mxu0 %v3021_v24  ;;  %4092 = vmatprep.mubr.msk.f32.mxu1 %vm3151_vm15, %v3020_v54 }
 0xae0   :  { %3291 = vmatprep.mubr.f32.mxu0 %v3026_v10 }
 0xae2   :  { %3422 = vmatmul.mubr.f32.gmra.mrb[94].mxu1 %v3019_v13 }
 0xae3   :  { %3292 = vmatmul.mubr.f32.gmra.mrb[122].mxu0 %v3025_v18  ;;  %4093 = vmatprep.mubr.msk.f32.mxu1 %vm3151_vm15, %v3024_v23 }
 0xae4   :  { %3296 = vmatprep.mubr.f32.mxu0 %v3030_v32 }
 0xae6   :  { %3427 = vmatmul.mubr.f32.gmra.mrb[96].mxu1 %v3023_v57 }
 0xae7   :  { %3297 = vmatmul.mubr.f32.gmra.mrb[124].mxu0 %v3029_v3  ;;  %4094 = vmatprep.mubr.msk.f32.mxu1 %vm3151_vm15, %v3028_v30 }
 0xae8   :  { %3301 = vmatprep.mubr.f32.mxu0 %v3034_v37  ;;  %v3094_v37 = vpop.permute.xlu0 %3093 }
 0xaea   :  { %3432 = vmatmul.mubr.f32.gmra.mrb[98].mxu1 %v3027_v47 }
 0xaeb   :  { %3302 = vmatmul.mubr.f32.gmra.mrb[126].mxu0 %v3033_v22  ;;  %4095 = vmatprep.mubr.msk.f32.mxu1 %vm3151_vm15, %v3032_v29 }
 0xaec   :  { %3306 = vmatprep.mubr.f32.mxu0 %v3038_v35 }
 0xaee   :  { %3437 = vmatmul.mubr.f32.gmra.mrb[100].mxu1 %v3031_v43 }
 0xaef   :  { %3307 = vmatmul.mubr.f32.gmra.mrb[128].mxu0 %v3037_v41  ;;  %4096 = vmatprep.mubr.msk.f32.mxu1 %vm3151_vm15, %v3036_v25 }
 0xaf0   :  { %3311 = vmatprep.mubr.f32.mxu0 %v3042_v38  ;;  %v3099_v38 = vpop.permute.xlu1 %3098 }
 0xaf2   :  { %3442 = vmatmul.mubr.f32.gmra.mrb[102].mxu1 %v3035_v48 }
 0xaf3   :  { %3312 = vmatmul.mubr.f32.gmra.mrb[130].mxu0 %v3041_v55  ;;  %4097 = vmatprep.mubr.msk.f32.mxu1 %vm3151_vm15, %v3040_v60 }
 0xaf4   :  { %3316 = vmatprep.mubr.f32.mxu0 %v3046_v40 }
 0xaf6   :  { %3447 = vmatmul.mubr.f32.gmra.mrb[104].mxu1 %v3039_v50 }
 0xaf7   :  { %3317 = vmatmul.mubr.f32.gmra.mrb[132].mxu0 %v3045_v63  ;;  %4098 = vmatprep.mubr.msk.f32.mxu1 %vm3151_vm15, %v3044_v4 }
 0xaf8   :  { %3321 = vmatprep.mubr.f32.mxu0 %v3050_v16 }
 0xafa   :  { %3452 = vmatmul.mubr.f32.gmra.mrb[106].mxu1 %v3043_v39 }
 0xafb   :  { %3322 = vmatmul.mubr.f32.gmra.mrb[134].mxu0 %v3049_v46  ;;  %4099 = vmatprep.mubr.msk.f32.mxu1 %vm3151_vm15, %v3048_v62  ;;  %v3104_v62 = vpop.permute.xlu0 %3103 }
 0xafc   :  { %3326 = vmatprep.mubr.f32.mxu0 %v3054_v11 }
 0xafe   :  { %3457 = vmatmul.mubr.f32.gmra.mrb[108].mxu1 %v3047_v1 }
 0xaff   :  { %3327 = vmatmul.mubr.f32.gmra.mrb[136].mxu0 %v3053_v12  ;;  %4100 = vmatprep.mubr.msk.f32.mxu1 %vm3151_vm15, %v3052_v28 }
 0xb00   :  { %3331 = vmatprep.mubr.f32.mxu0 %v3058_v17 }
 0xb02   :  { %3462 = vmatmul.mubr.f32.gmra.mrb[110].mxu1 %v3051_v49 }
 0xb03   :  { %3332 = vmatmul.mubr.f32.gmra.mrb[138].mxu0 %v3057_v27  ;;  %4101 = vmatprep.mubr.msk.f32.mxu1 %vm3151_vm15, %v3056_v33  ;;  %v3109_v33 = vpop.permute.xlu1 %3108 }
 0xb04   :  { %4499 = vmatprep.mubr.msk.f32.mxu0 %vm5268_vm6, %v5267_v19 }
 0xb06   :  { %3467 = vmatmul.mubr.f32.gmra.mrb[112].mxu1 %v3055_v45 }
 0xb07   :  { %4102 = vmatprep.mubr.msk.f32.mxu1 %vm3151_vm15, %v3060_v53 }
 0xb0a   :  { %3472 = vmatmul.mubr.f32.gmra.mrb[114].mxu1 %v3059_v58 }
 0xb0b   :  { %4561 = vmatprep.mubr.msk.f32.mxu1 %vm5268_vm6, %v5267_v19 }
 0xb9e   :  { %v4227_v6 = vpop.f32.mrb[110].mxu0 }
 0xb9f   :  { %v4228_v14 = vpop.f32.mrb[111].mxu0 }
 0xba0   :  { %v4229_v21 = vadd.f32 %v4228_v14, %v4227_v6 }
 0xba2   :  { %v4230_v34 = vpop.f32.mrb[112].mxu0  ;;  %v3264_v56 = vadd.f32 %v4229_v21, %v3079_v42 }
 0xba3   :  { %v4231_v51 = vpop.f32.mrb[113].mxu0 }
 0xba4   :  { %v4232_v52 = vadd.f32 %v4231_v51, %v4230_v34 }
 0xba5   :  { %v3403_v59 = vpop.f32.mrb[86].mxu1 }
 0xba6   :  { %v3404_v61 = vadd.f32 %v3403_v59, %v3264_v56  ;;  %v4233_v0 = vpop.f32.mrb[114].mxu0  ;;  %v3405_v7 = vpop.f32.mrb[87].mxu1  ;;  %v3269_v26 = vadd.f32 %v4232_v52, %v3084_v8 }
 0xba7   :  { %v4234_v15 = vpop.f32.mrb[115].mxu0  ;;  %v3114_v56 = vpop.permute.xlu0 %3113 }
 0xba8   :  { %v4235_v20 = vadd.f32 %v4234_v15, %v4233_v0  ;;  %v3477_v54 = vmax.f32 %v3404_v61, 0.0 }
 0xba9   :  { %v3408_v36 = vpop.f32.mrb[88].mxu1 }
 0xbaa   :  { %v3409_v44 = vadd.f32 %v3408_v36, %v3269_v26  ;;  %v4236_v2 = vpop.f32.mrb[116].mxu0  ;;  %v3410_v5 = vpop.f32.mrb[89].mxu1  ;;  %v3274_v18 = vadd.f32 %v4235_v20, %v3089_v9 }
 0xbab   :  { %v4237_v24 = vpop.f32.mrb[117].mxu0  ;;  %v3119_v26 = vpop.permute.xlu1 %3118 }
 0xbac   :  { %v3478_v10 = vmax.f32 %v3409_v44, 0.0  ;;  %v4238_v13 = vadd.f32 %v4237_v24, %v4236_v2 }
 0xbad   :  { %v3413_v23 = vpop.f32.mrb[90].mxu1 }
 0xbae   :  { %v4848_v32 = vpack.c.bf16 %v3478_v10, %v3477_v54  ;;  %v3414_v57 = vadd.f32 %v3413_v23, %v3274_v18  ;;  %v4239_v3 = vpop.f32.mrb[118].mxu0  ;;  %v3415_v30 = vpop.f32.mrb[91].mxu1  ;;  %v3279_v29 = vadd.f32 %v4238_v13, %v3094_v37 }
 0xbaf   :  { %v4240_v47 = vpop.f32.mrb[119].mxu0  ;;  %v3124_v23 = vpop.permute.xlu0 %3123 }
 0xbb0   :  { %v4241_v22 = vadd.f32 %v4240_v47, %v4239_v3  ;;  %4849 = vmatpush3.bf16.msra.mxu0 %v4848_v32  ;;  %v3479_v55 = vmax.f32 %v3414_v57, 0.0 }
 0xbb1   :  { %v3418_v35 = vpop.f32.mrb[92].mxu1  ;;  %4850 = vmatprep.subr.bf16.mxu0 %v5261_v31 }
 0xbb2   :  { %v3419_v43 = vadd.f32 %v3418_v35, %v3279_v29  ;;  %v4242_v41 = vpop.f32.mrb[120].mxu0  ;;  %v3420_v25 = vpop.f32.mrb[93].mxu1  ;;  %v3284_v50 = vadd.f32 %v4241_v22, %v3099_v38 }
 0xbb3   :  { %v4243_v48 = vpop.f32.mrb[121].mxu0  ;;  %v3129_v29 = vpop.permute.xlu1 %3128 }
 0xbb4   :  { %v3480_v60 = vmax.f32 %v3419_v43, 0.0  ;;  %v4244_v40 = vadd.f32 %v4243_v48, %v4242_v41 }
 0xbb5   :  { %v3423_v63 = vpop.f32.mrb[94].mxu1 }
 0xbb6   :  { %v4851_v4 = vpack.c.bf16 %v3480_v60, %v3479_v55  ;;  %v3424_v16 = vadd.f32 %v3423_v63, %v3284_v50  ;;  %v4245_v39 = vpop.f32.mrb[122].mxu0  ;;  %v3425_v46 = vpop.f32.mrb[95].mxu1  ;;  %v3289_v12 = vadd.f32 %v4244_v40, %v3104_v62 }
 0xbb7   :  { %v4246_v11 = vpop.f32.mrb[123].mxu0  ;;  %v3134_v63 = vpop.permute.xlu0 %3133 }
 0xbb8   :  { %v4247_v1 = vadd.f32 %v4246_v11, %v4245_v39  ;;  %4852 = vmatpush3.bf16.msra.mxu0 %v4851_v4  ;;  %v3481_v53 = vmax.f32 %v3424_v16, 0.0 }
 0xbb9   :  { %v3428_v28 = vpop.f32.mrb[96].mxu1  ;;  %4853 = vmatprep.subr.bf16.mxu0 %v5261_v31 }
 0xbba   :  { %v3429_v17 = vadd.f32 %v3428_v28, %v3289_v12  ;;  %v4248_v49 = vpop.f32.mrb[124].mxu0  ;;  %v3430_v27 = vpop.f32.mrb[97].mxu1  ;;  %v3294_v14 = vadd.f32 %v4247_v1, %v3109_v33 }
 0xbbb   :  { %v4249_v45 = vpop.f32.mrb[125].mxu0  ;;  %v3139_v12 = vpop.permute.xlu1 %3138 }
 0xbbc   :  { %v3482_v58 = vmax.f32 %v3429_v17, 0.0  ;;  %v4250_v6 = vadd.f32 %v4249_v45, %v4248_v49 }
 0xbbd   :  { %v3433_v21 = vpop.f32.mrb[98].mxu1 }
 0xbbe   :  { %v4854_v34 = vpack.c.bf16 %v3482_v58, %v3481_v53  ;;  %v3434_v42 = vadd.f32 %v3433_v21, %v3294_v14  ;;  %v4251_v51 = vpop.f32.mrb[126].mxu0  ;;  %v3435_v52 = vpop.f32.mrb[99].mxu1  ;;  %v3299_v0 = vadd.f32 %v4250_v6, %v3114_v56 }
 0xbbf   :  { %v4252_v59 = vpop.f32.mrb[127].mxu0  ;;  %v3144_v21 = vpop.permute.xlu0 %3143 }
 0xbc0   :  { %v4253_v61 = vadd.f32 %v4252_v59, %v4251_v51  ;;  %4855 = vmatpush3.bf16.msra.mxu0 %v4854_v34  ;;  %v3483_v44 = vmax.f32 %v3434_v42, 0.0 }
 0xbc1   :  { %v3438_v7 = vpop.f32.mrb[100].mxu1  ;;  %4856 = vmatprep.subr.bf16.mxu0 %v5261_v31 }
 0xbc2   :  { %v3439_v8 = vadd.f32 %v3438_v7, %v3299_v0  ;;  %v4254_v15 = vpop.f32.mrb[128].mxu0  ;;  %v3440_v20 = vpop.f32.mrb[101].mxu1  ;;  %v3304_v9 = vadd.f32 %v4253_v61, %v3119_v26 }
 0xbc3   :  { %v4255_v36 = vpop.f32.mrb[129].mxu0  ;;  %v3149_v61 = vpop.permute.xlu1 %3148 }
 0xbc4   :  { %v3484_v2 = vmax.f32 %v3439_v8, 0.0  ;;  %v4256_v5 = vadd.f32 %v4255_v36, %v4254_v15 }
 0xbc5   :  { %v3443_v24 = vpop.f32.mrb[102].mxu1 }
 0xbc6   :  { %v4857_v54 = vpack.c.bf16 %v3484_v2, %v3483_v44  ;;  %v3444_v10 = vadd.f32 %v3443_v24, %v3304_v9  ;;  %v4257_v13 = vpop.f32.mrb[130].mxu0  ;;  %v3445_v18 = vpop.f32.mrb[103].mxu1  ;;  %v3309_v3 = vadd.f32 %v4256_v5, %v3124_v23  ;;  %v3492_v2 = vld [vmem:[%s7200_s13] sm:$0xff]  ;;  %v3494_v5 = vld [vmem:[%s7200_s13 + $0x10] sm:$0xff]  ;;  %v3495_v9 = vld [vmem:[%s7200_s13 + $0x18] sm:$0xff] }
 0xbc7   :  { %v4258_v32 = vpop.f32.mrb[131].mxu0  ;;  %v3496_v24 = vld [vmem:[%s7200_s13 + $0x20] sm:$0xff]  ;;  %v3501_v23 = vld [vmem:[%s7200_s13 + $0x48] sm:$0xff] }
 0xbc8   :  { %v4259_v57 = vadd.f32 %v4258_v32, %v4257_v13  ;;  %4858 = vmatpush3.bf16.msra.mxu0 %v4857_v54  ;;  %v3485_v43 = vmax.f32 %v3444_v10, 0.0  ;;  %v3497_v54 = vld [vmem:[%s7200_s13 + $0x28] sm:$0xff]  ;;  %v3498_v10 = vld [vmem:[%s7200_s13 + $0x30] sm:$0xff]  ;;  %v3499_v13 = vld [vmem:[%s7200_s13 + $0x38] sm:$0xff] }
 0xbc9   :  { %v3448_v30 = vpop.f32.mrb[104].mxu1  ;;  %4859 = vmatprep.subr.bf16.mxu0 %v5261_v31  ;;  %v3500_v18 = vld [vmem:[%s7200_s13 + $0x40] sm:$0xff]  ;;  %v3502_v32 = vld [vmem:[%s7200_s13 + $0x50] sm:$0xf] }
 0xbca   :  { %v3449_v37 = vadd.f32 %v3448_v30, %v3309_v3  ;;  %v4260_v47 = vpop.f32.mrb[132].mxu0  ;;  %v3450_v22 = vpop.f32.mrb[105].mxu1  ;;  %v3314_v38 = vadd.f32 %v4259_v57, %v3129_v29  ;;  %v3734_v57 = vld [vmem:[%s7202_s15] sm:$0xff] }
 0xbcb   :  { %v4261_v35 = vpop.f32.mrb[133].mxu0  ;;  %v3522_v22 = vpop.permute.xlu1 %3521 }
 0xbcc   :  { %v3486_v41 = vmax.f32 %v3449_v37, 0.0  ;;  %v4262_v25 = vadd.f32 %v4261_v35, %v4260_v47  ;;  %v3517_v37 = vpop.permute.xlu0 %3516 }
 0xbcd   :  { %v3453_v48 = vpop.f32.mrb[106].mxu1 }
 0xbce   :  { %v4860_v55 = vpack.c.bf16 %v3486_v41, %v3485_v43  ;;  %v3454_v60 = vadd.f32 %v3453_v48, %v3314_v38  ;;  %v4263_v40 = vpop.f32.mrb[134].mxu0  ;;  %v3455_v50 = vpop.f32.mrb[107].mxu1  ;;  %v3319_v39 = vadd.f32 %v4262_v25, %v3134_v63 }
 0xbcf   :  { %v4264_v4 = vpop.f32.mrb[135].mxu0 }
 0xbd0   :  { %v4265_v16 = vadd.f32 %v4264_v4, %v4263_v40  ;;  %4861 = vmatpush3.bf16.msra.mxu0 %v4860_v55  ;;  %v3487_v17 = vmax.f32 %v3454_v60, 0.0  ;;  %v3527_v55 = vpop.permute.xlu0 %3526  ;;  %v3532_v40 = vpop.permute.xlu1 %3531 }
 0xbd1   :  { %v3458_v46 = vpop.f32.mrb[108].mxu1  ;;  %4862 = vmatprep.subr.bf16.mxu0 %v5261_v31 }
 0xbd2   :  { %v3459_v62 = vadd.f32 %v3458_v46, %v3319_v39  ;;  %v4266_v11 = vpop.f32.mrb[136].mxu0  ;;  %v3460_v1 = vpop.f32.mrb[109].mxu1  ;;  %v3324_v33 = vadd.f32 %v4265_v16, %v3139_v12 }
 0xbd3   :  { %v4267_v28 = vpop.f32.mrb[137].mxu0 }
 0xbd4   :  { %v3488_v49 = vmax.f32 %v3459_v62, 0.0  ;;  %v4268_v27 = vadd.f32 %v4267_v28, %v4266_v11  ;;  %v3537_v1 = vpop.permute.xlu0 %3536  ;;  %v3542_v28 = vpop.permute.xlu1 %3541 }
 0xbd5   :  { %v3463_v45 = vpop.f32.mrb[110].mxu1 }
 0xbd6   :  { %v4863_v53 = vpack.c.bf16 %v3488_v49, %v3487_v17  ;;  %v3464_v58 = vadd.f32 %v3463_v45, %v3324_v33  ;;  %v4269_v6 = vpop.f32.mrb[138].mxu0  ;;  %v3465_v14 = vpop.f32.mrb[111].mxu1  ;;  %v3329_v51 = vadd.f32 %v4268_v27, %v3144_v21 }
 0xbd7   :  { %v4270_v34 = vpop.f32.mrb[139].mxu0 }
 0xbd8   :  { %v4271_v42 = vadd.f32 %v4270_v34, %v4269_v6  ;;  %4864 = vmatpush3.bf16.msra.mxu0 %v4863_v53  ;;  %v3489_v0 = vmax.f32 %v3464_v58, 0.0  ;;  %v3547_v14 = vpop.permute.xlu0 %3546  ;;  %v3552_v34 = vpop.permute.xlu1 %3551 }
 0xbd9   :  { %v3468_v52 = vpop.f32.mrb[112].mxu1  ;;  %4865 = vmatprep.subr.bf16.mxu0 %v5261_v31  ;;  %v3493_v31 = vld [vmem:[%s7200_s13 + $0x8] sm:$0xff] }
 0xbda   :  { %v3469_v56 = vadd.f32 %v3468_v52, %v3329_v51  ;;  %v3470_v59 = vpop.f32.mrb[113].mxu1  ;;  %v3334_v8 = vadd.f32 %v4271_v42, %v3149_v61 }
 0xbdc   :  { %v3490_v7 = vmax.f32 %v3469_v56, 0.0 }
 0xbdd   :  { %v3473_v15 = vpop.f32.mrb[114].mxu1 }
 0xbde   :  { %v4866_v20 = vpack.c.bf16 %v3490_v7, %v3489_v0  ;;  %v3474_v26 = vadd.f32 %v3473_v15, %v3334_v8  ;;  %v3475_v36 = vpop.f32.mrb[115].mxu1  ;;  %v3557_v8 = vpop.permute.xlu0 %3556 }
 0xbe0   :  { %4867 = vmatpush3.bf16.msra.mxu0 %v4866_v20  ;;  %v3491_v44 = vmax.f32 %v3474_v26, 0.0  ;;  %v3562_v20 = vpop.permute.xlu1 %3561 }
 0xbe1   :  { %4497 = vmatprep.subr.mxu0 %v5267_v19 }
 0xbe4   :  { %4498 = vmatpush3.msra.mxu0 %v3491_v44 }
 0xbe5   :  { %4500 = vmatmul.mubr.msk.f32.vlgmr.msra.gmra.mrb[140].mxu0 %vm3569_vm1, %v3492_v2 }
 0xbe6   :  { %4502 = vmatprep.mubr.msk.f32.mxu0 %vm5268_vm6, %v5267_v19 }
 0xbe9   :  { %4503 = vmatmul.mubr.msk.f32.gmra.mrb[142].mxu0 %vm3569_vm1, %v3493_v31 }
 0xbea   :  { %4505 = vmatprep.mubr.msk.f32.mxu0 %vm5268_vm6, %v5267_v19 }
 0xbed   :  { %4506 = vmatmul.mubr.msk.f32.gmra.mrb[144].mxu0 %vm3569_vm1, %v3494_v5  ;;  %v3567_v5 = vpop.permute.xlu0 %3566 }
 0xbee   :  { %4508 = vmatprep.mubr.msk.f32.mxu0 %vm5268_vm6, %v5267_v19 }
 0xbf1   :  { %4509 = vmatmul.mubr.msk.f32.gmra.mrb[146].mxu0 %vm3569_vm1, %v3495_v9 }
 0xbf2   :  { %4511 = vmatprep.mubr.msk.f32.mxu0 %vm5268_vm6, %v5267_v19 }
 0xbf5   :  { %4512 = vmatmul.mubr.msk.f32.gmra.mrb[148].mxu0 %vm3569_vm1, %v3496_v24 }
 0xbf6   :  { %4514 = vmatprep.mubr.msk.f32.mxu0 %vm5268_vm6, %v5267_v19 }
 0xbf9   :  { %4515 = vmatmul.mubr.msk.f32.gmra.mrb[150].mxu0 %vm3569_vm1, %v3497_v54 }
 0xbfa   :  { %4517 = vmatprep.mubr.msk.f32.mxu0 %vm5268_vm6, %v5267_v19 }
 0xbfd   :  { %4518 = vmatmul.mubr.msk.f32.gmra.mrb[152].mxu0 %vm3569_vm1, %v3498_v10 }
 0xbfe   :  { %4520 = vmatprep.mubr.msk.f32.mxu0 %vm5268_vm6, %v5267_v19 }
 0xc01   :  { %4521 = vmatmul.mubr.msk.f32.gmra.mrb[154].mxu0 %vm3569_vm1, %v3499_v13 }
 0xc02   :  { %4523 = vmatprep.mubr.msk.f32.mxu0 %vm5268_vm6, %v5267_v19 }
 0xc05   :  { %4524 = vmatmul.mubr.msk.f32.gmra.mrb[156].mxu0 %vm3569_vm1, %v3500_v18  ;;  %v3735_v18 = vld [vmem:[%s7202_s15 + $0x8] sm:$0x3] }
 0xc06   :  { %4526 = vmatprep.mubr.msk.f32.mxu0 %vm5268_vm6, %v5267_v19 }
 0xc09   :  { %4527 = vmatmul.mubr.msk.f32.gmra.mrb[158].mxu0 %vm3569_vm1, %v3501_v23  ;;  %v3746_v23 = vpop.permute.xlu0 %3745 }
 0xc0a   :  { %4529 = vmatprep.mubr.msk.f32.mxu0 %vm5268_vm6, %v5267_v19 }
 0xc0d   :  { %4530 = vmatmul.mubr.msk.f32.gmra.mrb[160].mxu0 %vm3569_vm1, %v3502_v32 }
 0xc0e   :  { %4554 = vmatprep.mubr.msk.f32.mxu0 %vm3748_vm2, %v3734_v57  ;;  %v3741_v57 = vpop.permute.xlu1 %3740 }
 0xcb8   :  { %v3669_v3 = vpop.f32.mrb[140].mxu0 }
 0xcb9   :  { %v4501_v30 = vpop.f32.mrb[141].mxu0  ;;  %v3670_v47 = vadd.f32 %v3669_v3, %v3517_v37 }
 0xcbb   :  { %v3723_v43 = vmax.f32 %v3670_v47, 0.0 }
 0xcbc   :  { %v3674_v29 = vpop.f32.mrb[142].mxu0 }
 0xcbd   :  { %v3675_v19 = vadd.f32 %v3674_v29, %v3522_v22  ;;  %v4504_v35 = vpop.f32.mrb[143].mxu0 }
 0xcbf   :  { %v3724_v41 = vmax.f32 %v3675_v19, 0.0 }
 0xcc0   :  { %v3679_v25 = vpop.f32.mrb[144].mxu0 }
 0xcc1   :  { %v4868_v38 = vpack.c.bf16 %v3724_v41, %v3723_v43  ;;  %v4507_v48 = vpop.f32.mrb[145].mxu0  ;;  %v3680_v60 = vadd.f32 %v3679_v25, %v3527_v55 }
 0xcc3   :  { %4869 = vmatprep.subr.bf16.mxu0 %v4868_v38  ;;  %v3725_v16 = vmax.f32 %v3680_v60, 0.0 }
 0xcc4   :  { %v3684_v50 = vpop.f32.mrb[146].mxu0  ;;  %4871 = vmatpush3.bf16.msra.mxu0 %v4868_v38 }
 0xcc5   :  { %v3685_v63 = vadd.f32 %v3684_v50, %v3532_v40  ;;  %v4510_v4 = vpop.f32.mrb[147].mxu0 }
 0xcc7   :  { %v3726_v39 = vmax.f32 %v3685_v63, 0.0 }
 0xcc8   :  { %v3689_v46 = vpop.f32.mrb[148].mxu0 }
 0xcc9   :  { %v4872_v62 = vpack.c.bf16 %v3726_v39, %v3725_v16  ;;  %v4513_v11 = vpop.f32.mrb[149].mxu0  ;;  %v3690_v12 = vadd.f32 %v3689_v46, %v3537_v1 }
 0xccb   :  { %4873 = vmatprep.subr.bf16.mxu0 %v4872_v62  ;;  %v3727_v33 = vmax.f32 %v3690_v12, 0.0 }
 0xccc   :  { %v3694_v17 = vpop.f32.mrb[150].mxu0  ;;  %4875 = vmatpush3.bf16.msra.mxu0 %v4872_v62 }
 0xccd   :  { %v3695_v49 = vadd.f32 %v3694_v17, %v3542_v28  ;;  %v4516_v27 = vpop.f32.mrb[151].mxu0  ;;  %v3861_v28 = vld [vmem:[%s7204_s17] sm:$0x3] }
 0xccf   :  { %v3728_v45 = vmax.f32 %v3695_v49, 0.0 }
 0xcd0   :  { %v3699_v53 = vpop.f32.mrb[152].mxu0 }
 0xcd1   :  { %v4876_v58 = vpack.c.bf16 %v3728_v45, %v3727_v33  ;;  %v4519_v6 = vpop.f32.mrb[153].mxu0  ;;  %v3700_v21 = vadd.f32 %v3699_v53, %v3547_v14 }
 0xcd3   :  { %4877 = vmatprep.subr.bf16.mxu0 %v4876_v58  ;;  %v3729_v56 = vmax.f32 %v3700_v21, 0.0 }
 0xcd4   :  { %v3704_v42 = vpop.f32.mrb[154].mxu0  ;;  %4879 = vmatpush3.bf16.msra.mxu0 %v4876_v58 }
 0xcd5   :  { %v3705_v51 = vadd.f32 %v3704_v42, %v3552_v34  ;;  %v4522_v52 = vpop.f32.mrb[155].mxu0 }
 0xcd7   :  { %v3730_v59 = vmax.f32 %v3705_v51, 0.0 }
 0xcd8   :  { %v3709_v61 = vpop.f32.mrb[156].mxu0 }
 0xcd9   :  { %v4880_v0 = vpack.c.bf16 %v3730_v59, %v3729_v56  ;;  %v4525_v7 = vpop.f32.mrb[157].mxu0  ;;  %v3710_v15 = vadd.f32 %v3709_v61, %v3557_v8 }
 0xcdb   :  { %4881 = vmatprep.subr.bf16.mxu0 %v4880_v0  ;;  %v3731_v2 = vmax.f32 %v3710_v15, 0.0 }
 0xcdc   :  { %v3714_v26 = vpop.f32.mrb[158].mxu0  ;;  %4883 = vmatpush3.bf16.msra.mxu0 %v4880_v0 }
 0xcdd   :  { %v3715_v36 = vadd.f32 %v3714_v26, %v3562_v20  ;;  %v4528_v44 = vpop.f32.mrb[159].mxu0 }
 0xcdf   :  { %v3732_v31 = vmax.f32 %v3715_v36, 0.0 }
 0xce0   :  { %v3719_v9 = vpop.f32.mrb[160].mxu0 }
 0xce1   :  { %v4884_v24 = vpack.c.bf16 %v3732_v31, %v3731_v2  ;;  %v3720_v54 = vadd.f32 %v3719_v9, %v3567_v5  ;;  %v4531_v10 = vpop.f32.mrb[161].mxu0 }
 0xce3   :  { %v3733_v13 = vmax.f32 %v3720_v54, 0.0  ;;  %4885 = vmatprep.subr.bf16.mxu0 %v4884_v24 }
 0xce4   :  { %4887 = vmatpush3.bf16.msra.mxu0 %v4884_v24 }
 0xce5   :  { %4552 = vmatprep.subr.msk.mxu0 %vm91_vm0, %v3733_v13 }
 0xce8   :  { %4553 = vmatpush3.msk.msra.mxu0 %vm91_vm0, %v3733_v13  ;;  %vm4890_vm0 = vmpackc.low %vm3833_vm4, %vm3833_vm4 }
 0xce9   :  { %4555 = vmatmul.mubr.msk.f32.vlgmr.msra.gmra.mrb[162].mxu0 %vm3748_vm2, %v3735_v18 }
 0xdbc   :  { %v4556_v32 = vpop.f32.mrb[162].mxu0 }
 0xdbd   :  { %v3830_v3 = vadd.f32 %v4556_v32, %v3746_v23  ;;  %v3824_v30 = vpop.f32.mrb[163].mxu0 }
 0xdbe   :  { %v3825_v37 = vadd.f32 %v3824_v30, %v3741_v57 }
 0xdbf   :  { %v3838_v47 = vsel %vm3837_vm3, %v3830_v3, -inf }
 0xdc0   :  { %3839 = vmax.xlane.f32.xlu0 %v3838_v47  ;;  %v3834_v22 = vsel %vm3833_vm4, %v3825_v37, -inf }
 0xdc1   :  { %3835 = vmax.xlane.f32.xlu1 %v3834_v22 }
 0xe4d   :  { %v3840_v29 = vpop.xlane.xlu0 %3839 }
 0xe4e   :  { %v3842_v19 = vsub.f32 %v3830_v3, %v3840_v29  ;;  %v3836_v35 = vpop.xlane.xlu1 %3835 }
 0xe4f   :  { %v3841_v43 = vsub.f32 %v3825_v37, %v3836_v35 }
 0xe50   :  { %v3845_v41 = vmul.f32 1.442695, %v3842_v19 }
 0xe51   :  { %v3843_v25 = vmul.f32 1.442695, %v3841_v43 }
 0xe52   :  { %5228 = vpow2.f32 %v3845_v41 }
 0xe53   :  { %5230 = vpow2.f32 %v3843_v25 }
 0xe5c   :  { %v5229_v38 = vpop.eup %5228 }
 0xe5d   :  { %v5231_v48 = vpop.eup %5230  ;;  %v3850_v55 = vsel %vm3837_vm3, %v5229_v38, 0.0 }
 0xe5e   :  { %3851 = vadd.xlane.f32.xlu1 %v3850_v55  ;;  %v3847_v60 = vsel %vm3833_vm4, %v5231_v48, 0.0 }
 0xe5f   :  { %3848 = vadd.xlane.f32.xlu0 %v3847_v60 }
 0xeeb   :  { %v3852_v40 = vpop.xlane.xlu1 %3851 }
 0xeec   :  { %5232 = vlog2.f32 %v3852_v40  ;;  %v3849_v50 = vpop.xlane.xlu0 %3848 }
 0xeed   :  { %5234 = vlog2.f32 %v3849_v50 }
 0xef6   :  { %v5233_v63 = vpop.eup %5232 }
 0xef7   :  { %v5235_v4 = vpop.eup %5234  ;;  %v3856_v16 = vmul.f32 0.6931472, %v5233_v63 }
 0xef8   :  { %v3854_v39 = vmul.f32 0.6931472, %v5235_v4 }
 0xef9   :  { %v3858_v46 = vadd.f32 %v3856_v16, %v3840_v29 }
 0xefa   :  { %v3857_v62 = vadd.f32 %v3854_v39, %v3836_v35 }
 0xefb   :  { %v3860_v11 = vsub.f32 %v3830_v3, %v3858_v46 }
 0xefc   :  { %v3859_v1 = vsub.f32 %v3825_v37, %v3857_v62 }
 0xefe   :  { %v4889_v12 = vpack.c.bf16 %v3860_v11, %v3859_v1 }
 0xf00   :  { %4891 = vmatpush3.bf16.xpose.msk.msra.mxu1 %vm4890_vm0, %v4889_v12 }
 0xf07   :  { %4562 = vmatmul.mubr.msk.f32.vlgmr.msra.gmra.mrb[116].mxu1 %vm3833_vm4, %v3861_v28 }
 0xfda   :  { %v3937_v17 = vpop.f32.mrb[116].mxu1 }
 0xfdb   :  { %3942 = vst.msk [vmem:[#allocation2] sm:$0x3] %vm3941_vm5, %v3937_v17  ;;  %v4563_v49 = vpop.f32.mrb[117].mxu1 }
 0xfdc   :  { %5247 = shalt.err (!%p5244_p4)
}
 0xfdd   :  { %s5248_s17 = scalar_lea.hbm %s7205_s18, 32 }
 0xfde   :  { %p5249_p5 = scmp.ne.s32.totalorder %s7205_s18, %s5248_s17  ;;  %p5252_p6 = scmp.lt.u32.totalorder %s5248_s17, %s7205_s18 }
 0xfe0   :  { %p5254_p7 = pnand %p5252_p6, %p5249_p5 }
 0xfe2   :  { %5257 = shalt.err (!%p5254_p7)
}
 0xfe3   :  { %3952 = dma.vmem_to_hbm [thread:$0]  %s3950_s11, 32, %s7205_s18, [#allocation3]  }
 0xfe4   :  { %5258 = dma.done.wait [#allocation3], 32  }
 0xfe5   :  { %5259 = vsyncadd [#allocation3], 4294967264 }
 0xfe6   :  { %3956 = vsyncpa [#allocation3], 1 }

</bundles_post_ra>
